<compile_context>
chip_gen: v5e
topology: v5e:2x2
jax: 0.10.0
libtpu: 0.0.40
codegen_flags: <defaults>
</compile_context>

<pallas_src>
import jax
import jax.numpy as jnp
from jax import lax
from jax.experimental import pallas as pl
from jax.experimental.pallas import tpu as pltpu

_EPS = 1e-5
_LANE = 128


def _vmem_limit_bytes():
    try:
        cap = int(pltpu.get_tpu_info().vmem_capacity_bytes)
    except Exception:
        cap = 64 * 1024 * 1024
    if cap <= 0:
        cap = 64 * 1024 * 1024
    return min((cap * 3) // 4, 100 * 1024 * 1024)


_VMEM_LIMIT = _vmem_limit_bytes()


def _round_up(x, m):
    return (x + m - 1) // m * m


def _pad_last(a, c_pad):
    c = a.shape[-1]
    if c == c_pad:
        return a
    pad = [(0, 0)] * (a.ndim - 1) + [(0, c_pad - c)]
    return jnp.pad(a, pad)


def _pick_tn(cout_p):
    # prefer 256-wide output tiles (matches v6e/v7x 2x256^2 MXU), else 128
    return 256 if cout_p % 256 == 0 else 128


# --------------------------- BatchNorm statistics ----------------------------
# Tiled reduction over the batch grid axis ("arbitrary" -> resident output).

def _bn_stats_kernel(x_ref, sum_ref, sq_ref):
    @pl.when(pl.program_id(0) == 0)
    def _init():
        sum_ref[...] = jnp.zeros_like(sum_ref)
        sq_ref[...] = jnp.zeros_like(sq_ref)

    x = x_ref[0].astype(jnp.float32)                           # (H, W, C)
    sum_ref[...] += jnp.sum(x, axis=(0, 1), keepdims=True)[0]  # (1, C)
    sq_ref[...] += jnp.sum(x * x, axis=(0, 1), keepdims=True)[0]


def bn_batch_scale_shift(x_nhwc, gamma, beta):
    """Train-mode BatchNorm folded into per-channel (scale, shift), (1, C) f32."""
    n, h, w, c = x_nhwc.shape
    s, sq = pl.pallas_call(
        _bn_stats_kernel,
        grid=(n,),
        in_specs=[pl.BlockSpec((1, h, w, c), lambda i: (i, 0, 0, 0))],
        out_specs=[pl.BlockSpec((1, c), lambda i: (0, 0)),
                   pl.BlockSpec((1, c), lambda i: (0, 0))],
        out_shape=[jax.ShapeDtypeStruct((1, c), jnp.float32),
                   jax.ShapeDtypeStruct((1, c), jnp.float32)],
        compiler_params=pltpu.CompilerParams(
            dimension_semantics=("arbitrary",),
            vmem_limit_bytes=_VMEM_LIMIT),
    )(x_nhwc)
    cnt = float(n * h * w)
    # TODO(synk): E[x^2]-E[x]^2 in f32 can cancel for |mean| >> std at very
    # large N*H*W; a centered second pass would be more robust.
    mean = s / cnt
    var = jnp.maximum(sq / cnt - mean * mean, 0.0)   # biased var, as PyTorch BN
    scale = gamma[None, :] * lax.rsqrt(var + _EPS)
    shift = beta[None, :] - mean * scale
    return scale.astype(jnp.float32), shift.astype(jnp.float32)


# ------ fused BN+ReLU -> 3x3 conv (+ 1x1 shortcut, + residual, + bn stats) ---

def _make_conv3x3_kernel(n_src, place, taps, hp, wp, hout, wout, cin, tn,
                         fuse_add, fuse_sc, emit_stats):
    def kernel(*refs):
        idx = n_src
        src_refs = refs[:n_src]
        w_ref = refs[idx]; idx += 1
        scale_ref = refs[idx]; idx += 1
        shift_ref = refs[idx]; idx += 1
        wsc_ref = None
        if fuse_sc:
            wsc_ref = refs[idx]; idx += 1
        c_ref = None
        if fuse_add:
            c_ref = refs[idx]; idx += 1
        out_ref = refs[idx]; idx += 1
        sum_ref = sq_ref = None
        if emit_stats:
            sum_ref = refs[idx]; sq_ref = refs[idx + 1]; idx += 2
        sc_ref = None
        if fuse_sc:
            sc_ref = refs[idx]; idx += 1
        act_ref = refs[idx]
        taps_ref = refs[idx + 1]

        j = pl.program_id(1)

        # -------- prologue: BN + ReLU + zero conv border, once per batch ----
        @pl.when(j == 0)
        def _prologue():
            scale = scale_ref[...].reshape(1, 1, cin)
            shift = shift_ref[...].reshape(1, 1, cin)
            for si in range(n_src):
                r0, c0 = place[si]
                # zero the slab (covers the 1-wide conv zero border), then
                # write normalized+ReLU'd values into the interior window.
                act_ref[si] = jnp.zeros((hp, wp, cin), jnp.bfloat16)
                a = jnp.maximum(src_refs[si][0] * scale + shift, 0.0)
                act_ref[si, pl.ds(r0, hout), pl.ds(c0, wout), :] = (
                    a.astype(jnp.bfloat16))
            # pre-flatten the 9 tap slabs once -> contiguous matmul operands
            for t, (si, oh, ow) in enumerate(taps):
                taps_ref[t] = act_ref[si, pl.ds(oh, hout),
                                      pl.ds(ow, wout), :].reshape(hout * wout, cin)

        # -------- 9 tap-shifted bf16 MXU matmuls, f32 accumulation ----------
        acc = jnp.zeros((hout * wout, tn), jnp.float32)
        for t in range(9):
            acc = acc + jnp.dot(taps_ref[t],
                                w_ref[j, pl.ds(t * cin, cin), :],
                                preferred_element_type=jnp.float32)

        if emit_stats:  # per-batch partial bn2 statistics of the conv output
            sum_ref[...] = jnp.sum(acc, axis=0, keepdims=True).reshape(1, 1, tn)
            sq_ref[...] = jnp.sum(acc * acc, axis=0,
                                  keepdims=True).reshape(1, 1, tn)

        if fuse_sc:     # 1x1 convShortcut rides tap (1,1) of the activation
            sc = jnp.dot(taps_ref[4], wsc_ref[j],
                         preferred_element_type=jnp.float32)
            sc_ref[0] = sc.reshape(hout, wout, tn)

        if fuse_add:    # fused residual add
            acc = acc + c_ref[0].reshape(hout * wout, tn).astype(jnp.float32)

        out_ref[0] = acc.reshape(hout, wout, tn).astype(out_ref.dtype)

    return kernel


def conv3x3_fused(x_nhwc, w9t, scale, shift, stride, *, shortcut=None,
                  wsc_t=None, emit_stats=False, out_dtype=jnp.float32):
    """relu(x*scale + shift) -> 3x3 conv (stride, pad=1), optionally fused with
    a residual add (shortcut), the 1x1 convShortcut (wsc_t) and per-batch
    partial BN statistics of the conv output.

    x_nhwc: (N, H, W, Cin_pad).  w9t: (cout_tiles, 9*Cin_pad, tn) bf16.
    Returns (out, stats_sum, stats_sq, shortcut_out); unused slots are None.
    """
    n, h, w, cin = x_nhwc.shape
    n_j, nine_cin, tn = w9t.shape
    assert nine_cin == 9 * cin
    cout_p = n_j * tn
    fuse_add = shortcut is not None
    fuse_sc = wsc_t is not None

    if stride == 1:
        hout, wout = h, w
        hp, wp = h + 2, w + 2
        srcs = [x_nhwc]
        place = [(1, 1)]
        taps = [(0, kh, kw) for kh in range(3) for kw in range(3)]
    elif stride == 2:
        assert h % 2 == 0 and w % 2 == 0
        hout, wout = h // 2, w // 2
        hp, wp = hout + 1, wout + 1
        # four parity slabs (plain strided slices, no jnp.pad HBM pass)
        srcs = [x_nhwc[:, (1 - a)::2, (1 - b)::2, :]
                for a in (0, 1) for b in (0, 1)]
        place = [(1 - a, 1 - b) for a in (0, 1) for b in (0, 1)]
        taps = [((kh % 2) * 2 + (kw % 2), kh // 2, kw // 2)
                for kh in range(3) for kw in range(3)]
    else:
        raise NotImplementedError("WideResNet only uses stride 1 or 2")
    n_src = len(srcs)

    kernel = _make_conv3x3_kernel(n_src, place, taps, hp, wp, hout, wout,
                                  cin, tn, fuse_add, fuse_sc, emit_stats)

    in_specs = [pl.BlockSpec((1, hout, wout, cin), lambda i, j: (i, 0, 0, 0))
                for _ in range(n_src)]
    in_specs += [
        # full weight resident in VMEM (constant block index -> fetched once)
        pl.BlockSpec((n_j, 9 * cin, tn), lambda i, j: (0, 0, 0)),
        pl.BlockSpec((1, cin), lambda i, j: (0, 0)),
        pl.BlockSpec((1, cin), lambda i, j: (0, 0)),
    ]
    args = list(srcs) + [w9t, scale, shift]
    if fuse_sc:
        in_specs.append(pl.BlockSpec((n_j, cin, tn), lambda i, j: (0, 0, 0)))
        args.append(wsc_t)
    if fuse_add:
        in_specs.append(pl.BlockSpec((1, hout, wout, tn),
                                     lambda i, j: (i, 0, 0, j)))
        args.append(shortcut)

    out_shapes = [jax.ShapeDtypeStruct((n, hout, wout, cout_p), out_dtype)]
    out_specs = [pl.BlockSpec((1, hout, wout, tn), lambda i, j: (i, 0, 0, j))]
    if emit_stats:
        out_shapes += [jax.ShapeDtypeStruct((n, 1, cout_p), jnp.float32)] * 2
        out_specs += [pl.BlockSpec((1, 1, tn), lambda i, j: (i, 0, j))] * 2
    if fuse_sc:
        out_shapes.append(jax.ShapeDtypeStruct((n, hout, wout, cout_p),
                                               jnp.float32))
        out_specs.append(pl.BlockSpec((1, hout, wout, tn),
                                      lambda i, j: (i, 0, 0, j)))

    flops = 2 * n * hout * wout * 9 * cin * cout_p
    if fuse_sc:
        flops += 2 * n * hout * wout * cin * cout_p
    bytes_accessed = (sum(s.size for s in srcs) * x_nhwc.dtype.itemsize
                      + w9t.size * 2
                      + n * hout * wout * cout_p
                      * (jnp.dtype(out_dtype).itemsize + (4 if fuse_sc else 0))
                      + (shortcut.size * 4 if fuse_add else 0))

    outs = pl.pallas_call(
        kernel,
        grid=(n, n_j),
        in_specs=in_specs,
        out_specs=out_specs,
        out_shape=out_shapes,
        scratch_shapes=[pltpu.VMEM((n_src, hp, wp, cin), jnp.bfloat16),
                        pltpu.VMEM((9, hout * wout, cin), jnp.bfloat16)],
        compiler_params=pltpu.CompilerParams(
            # batch parallel (megacore), cout tiles arbitrary (prologue at j==0)
            dimension_semantics=("parallel", "arbitrary"),
            vmem_limit_bytes=_VMEM_LIMIT),
        cost_estimate=pl.CostEstimate(flops=flops, transcendentals=0,
                                      bytes_accessed=bytes_accessed),
    )(*args)

    out = outs[0]
    k = 1
    s = sq = sc = None
    if emit_stats:
        s, sq = outs[1], outs[2]
        k = 3
    if fuse_sc:
        sc = outs[k]
    return out, s, sq, sc


# --------------------------------- forward -----------------------------------

def _prep_w3x3(w_hwio, cin_p, cout_p, tn):
    _, _, cin, cout = w_hwio.shape
    wpad = jnp.pad(w_hwio, ((0, 0), (0, 0), (0, cin_p - cin), (0, cout_p - cout)))
    # row index = (kh*3 + kw)*cin_p + ci  -- matches the kernel's tap order
    w2d = wpad.reshape(9 * cin_p, cout_p).astype(jnp.bfloat16)
    n_j = cout_p // tn
    return w2d.reshape(9 * cin_p, n_j, tn).transpose(1, 0, 2)   # (n_j, 9cin, tn)


def _prep_w1x1(w_hwio, cin_p, cout_p, tn):
    _, _, cin, cout = w_hwio.shape
    wpad = jnp.pad(w_hwio, ((0, 0), (0, 0), (0, cin_p - cin), (0, cout_p - cout)))
    w2d = wpad.reshape(cin_p, cout_p).astype(jnp.bfloat16)
    n_j = cout_p // tn
    return w2d.reshape(cin_p, n_j, tn).transpose(1, 0, 2)       # (n_j, cin, tn)


def basic_block_forward_nhwc(x_nhwc, params, stride):
    """BasicBlock.forward on NHWC input (NCHW wrapper below matches PyTorch)."""
    n, h, w, cin = x_nhwc.shape
    cout = params["conv1_w"].shape[-1]
    equal_in_out = (cin == cout)
    cin_p = _round_up(cin, _LANE)
    cout_p = _round_up(cout, _LANE)
    tn = _pick_tn(cout_p)

    x = _pad_last(x_nhwc.astype(jnp.float32), cin_p)            # (N, H, W, cin_p)

    w1 = _prep_w3x3(params["conv1_w"], cin_p, cout_p, tn)
    w2 = _prep_w3x3(params["conv2_w"], cout_p, cout_p, tn)
    g1 = _pad_last(params["bn1_g"], cin_p)
    b1 = _pad_last(params["bn1_b"], cin_p)
    g2 = _pad_last(params["bn2_g"], cout_p)
    b2 = _pad_last(params["bn2_b"], cout_p)

    # bn1 (train-mode batch stats) folded to per-channel scale/shift
    scale1, shift1 = bn_batch_scale_shift(x, g1, b1)

    wsc = None
    if not equal_in_out:
        wsc = _prep_w1x1(params["convsc_w"], cin_p, cout_p, tn)

    # conv1: bn1+relu1 fused prologue, bn2 partial stats + convShortcut fused
    # into the epilogue; intermediate activation written bf16.
    out1, sum2, sq2, sc = conv3x3_fused(
        x, w1, scale1, shift1, stride,
        wsc_t=wsc, emit_stats=True, out_dtype=jnp.bfloat16)

    hout, wout = out1.shape[1], out1.shape[2]

    # bn2 folded to scale/shift from the fused per-batch partial statistics
    cnt = float(n * hout * wout)
    mean2 = jnp.sum(sum2, axis=0) / cnt                          # (1, cout_p)
    var2 = jnp.maximum(jnp.sum(sq2, axis=0) / cnt - mean2 * mean2, 0.0)
    scale2 = g2[None, :] * lax.rsqrt(var2 + _EPS)
    shift2 = b2[None, :] - mean2 * scale2

    # shortcut branch (mirrors the torch module's x-rebinding semantics)
    shortcut = x if equal_in_out else sc

    # TODO(synk): dropRate > 0 would need pltpu.prng_* stochastic masking here;
    # the reference module defaults to dropRate=0.0, so dropout is a no-op.

    # conv2: bn2+relu2 fused prologue + residual add fused epilogue
    y, _, _, _ = conv3x3_fused(out1, w2, scale2.astype(jnp.float32),
                               shift2.astype(jnp.float32), 1,
                               shortcut=shortcut, out_dtype=jnp.float32)
    return y[..., :cout]


def basic_block_forward(x_nchw, params, stride):
    x = jnp.transpose(x_nchw, (0, 2, 3, 1))
    y = basic_block_forward_nhwc(x, params, stride)
    return jnp.transpose(y, (0, 3, 1, 2))


# --------------------------- pure-JAX reference ------------------------------

def _ref_forward(x_nchw, params, stride):
    x = jnp.transpose(x_nchw, (0, 2, 3, 1)).astype(jnp.float32)

    def bn_relu(v, g, b):
        m = v.mean(axis=(0, 1, 2), keepdims=True)
        var = ((v - m) ** 2).mean(axis=(0, 1, 2), keepdims=True)
        return jnp.maximum((v - m) * lax.rsqrt(var + _EPS) * g + b, 0.0)

    def conv(v, wgt, s, pad):
        return lax.conv_general_dilated(
            v, wgt, (s, s), pad,
            dimension_numbers=("NHWC", "HWIO", "NHWC"),
            precision=lax.Precision.HIGHEST)

    cin = x.shape[-1]
    cout = params["conv1_w"].shape[-1]
    equal_in_out = (cin == cout)

    act = bn_relu(x, params["bn1_g"], params["bn1_b"])
    out = conv(act, params["conv1_w"], stride, [(1, 1), (1, 1)])
    out = bn_relu(out, params["bn2_g"], params["bn2_b"])
    out = conv(out, params["conv2_w"], 1, [(1, 1), (1, 1)])
    sc = x if equal_in_out else conv(act, params["convsc_w"], stride,
                                     [(0, 0), (0, 0)])
    return jnp.transpose(sc + out, (0, 3, 1, 2))


# ---------------------------------- main -------------------------------------

def _make_params(key, in_planes, out_planes):
    ks = jax.random.split(key, 7)
    params = {
        "bn1_g": jax.random.normal(ks[0], (in_planes,), jnp.float32) * 0.1 + 1.0,
        "bn1_b": jax.random.normal(ks[1], (in_planes,), jnp.float32) * 0.1,
        "conv1_w": jax.random.normal(ks[2], (3, 3, in_planes, out_planes),
                                     jnp.float32) * 0.1,
        "bn2_g": jax.random.normal(ks[3], (out_planes,), jnp.float32) * 0.1 + 1.0,
        "bn2_b": jax.random.normal(ks[4], (out_planes,), jnp.float32) * 0.1,
        "conv2_w": jax.random.normal(ks[5], (3, 3, out_planes, out_planes),
                                     jnp.float32) * 0.1,
    }
    if in_planes != out_planes:
        params["convsc_w"] = jax.random.normal(
            ks[6], (1, 1, in_planes, out_planes), jnp.float32) * 0.1
    return params


if __name__ == "__main__":
    key = jax.random.PRNGKey(0)
    kx, kp1, kp2 = jax.random.split(key, 3)

    x = jax.random.normal(kx, (2, 4, 16, 16), jnp.float32)
    fwd = jax.jit(basic_block_forward, static_argnames=("stride",))

    # Config A: in_planes != out_planes, stride 2 -> fused convShortcut path
    params_a = _make_params(kp1, 4, 8)
    y_a = jax.block_until_ready(fwd(x, params_a, stride=2))
    ref_a = _ref_forward(x, params_a, 2)
    assert y_a.shape == (2, 8, 8, 8), y_a.shape
    # bf16 MXU operands / bf16 intermediate activation -> loose tolerance
    assert jnp.allclose(y_a, ref_a, rtol=2e-2, atol=2e-2), "config A mismatch"

    # Config B: in_planes == out_planes, stride 1 -> identity shortcut path
    params_b = _make_params(kp2, 4, 4)
    y_b = jax.block_until_ready(fwd(x, params_b, stride=1))
    ref_b = _ref_forward(x, params_b, 1)
    assert y_b.shape == (2, 4, 16, 16), y_b.shape
    assert jnp.allclose(y_b, ref_b, rtol=2e-2, atol=2e-2), "config B mismatch"

    print("KERNEL_OK")
</pallas_src>

<mosaic_0001>
module attributes {stable_mosaic.version = 11 : i64} {
  func.func @_bn_stats_kernel(%arg0: i32, %arg1: memref<1x16x16x128xf32, #tpu.memory_space<vmem>>, %arg2: memref<1x128xf32, #tpu.memory_space<vmem>>, %arg3: memref<1x128xf32, #tpu.memory_space<vmem>>) attributes {dimension_semantics = [#tpu.dimension_semantics<arbitrary>], iteration_bounds = array<i64: 2>, scalar_prefetch = 0 : i64, scratch_operands = 0 : i64, tpu.core_type = #tpu.core_type<tc>, window_params = [{transform_indices = @transform_0, window_bounds = array<i64: 1, 16, 16, 128>}, {pipeline_mode = #tpu.pipeline_mode<synchronous>, transform_indices = @transform_1, window_bounds = array<i64: 1, 128>}, {pipeline_mode = #tpu.pipeline_mode<synchronous>, transform_indices = @transform_2, window_bounds = array<i64: 1, 128>}]} {
    %c0_i32 = arith.constant 0 : i32
    %0 = arith.cmpi eq, %arg0, %c0_i32 : i32
    %1 = arith.extui %0 : i1 to i32
    %c0_i32_0 = arith.constant 0 : i32
    %2 = arith.cmpi ne, %1, %c0_i32_0 : i32
    scf.if %2 {
      %cst_13 = arith.constant 0.000000e+00 : f32
      %18 = vector.broadcast %cst_13 : f32 to vector<1x128xf32>
      %c0_14 = arith.constant 0 : index
      %c0_15 = arith.constant 0 : index
      %19 = vector.load %arg2[%c0_14, %c0_15] : memref<1x128xf32, #tpu.memory_space<vmem>>, vector<1x128xf32>
      tpu.vector_store %arg2[%c0_14, %c0_15], %18 {strides = array<i32>} : memref<1x128xf32, #tpu.memory_space<vmem>>, vector<1x128xf32>,
      %cst_16 = arith.constant 0.000000e+00 : f32
      %20 = vector.broadcast %cst_16 : f32 to vector<1x128xf32>
      %c0_17 = arith.constant 0 : index
      %c0_18 = arith.constant 0 : index
      %21 = vector.load %arg3[%c0_17, %c0_18] : memref<1x128xf32, #tpu.memory_space<vmem>>, vector<1x128xf32>
      tpu.vector_store %arg3[%c0_17, %c0_18], %20 {strides = array<i32>} : memref<1x128xf32, #tpu.memory_space<vmem>>, vector<1x128xf32>,
    } else {
    }
    %c0 = arith.constant 0 : index
    %c0_1 = arith.constant 0 : index
    %c0_2 = arith.constant 0 : index
    %c0_3 = arith.constant 0 : index
    %3 = vector.load %arg1[%c0, %c0_1, %c0_2, %c0_3] : memref<1x16x16x128xf32, #tpu.memory_space<vmem>>, vector<1x16x16x128xf32>
    %4 = vector.shape_cast %3 : vector<1x16x16x128xf32> to vector<16x16x128xf32>
    %c0_4 = arith.constant 0 : index
    %c0_5 = arith.constant 0 : index
    %5 = vector.load %arg2[%c0_4, %c0_5] : memref<1x128xf32, #tpu.memory_space<vmem>>, vector<1x128xf32>
    %cst = arith.constant dense<0.000000e+00> : vector<128xf32>
    %6 = vector.multi_reduction <add>, %4, %cst [0, 1] : vector<16x16x128xf32> to vector<128xf32>
    %7 = vector.shape_cast %6 : vector<128xf32> to vector<1x1x128xf32>
    %8 = vector.shape_cast %7 : vector<1x1x128xf32> to vector<1x128xf32>
    %9 = arith.addf %5, %8 : vector<1x128xf32>
    %c0_6 = arith.constant 0 : index
    %c0_7 = arith.constant 0 : index
    %10 = vector.load %arg2[%c0_6, %c0_7] : memref<1x128xf32, #tpu.memory_space<vmem>>, vector<1x128xf32>
    tpu.vector_store %arg2[%c0_6, %c0_7], %9 {strides = array<i32>} : memref<1x128xf32, #tpu.memory_space<vmem>>, vector<1x128xf32>,
    %c0_8 = arith.constant 0 : index
    %c0_9 = arith.constant 0 : index
    %11 = vector.load %arg3[%c0_8, %c0_9] : memref<1x128xf32, #tpu.memory_space<vmem>>, vector<1x128xf32>
    %12 = arith.mulf %4, %4 : vector<16x16x128xf32>
    %cst_10 = arith.constant dense<0.000000e+00> : vector<128xf32>
    %13 = vector.multi_reduction <add>, %12, %cst_10 [0, 1] : vector<16x16x128xf32> to vector<128xf32>
    %14 = vector.shape_cast %13 : vector<128xf32> to vector<1x1x128xf32>
    %15 = vector.shape_cast %14 : vector<1x1x128xf32> to vector<1x128xf32>
    %16 = arith.addf %11, %15 : vector<1x128xf32>
    %c0_11 = arith.constant 0 : index
    %c0_12 = arith.constant 0 : index
    %17 = vector.load %arg3[%c0_11, %c0_12] : memref<1x128xf32, #tpu.memory_space<vmem>>, vector<1x128xf32>
    tpu.vector_store %arg3[%c0_11, %c0_12], %16 {strides = array<i32>} : memref<1x128xf32, #tpu.memory_space<vmem>>, vector<1x128xf32>,
    return
  }
  func.func @transform_0(%arg0: i32) -> (i32, i32, i32, i32) {
    %c0_i32 = arith.constant 0 : i32
    %c0_i32_0 = arith.constant 0 : i32
    %c0_i32_1 = arith.constant 0 : i32
    %c0_i32_2 = arith.constant 0 : i32
    return %arg0, %c0_i32, %c0_i32_0, %c0_i32_1 : i32, i32, i32, i32
  }
  func.func @transform_1(%arg0: i32) -> (i32, i32) {
    %c0_i32 = arith.constant 0 : i32
    %c0_i32_0 = arith.constant 0 : i32
    %c0_i32_1 = arith.constant 0 : i32
    return %c0_i32, %c0_i32_0 : i32, i32
  }
  func.func @transform_2(%arg0: i32) -> (i32, i32) {
    %c0_i32 = arith.constant 0 : i32
    %c0_i32_0 = arith.constant 0 : i32
    %c0_i32_1 = arith.constant 0 : i32
    return %c0_i32, %c0_i32_0 : i32, i32
  }
}

module attributes {stable_mosaic.version = 11 : i64} {
  func.func @kernel(%arg0: i32, %arg1: i32, %arg2: memref<1x8x8x128xf32, #tpu.memory_space<vmem>>, %arg3: memref<1x8x8x128xf32, #tpu.memory_space<vmem>>, %arg4: memref<1x8x8x128xf32, #tpu.memory_space<vmem>>, %arg5: memref<1x8x8x128xf32, #tpu.memory_space<vmem>>, %arg6: memref<1x1152x128xbf16, #tpu.memory_space<vmem>>, %arg7: memref<1x128xf32, #tpu.memory_space<vmem>>, %arg8: memref<1x128xf32, #tpu.memory_space<vmem>>, %arg9: memref<1x128x128xbf16, #tpu.memory_space<vmem>>, %arg10: memref<1x8x8x128xbf16, #tpu.memory_space<vmem>>, %arg11: memref<1x1x128xf32, #tpu.memory_space<vmem>>, %arg12: memref<1x1x128xf32, #tpu.memory_space<vmem>>, %arg13: memref<1x8x8x128xf32, #tpu.memory_space<vmem>>, %arg14: memref<4x9x9x128xbf16, #tpu.memory_space<vmem>>, %arg15: memref<9x64x128xbf16, #tpu.memory_space<vmem>>) attributes {dimension_semantics = [#tpu.dimension_semantics<parallel>, #tpu.dimension_semantics<arbitrary>], iteration_bounds = array<i64: 2, 1>, scalar_prefetch = 0 : i64, scratch_operands = 2 : i64, tpu.core_type = #tpu.core_type<tc>, window_params = [{transform_indices = @transform_0, window_bounds = array<i64: 1, 8, 8, 128>}, {transform_indices = @transform_1, window_bounds = array<i64: 1, 8, 8, 128>}, {transform_indices = @transform_2, window_bounds = array<i64: 1, 8, 8, 128>}, {transform_indices = @transform_3, window_bounds = array<i64: 1, 8, 8, 128>}, {pipeline_mode = #tpu.pipeline_mode<synchronous>, transform_indices = @transform_4, window_bounds = array<i64: 1, 1152, 128>}, {pipeline_mode = #tpu.pipeline_mode<synchronous>, transform_indices = @transform_5, window_bounds = array<i64: 1, 128>}, {pipeline_mode = #tpu.pipeline_mode<synchronous>, transform_indices = @transform_6, window_bounds = array<i64: 1, 128>}, {pipeline_mode = #tpu.pipeline_mode<synchronous>, transform_indices = @transform_7, window_bounds = array<i64: 1, 128, 128>}, {transform_indices = @transform_8, window_bounds = array<i64: 1, 8, 8, 128>}, {transform_indices = @transform_9, window_bounds = array<i64: 1, 1, 128>}, {transform_indices = @transform_10, window_bounds = array<i64: 1, 1, 128>}, {transform_indices = @transform_11, window_bounds = array<i64: 1, 8, 8, 128>}]} {
    %c0_i32 = arith.constant 0 : i32
    %0 = arith.cmpi eq, %arg1, %c0_i32 : i32
    %1 = arith.extui %0 : i1 to i32
    %c0_i32_0 = arith.constant 0 : i32
    %2 = arith.cmpi ne, %1, %c0_i32_0 : i32
    scf.if %2 {
      %c0_60 = arith.constant 0 : index
      %c0_61 = arith.constant 0 : index
      %91 = vector.load %arg7[%c0_60, %c0_61] : memref<1x128xf32, #tpu.memory_space<vmem>>, vector<1x128xf32>
      %92 = vector.shape_cast %91 : vector<1x128xf32> to vector<1x1x128xf32>
      %c0_62 = arith.constant 0 : index
      %c0_63 = arith.constant 0 : index
      %93 = vector.load %arg8[%c0_62, %c0_63] : memref<1x128xf32, #tpu.memory_space<vmem>>, vector<1x128xf32>
      %94 = vector.shape_cast %93 : vector<1x128xf32> to vector<1x1x128xf32>
      %cst_64 = arith.constant 0.000000e+00 : bf16
      %95 = vector.broadcast %cst_64 : bf16 to vector<9x9x128xbf16>
      %c0_65 = arith.constant 0 : index
      %c0_66 = arith.constant 0 : index
      %c0_67 = arith.constant 0 : index
      %c0_68 = arith.constant 0 : index
      %96 = vector.load %arg14[%c0_65, %c0_66, %c0_67, %c0_68] : memref<4x9x9x128xbf16, #tpu.memory_space<vmem>>, vector<1x9x9x128xbf16>
      %97 = vector.shape_cast %96 : vector<1x9x9x128xbf16> to vector<9x9x128xbf16>
      %98 = vector.shape_cast %95 : vector<9x9x128xbf16> to vector<1x9x9x128xbf16>
      tpu.vector_store %arg14[%c0_65, %c0_66, %c0_67, %c0_68], %98 {strides = array<i32>} : memref<4x9x9x128xbf16, #tpu.memory_space<vmem>>, vector<1x9x9x128xbf16>,
      %c0_69 = arith.constant 0 : index
      %c0_70 = arith.constant 0 : index
      %c0_71 = arith.constant 0 : index
      %c0_72 = arith.constant 0 : index
      %99 = vector.load %arg2[%c0_69, %c0_70, %c0_71, %c0_72] : memref<1x8x8x128xf32, #tpu.memory_space<vmem>>, vector<1x8x8x128xf32>
      %100 = vector.shape_cast %99 : vector<1x8x8x128xf32> to vector<8x8x128xf32>
      %101 = vector.broadcast %92 : vector<1x1x128xf32> to vector<8x8x128xf32>
      %102 = arith.mulf %100, %101 : vector<8x8x128xf32>
      %103 = vector.broadcast %94 : vector<1x1x128xf32> to vector<8x8x128xf32>
      %104 = arith.addf %102, %103 : vector<8x8x128xf32>
      %cst_73 = arith.constant 0.000000e+00 : f32
      %105 = vector.broadcast %cst_73 : f32 to vector<8x8x128xf32>
      %106 = arith.maximumf %104, %105 : vector<8x8x128xf32>
      %107 = arith.truncf %106 : vector<8x8x128xf32> to vector<8x8x128xbf16>
      %c0_74 = arith.constant 0 : index
      %c1_75 = arith.constant 1 : index
      %c1_76 = arith.constant 1 : index
      %c0_77 = arith.constant 0 : index
      %108 = vector.load %arg14[%c0_74, %c1_75, %c1_76, %c0_77] : memref<4x9x9x128xbf16, #tpu.memory_space<vmem>>, vector<1x8x8x128xbf16>
      %109 = vector.shape_cast %108 : vector<1x8x8x128xbf16> to vector<8x8x128xbf16>
      %110 = vector.shape_cast %107 : vector<8x8x128xbf16> to vector<1x8x8x128xbf16>
      tpu.vector_store %arg14[%c0_74, %c1_75, %c1_76, %c0_77], %110 {strides = array<i32>} : memref<4x9x9x128xbf16, #tpu.memory_space<vmem>>, vector<1x8x8x128xbf16>,
      %cst_78 = arith.constant 0.000000e+00 : bf16
      %111 = vector.broadcast %cst_78 : bf16 to vector<9x9x128xbf16>
      %c1_79 = arith.constant 1 : index
      %c0_80 = arith.constant 0 : index
      %c0_81 = arith.constant 0 : index
      %c0_82 = arith.constant 0 : index
      %112 = vector.load %arg14[%c1_79, %c0_80, %c0_81, %c0_82] : memref<4x9x9x128xbf16, #tpu.memory_space<vmem>>, vector<1x9x9x128xbf16>
      %113 = vector.shape_cast %112 : vector<1x9x9x128xbf16> to vector<9x9x128xbf16>
      %114 = vector.shape_cast %111 : vector<9x9x128xbf16> to vector<1x9x9x128xbf16>
      tpu.vector_store %arg14[%c1_79, %c0_80, %c0_81, %c0_82], %114 {strides = array<i32>} : memref<4x9x9x128xbf16, #tpu.memory_space<vmem>>, vector<1x9x9x128xbf16>,
      %c0_83 = arith.constant 0 : index
      %c0_84 = arith.constant 0 : index
      %c0_85 = arith.constant 0 : index
      %c0_86 = arith.constant 0 : index
      %115 = vector.load %arg3[%c0_83, %c0_84, %c0_85, %c0_86] : memref<1x8x8x128xf32, #tpu.memory_space<vmem>>, vector<1x8x8x128xf32>
      %116 = vector.shape_cast %115 : vector<1x8x8x128xf32> to vector<8x8x128xf32>
      %117 = vector.broadcast %92 : vector<1x1x128xf32> to vector<8x8x128xf32>
      %118 = arith.mulf %116, %117 : vector<8x8x128xf32>
      %119 = vector.broadcast %94 : vector<1x1x128xf32> to vector<8x8x128xf32>
      %120 = arith.addf %118, %119 : vector<8x8x128xf32>
      %cst_87 = arith.constant 0.000000e+00 : f32
      %121 = vector.broadcast %cst_87 : f32 to vector<8x8x128xf32>
      %122 = arith.maximumf %120, %121 : vector<8x8x128xf32>
      %123 = arith.truncf %122 : vector<8x8x128xf32> to vector<8x8x128xbf16>
      %c1_88 = arith.constant 1 : index
      %c1_89 = arith.constant 1 : index
      %c0_90 = arith.constant 0 : index
      %c0_91 = arith.constant 0 : index
      %124 = vector.load %arg14[%c1_88, %c1_89, %c0_90, %c0_91] : memref<4x9x9x128xbf16, #tpu.memory_space<vmem>>, vector<1x8x8x128xbf16>
      %125 = vector.shape_cast %124 : vector<1x8x8x128xbf16> to vector<8x8x128xbf16>
      %126 = vector.shape_cast %123 : vector<8x8x128xbf16> to vector<1x8x8x128xbf16>
      tpu.vector_store %arg14[%c1_88, %c1_89, %c0_90, %c0_91], %126 {strides = array<i32>} : memref<4x9x9x128xbf16, #tpu.memory_space<vmem>>, vector<1x8x8x128xbf16>,
      %cst_92 = arith.constant 0.000000e+00 : bf16
      %127 = vector.broadcast %cst_92 : bf16 to vector<9x9x128xbf16>
      %c2_93 = arith.constant 2 : index
      %c0_94 = arith.constant 0 : index
      %c0_95 = arith.constant 0 : index
      %c0_96 = arith.constant 0 : index
      %128 = vector.load %arg14[%c2_93, %c0_94, %c0_95, %c0_96] : memref<4x9x9x128xbf16, #tpu.memory_space<vmem>>, vector<1x9x9x128xbf16>
      %129 = vector.shape_cast %128 : vector<1x9x9x128xbf16> to vector<9x9x128xbf16>
      %130 = vector.shape_cast %127 : vector<9x9x128xbf16> to vector<1x9x9x128xbf16>
      tpu.vector_store %arg14[%c2_93, %c0_94, %c0_95, %c0_96], %130 {strides = array<i32>} : memref<4x9x9x128xbf16, #tpu.memory_space<vmem>>, vector<1x9x9x128xbf16>,
      %c0_97 = arith.constant 0 : index
      %c0_98 = arith.constant 0 : index
      %c0_99 = arith.constant 0 : index
      %c0_100 = arith.constant 0 : index
      %131 = vector.load %arg4[%c0_97, %c0_98, %c0_99, %c0_100] : memref<1x8x8x128xf32, #tpu.memory_space<vmem>>, vector<1x8x8x128xf32>
      %132 = vector.shape_cast %131 : vector<1x8x8x128xf32> to vector<8x8x128xf32>
      %133 = vector.broadcast %92 : vector<1x1x128xf32> to vector<8x8x128xf32>
      %134 = arith.mulf %132, %133 : vector<8x8x128xf32>
      %135 = vector.broadcast %94 : vector<1x1x128xf32> to vector<8x8x128xf32>
      %136 = arith.addf %134, %135 : vector<8x8x128xf32>
      %cst_101 = arith.constant 0.000000e+00 : f32
      %137 = vector.broadcast %cst_101 : f32 to vector<8x8x128xf32>
      %138 = arith.maximumf %136, %137 : vector<8x8x128xf32>
      %139 = arith.truncf %138 : vector<8x8x128xf32> to vector<8x8x128xbf16>
      %c2_102 = arith.constant 2 : index
      %c0_103 = arith.constant 0 : index
      %c1_104 = arith.constant 1 : index
      %c0_105 = arith.constant 0 : index
      %140 = vector.load %arg14[%c2_102, %c0_103, %c1_104, %c0_105] : memref<4x9x9x128xbf16, #tpu.memory_space<vmem>>, vector<1x8x8x128xbf16>
      %141 = vector.shape_cast %140 : vector<1x8x8x128xbf16> to vector<8x8x128xbf16>
      %142 = vector.shape_cast %139 : vector<8x8x128xbf16> to vector<1x8x8x128xbf16>
      tpu.vector_store %arg14[%c2_102, %c0_103, %c1_104, %c0_105], %142 {strides = array<i32>} : memref<4x9x9x128xbf16, #tpu.memory_space<vmem>>, vector<1x8x8x128xbf16>,
      %cst_106 = arith.constant 0.000000e+00 : bf16
      %143 = vector.broadcast %cst_106 : bf16 to vector<9x9x128xbf16>
      %c3_107 = arith.constant 3 : index
      %c0_108 = arith.constant 0 : index
      %c0_109 = arith.constant 0 : index
      %c0_110 = arith.constant 0 : index
      %144 = vector.load %arg14[%c3_107, %c0_108, %c0_109, %c0_110] : memref<4x9x9x128xbf16, #tpu.memory_space<vmem>>, vector<1x9x9x128xbf16>
      %145 = vector.shape_cast %144 : vector<1x9x9x128xbf16> to vector<9x9x128xbf16>
      %146 = vector.shape_cast %143 : vector<9x9x128xbf16> to vector<1x9x9x128xbf16>
      tpu.vector_store %arg14[%c3_107, %c0_108, %c0_109, %c0_110], %146 {strides = array<i32>} : memref<4x9x9x128xbf16, #tpu.memory_space<vmem>>, vector<1x9x9x128xbf16>,
      %c0_111 = arith.constant 0 : index
      %c0_112 = arith.constant 0 : index
      %c0_113 = arith.constant 0 : index
      %c0_114 = arith.constant 0 : index
      %147 = vector.load %arg5[%c0_111, %c0_112, %c0_113, %c0_114] : memref<1x8x8x128xf32, #tpu.memory_space<vmem>>, vector<1x8x8x128xf32>
      %148 = vector.shape_cast %147 : vector<1x8x8x128xf32> to vector<8x8x128xf32>
      %149 = vector.broadcast %92 : vector<1x1x128xf32> to vector<8x8x128xf32>
      %150 = arith.mulf %148, %149 : vector<8x8x128xf32>
      %151 = vector.broadcast %94 : vector<1x1x128xf32> to vector<8x8x128xf32>
      %152 = arith.addf %150, %151 : vector<8x8x128xf32>
      %cst_115 = arith.constant 0.000000e+00 : f32
      %153 = vector.broadcast %cst_115 : f32 to vector<8x8x128xf32>
      %154 = arith.maximumf %152, %153 : vector<8x8x128xf32>
      %155 = arith.truncf %154 : vector<8x8x128xf32> to vector<8x8x128xbf16>
      %c3_116 = arith.constant 3 : index
      %c0_117 = arith.constant 0 : index
      %c0_118 = arith.constant 0 : index
      %c0_119 = arith.constant 0 : index
      %156 = vector.load %arg14[%c3_116, %c0_117, %c0_118, %c0_119] : memref<4x9x9x128xbf16, #tpu.memory_space<vmem>>, vector<1x8x8x128xbf16>
      %157 = vector.shape_cast %156 : vector<1x8x8x128xbf16> to vector<8x8x128xbf16>
      %158 = vector.shape_cast %155 : vector<8x8x128xbf16> to vector<1x8x8x128xbf16>
      tpu.vector_store %arg14[%c3_116, %c0_117, %c0_118, %c0_119], %158 {strides = array<i32>} : memref<4x9x9x128xbf16, #tpu.memory_space<vmem>>, vector<1x8x8x128xbf16>,
      %c0_120 = arith.constant 0 : index
      %c0_121 = arith.constant 0 : index
      %c0_122 = arith.constant 0 : index
      %c0_123 = arith.constant 0 : index
      %159 = vector.load %arg14[%c0_120, %c0_121, %c0_122, %c0_123] : memref<4x9x9x128xbf16, #tpu.memory_space<vmem>>, vector<1x8x8x128xbf16>
      %160 = vector.shape_cast %159 : vector<1x8x8x128xbf16> to vector<8x8x128xbf16>
      %161 = vector.shape_cast %160 : vector<8x8x128xbf16> to vector<64x128xbf16>
      %c0_124 = arith.constant 0 : index
      %c0_125 = arith.constant 0 : index
      %c0_126 = arith.constant 0 : index
      %162 = vector.load %arg15[%c0_124, %c0_125, %c0_126] : memref<9x64x128xbf16, #tpu.memory_space<vmem>>, vector<1x64x128xbf16>
      %163 = vector.shape_cast %162 : vector<1x64x128xbf16> to vector<64x128xbf16>
      %164 = vector.shape_cast %161 : vector<64x128xbf16> to vector<1x64x128xbf16>
      tpu.vector_store %arg15[%c0_124, %c0_125, %c0_126], %164 {strides = array<i32>} : memref<9x64x128xbf16, #tpu.memory_space<vmem>>, vector<1x64x128xbf16>,
      %c1_127 = arith.constant 1 : index
      %c0_128 = arith.constant 0 : index
      %c0_129 = arith.constant 0 : index
      %c0_130 = arith.constant 0 : index
      %165 = vector.load %arg14[%c1_127, %c0_128, %c0_129, %c0_130] : memref<4x9x9x128xbf16, #tpu.memory_space<vmem>>, vector<1x8x8x128xbf16>
      %166 = vector.shape_cast %165 : vector<1x8x8x128xbf16> to vector<8x8x128xbf16>
      %167 = vector.shape_cast %166 : vector<8x8x128xbf16> to vector<64x128xbf16>
      %c1_131 = arith.constant 1 : index
      %c0_132 = arith.constant 0 : index
      %c0_133 = arith.constant 0 : index
      %168 = vector.load %arg15[%c1_131, %c0_132, %c0_133] : memref<9x64x128xbf16, #tpu.memory_space<vmem>>, vector<1x64x128xbf16>
      %169 = vector.shape_cast %168 : vector<1x64x128xbf16> to vector<64x128xbf16>
      %170 = vector.shape_cast %167 : vector<64x128xbf16> to vector<1x64x128xbf16>
      tpu.vector_store %arg15[%c1_131, %c0_132, %c0_133], %170 {strides = array<i32>} : memref<9x64x128xbf16, #tpu.memory_space<vmem>>, vector<1x64x128xbf16>,
      %c0_134 = arith.constant 0 : index
      %c0_135 = arith.constant 0 : index
      %c1_136 = arith.constant 1 : index
      %c0_137 = arith.constant 0 : index
      %171 = vector.load %arg14[%c0_134, %c0_135, %c1_136, %c0_137] : memref<4x9x9x128xbf16, #tpu.memory_space<vmem>>, vector<1x8x8x128xbf16>
      %172 = vector.shape_cast %171 : vector<1x8x8x128xbf16> to vector<8x8x128xbf16>
      %173 = vector.shape_cast %172 : vector<8x8x128xbf16> to vector<64x128xbf16>
      %c2_138 = arith.constant 2 : index
      %c0_139 = arith.constant 0 : index
      %c0_140 = arith.constant 0 : index
      %174 = vector.load %arg15[%c2_138, %c0_139, %c0_140] : memref<9x64x128xbf16, #tpu.memory_space<vmem>>, vector<1x64x128xbf16>
      %175 = vector.shape_cast %174 : vector<1x64x128xbf16> to vector<64x128xbf16>
      %176 = vector.shape_cast %173 : vector<64x128xbf16> to vector<1x64x128xbf16>
      tpu.vector_store %arg15[%c2_138, %c0_139, %c0_140], %176 {strides = array<i32>} : memref<9x64x128xbf16, #tpu.memory_space<vmem>>, vector<1x64x128xbf16>,
      %c2_141 = arith.constant 2 : index
      %c0_142 = arith.constant 0 : index
      %c0_143 = arith.constant 0 : index
      %c0_144 = arith.constant 0 : index
      %177 = vector.load %arg14[%c2_141, %c0_142, %c0_143, %c0_144] : memref<4x9x9x128xbf16, #tpu.memory_space<vmem>>, vector<1x8x8x128xbf16>
      %178 = vector.shape_cast %177 : vector<1x8x8x128xbf16> to vector<8x8x128xbf16>
      %179 = vector.shape_cast %178 : vector<8x8x128xbf16> to vector<64x128xbf16>
      %c3_145 = arith.constant 3 : index
      %c0_146 = arith.constant 0 : index
      %c0_147 = arith.constant 0 : index
      %180 = vector.load %arg15[%c3_145, %c0_146, %c0_147] : memref<9x64x128xbf16, #tpu.memory_space<vmem>>, vector<1x64x128xbf16>
      %181 = vector.shape_cast %180 : vector<1x64x128xbf16> to vector<64x128xbf16>
      %182 = vector.shape_cast %179 : vector<64x128xbf16> to vector<1x64x128xbf16>
      tpu.vector_store %arg15[%c3_145, %c0_146, %c0_147], %182 {strides = array<i32>} : memref<9x64x128xbf16, #tpu.memory_space<vmem>>, vector<1x64x128xbf16>,
      %c3_148 = arith.constant 3 : index
      %c0_149 = arith.constant 0 : index
      %c0_150 = arith.constant 0 : index
      %c0_151 = arith.constant 0 : index
      %183 = vector.load %arg14[%c3_148, %c0_149, %c0_150, %c0_151] : memref<4x9x9x128xbf16, #tpu.memory_space<vmem>>, vector<1x8x8x128xbf16>
      %184 = vector.shape_cast %183 : vector<1x8x8x128xbf16> to vector<8x8x128xbf16>
      %185 = vector.shape_cast %184 : vector<8x8x128xbf16> to vector<64x128xbf16>
      %c4_152 = arith.constant 4 : index
      %c0_153 = arith.constant 0 : index
      %c0_154 = arith.constant 0 : index
      %186 = vector.load %arg15[%c4_152, %c0_153, %c0_154] : memref<9x64x128xbf16, #tpu.memory_space<vmem>>, vector<1x64x128xbf16>
      %187 = vector.shape_cast %186 : vector<1x64x128xbf16> to vector<64x128xbf16>
      %188 = vector.shape_cast %185 : vector<64x128xbf16> to vector<1x64x128xbf16>
      tpu.vector_store %arg15[%c4_152, %c0_153, %c0_154], %188 {strides = array<i32>} : memref<9x64x128xbf16, #tpu.memory_space<vmem>>, vector<1x64x128xbf16>,
      %c2_155 = arith.constant 2 : index
      %c0_156 = arith.constant 0 : index
      %c1_157 = arith.constant 1 : index
      %c0_158 = arith.constant 0 : index
      %189 = vector.load %arg14[%c2_155, %c0_156, %c1_157, %c0_158] : memref<4x9x9x128xbf16, #tpu.memory_space<vmem>>, vector<1x8x8x128xbf16>
      %190 = vector.shape_cast %189 : vector<1x8x8x128xbf16> to vector<8x8x128xbf16>
      %191 = vector.shape_cast %190 : vector<8x8x128xbf16> to vector<64x128xbf16>
      %c5_159 = arith.constant 5 : index
      %c0_160 = arith.constant 0 : index
      %c0_161 = arith.constant 0 : index
      %192 = vector.load %arg15[%c5_159, %c0_160, %c0_161] : memref<9x64x128xbf16, #tpu.memory_space<vmem>>, vector<1x64x128xbf16>
      %193 = vector.shape_cast %192 : vector<1x64x128xbf16> to vector<64x128xbf16>
      %194 = vector.shape_cast %191 : vector<64x128xbf16> to vector<1x64x128xbf16>
      tpu.vector_store %arg15[%c5_159, %c0_160, %c0_161], %194 {strides = array<i32>} : memref<9x64x128xbf16, #tpu.memory_space<vmem>>, vector<1x64x128xbf16>,
      %c0_162 = arith.constant 0 : index
      %c1_163 = arith.constant 1 : index
      %c0_164 = arith.constant 0 : index
      %c0_165 = arith.constant 0 : index
      %195 = vector.load %arg14[%c0_162, %c1_163, %c0_164, %c0_165] : memref<4x9x9x128xbf16, #tpu.memory_space<vmem>>, vector<1x8x8x128xbf16>
      %196 = vector.shape_cast %195 : vector<1x8x8x128xbf16> to vector<8x8x128xbf16>
      %197 = vector.shape_cast %196 : vector<8x8x128xbf16> to vector<64x128xbf16>
      %c6_166 = arith.constant 6 : index
      %c0_167 = arith.constant 0 : index
      %c0_168 = arith.constant 0 : index
      %198 = vector.load %arg15[%c6_166, %c0_167, %c0_168] : memref<9x64x128xbf16, #tpu.memory_space<vmem>>, vector<1x64x128xbf16>
      %199 = vector.shape_cast %198 : vector<1x64x128xbf16> to vector<64x128xbf16>
      %200 = vector.shape_cast %197 : vector<64x128xbf16> to vector<1x64x128xbf16>
      tpu.vector_store %arg15[%c6_166, %c0_167, %c0_168], %200 {strides = array<i32>} : memref<9x64x128xbf16, #tpu.memory_space<vmem>>, vector<1x64x128xbf16>,
      %c1_169 = arith.constant 1 : index
      %c1_170 = arith.constant 1 : index
      %c0_171 = arith.constant 0 : index
      %c0_172 = arith.constant 0 : index
      %201 = vector.load %arg14[%c1_169, %c1_170, %c0_171, %c0_172] : memref<4x9x9x128xbf16, #tpu.memory_space<vmem>>, vector<1x8x8x128xbf16>
      %202 = vector.shape_cast %201 : vector<1x8x8x128xbf16> to vector<8x8x128xbf16>
      %203 = vector.shape_cast %202 : vector<8x8x128xbf16> to vector<64x128xbf16>
      %c7_173 = arith.constant 7 : index
      %c0_174 = arith.constant 0 : index
      %c0_175 = arith.constant 0 : index
      %204 = vector.load %arg15[%c7_173, %c0_174, %c0_175] : memref<9x64x128xbf16, #tpu.memory_space<vmem>>, vector<1x64x128xbf16>
      %205 = vector.shape_cast %204 : vector<1x64x128xbf16> to vector<64x128xbf16>
      %206 = vector.shape_cast %203 : vector<64x128xbf16> to vector<1x64x128xbf16>
      tpu.vector_store %arg15[%c7_173, %c0_174, %c0_175], %206 {strides = array<i32>} : memref<9x64x128xbf16, #tpu.memory_space<vmem>>, vector<1x64x128xbf16>,
      %c0_176 = arith.constant 0 : index
      %c1_177 = arith.constant 1 : index
      %c1_178 = arith.constant 1 : index
      %c0_179 = arith.constant 0 : index
      %207 = vector.load %arg14[%c0_176, %c1_177, %c1_178, %c0_179] : memref<4x9x9x128xbf16, #tpu.memory_space<vmem>>, vector<1x8x8x128xbf16>
      %208 = vector.shape_cast %207 : vector<1x8x8x128xbf16> to vector<8x8x128xbf16>
      %209 = vector.shape_cast %208 : vector<8x8x128xbf16> to vector<64x128xbf16>
      %c8_180 = arith.constant 8 : index
      %c0_181 = arith.constant 0 : index
      %c0_182 = arith.constant 0 : index
      %210 = vector.load %arg15[%c8_180, %c0_181, %c0_182] : memref<9x64x128xbf16, #tpu.memory_space<vmem>>, vector<1x64x128xbf16>
      %211 = vector.shape_cast %210 : vector<1x64x128xbf16> to vector<64x128xbf16>
      %212 = vector.shape_cast %209 : vector<64x128xbf16> to vector<1x64x128xbf16>
      tpu.vector_store %arg15[%c8_180, %c0_181, %c0_182], %212 {strides = array<i32>} : memref<9x64x128xbf16, #tpu.memory_space<vmem>>, vector<1x64x128xbf16>,
    } else {
    }
    %cst = arith.constant 0.000000e+00 : f32
    %3 = vector.broadcast %cst : f32 to vector<64x128xf32>
    %c0 = arith.constant 0 : index
    %c0_1 = arith.constant 0 : index
    %c0_2 = arith.constant 0 : index
    %4 = vector.load %arg15[%c0, %c0_1, %c0_2] : memref<9x64x128xbf16, #tpu.memory_space<vmem>>, vector<1x64x128xbf16>
    %5 = vector.shape_cast %4 : vector<1x64x128xbf16> to vector<64x128xbf16>
    %6 = arith.index_cast %arg1 : i32 to index
    %c0_3 = arith.constant 0 : index
    %c0_4 = arith.constant 0 : index
    %7 = vector.load %arg6[%6, %c0_3, %c0_4] : memref<1x1152x128xbf16, #tpu.memory_space<vmem>>, vector<1x128x128xbf16>
    %8 = vector.shape_cast %7 : vector<1x128x128xbf16> to vector<128x128xbf16>
    %cst_5 = arith.constant dense<0.000000e+00> : vector<64x128xf32>
    %9 = tpu.matmul %5, %8, %cst_5 {dimension_numbers = #tpu.dot_dimension_numbers<[1], [0], [0], [1], [0, 0, 1, 1], [], []>} : vector<64x128xbf16>, vector<128x128xbf16>, vector<64x128xf32> -> vector<64x128xf32>
    %10 = arith.addf %3, %9 : vector<64x128xf32>
    %c1 = arith.constant 1 : index
    %c0_6 = arith.constant 0 : index
    %c0_7 = arith.constant 0 : index
    %11 = vector.load %arg15[%c1, %c0_6, %c0_7] : memref<9x64x128xbf16, #tpu.memory_space<vmem>>, vector<1x64x128xbf16>
    %12 = vector.shape_cast %11 : vector<1x64x128xbf16> to vector<64x128xbf16>
    %13 = arith.index_cast %arg1 : i32 to index
    %c128 = arith.constant 128 : index
    %c0_8 = arith.constant 0 : index
    %14 = vector.load %arg6[%13, %c128, %c0_8] : memref<1x1152x128xbf16, #tpu.memory_space<vmem>>, vector<1x128x128xbf16>
    %15 = vector.shape_cast %14 : vector<1x128x128xbf16> to vector<128x128xbf16>
    %cst_9 = arith.constant dense<0.000000e+00> : vector<64x128xf32>
    %16 = tpu.matmul %12, %15, %cst_9 {dimension_numbers = #tpu.dot_dimension_numbers<[1], [0], [0], [1], [0, 0, 1, 1], [], []>} : vector<64x128xbf16>, vector<128x128xbf16>, vector<64x128xf32> -> vector<64x128xf32>
    %17 = arith.addf %10, %16 : vector<64x128xf32>
    %c2 = arith.constant 2 : index
    %c0_10 = arith.constant 0 : index
    %c0_11 = arith.constant 0 : index
    %18 = vector.load %arg15[%c2, %c0_10, %c0_11] : memref<9x64x128xbf16, #tpu.memory_space<vmem>>, vector<1x64x128xbf16>
    %19 = vector.shape_cast %18 : vector<1x64x128xbf16> to vector<64x128xbf16>
    %20 = arith.index_cast %arg1 : i32 to index
    %c256 = arith.constant 256 : index
    %c0_12 = arith.constant 0 : index
    %21 = vector.load %arg6[%20, %c256, %c0_12] : memref<1x1152x128xbf16, #tpu.memory_space<vmem>>, vector<1x128x128xbf16>
    %22 = vector.shape_cast %21 : vector<1x128x128xbf16> to vector<128x128xbf16>
    %cst_13 = arith.constant dense<0.000000e+00> : vector<64x128xf32>
    %23 = tpu.matmul %19, %22, %cst_13 {dimension_numbers = #tpu.dot_dimension_numbers<[1], [0], [0], [1], [0, 0, 1, 1], [], []>} : vector<64x128xbf16>, vector<128x128xbf16>, vector<64x128xf32> -> vector<64x128xf32>
    %24 = arith.addf %17, %23 : vector<64x128xf32>
    %c3 = arith.constant 3 : index
    %c0_14 = arith.constant 0 : index
    %c0_15 = arith.constant 0 : index
    %25 = vector.load %arg15[%c3, %c0_14, %c0_15] : memref<9x64x128xbf16, #tpu.memory_space<vmem>>, vector<1x64x128xbf16>
    %26 = vector.shape_cast %25 : vector<1x64x128xbf16> to vector<64x128xbf16>
    %27 = arith.index_cast %arg1 : i32 to index
    %c384 = arith.constant 384 : index
    %c0_16 = arith.constant 0 : index
    %28 = vector.load %arg6[%27, %c384, %c0_16] : memref<1x1152x128xbf16, #tpu.memory_space<vmem>>, vector<1x128x128xbf16>
    %29 = vector.shape_cast %28 : vector<1x128x128xbf16> to vector<128x128xbf16>
    %cst_17 = arith.constant dense<0.000000e+00> : vector<64x128xf32>
    %30 = tpu.matmul %26, %29, %cst_17 {dimension_numbers = #tpu.dot_dimension_numbers<[1], [0], [0], [1], [0, 0, 1, 1], [], []>} : vector<64x128xbf16>, vector<128x128xbf16>, vector<64x128xf32> -> vector<64x128xf32>
    %31 = arith.addf %24, %30 : vector<64x128xf32>
    %c4 = arith.constant 4 : index
    %c0_18 = arith.constant 0 : index
    %c0_19 = arith.constant 0 : index
    %32 = vector.load %arg15[%c4, %c0_18, %c0_19] : memref<9x64x128xbf16, #tpu.memory_space<vmem>>, vector<1x64x128xbf16>
    %33 = vector.shape_cast %32 : vector<1x64x128xbf16> to vector<64x128xbf16>
    %34 = arith.index_cast %arg1 : i32 to index
    %c512 = arith.constant 512 : index
    %c0_20 = arith.constant 0 : index
    %35 = vector.load %arg6[%34, %c512, %c0_20] : memref<1x1152x128xbf16, #tpu.memory_space<vmem>>, vector<1x128x128xbf16>
    %36 = vector.shape_cast %35 : vector<1x128x128xbf16> to vector<128x128xbf16>
    %cst_21 = arith.constant dense<0.000000e+00> : vector<64x128xf32>
    %37 = tpu.matmul %33, %36, %cst_21 {dimension_numbers = #tpu.dot_dimension_numbers<[1], [0], [0], [1], [0, 0, 1, 1], [], []>} : vector<64x128xbf16>, vector<128x128xbf16>, vector<64x128xf32> -> vector<64x128xf32>
    %38 = arith.addf %31, %37 : vector<64x128xf32>
    %c5 = arith.constant 5 : index
    %c0_22 = arith.constant 0 : index
    %c0_23 = arith.constant 0 : index
    %39 = vector.load %arg15[%c5, %c0_22, %c0_23] : memref<9x64x128xbf16, #tpu.memory_space<vmem>>, vector<1x64x128xbf16>
    %40 = vector.shape_cast %39 : vector<1x64x128xbf16> to vector<64x128xbf16>
    %41 = arith.index_cast %arg1 : i32 to index
    %c640 = arith.constant 640 : index
    %c0_24 = arith.constant 0 : index
    %42 = vector.load %arg6[%41, %c640, %c0_24] : memref<1x1152x128xbf16, #tpu.memory_space<vmem>>, vector<1x128x128xbf16>
    %43 = vector.shape_cast %42 : vector<1x128x128xbf16> to vector<128x128xbf16>
    %cst_25 = arith.constant dense<0.000000e+00> : vector<64x128xf32>
    %44 = tpu.matmul %40, %43, %cst_25 {dimension_numbers = #tpu.dot_dimension_numbers<[1], [0], [0], [1], [0, 0, 1, 1], [], []>} : vector<64x128xbf16>, vector<128x128xbf16>, vector<64x128xf32> -> vector<64x128xf32>
    %45 = arith.addf %38, %44 : vector<64x128xf32>
    %c6 = arith.constant 6 : index
    %c0_26 = arith.constant 0 : index
    %c0_27 = arith.constant 0 : index
    %46 = vector.load %arg15[%c6, %c0_26, %c0_27] : memref<9x64x128xbf16, #tpu.memory_space<vmem>>, vector<1x64x128xbf16>
    %47 = vector.shape_cast %46 : vector<1x64x128xbf16> to vector<64x128xbf16>
    %48 = arith.index_cast %arg1 : i32 to index
    %c768 = arith.constant 768 : index
    %c0_28 = arith.constant 0 : index
    %49 = vector.load %arg6[%48, %c768, %c0_28] : memref<1x1152x128xbf16, #tpu.memory_space<vmem>>, vector<1x128x128xbf16>
    %50 = vector.shape_cast %49 : vector<1x128x128xbf16> to vector<128x128xbf16>
    %cst_29 = arith.constant dense<0.000000e+00> : vector<64x128xf32>
    %51 = tpu.matmul %47, %50, %cst_29 {dimension_numbers = #tpu.dot_dimension_numbers<[1], [0], [0], [1], [0, 0, 1, 1], [], []>} : vector<64x128xbf16>, vector<128x128xbf16>, vector<64x128xf32> -> vector<64x128xf32>
    %52 = arith.addf %45, %51 : vector<64x128xf32>
    %c7 = arith.constant 7 : index
    %c0_30 = arith.constant 0 : index
    %c0_31 = arith.constant 0 : index
    %53 = vector.load %arg15[%c7, %c0_30, %c0_31] : memref<9x64x128xbf16, #tpu.memory_space<vmem>>, vector<1x64x128xbf16>
    %54 = vector.shape_cast %53 : vector<1x64x128xbf16> to vector<64x128xbf16>
    %55 = arith.index_cast %arg1 : i32 to index
    %c896 = arith.constant 896 : index
    %c0_32 = arith.constant 0 : index
    %56 = vector.load %arg6[%55, %c896, %c0_32] : memref<1x1152x128xbf16, #tpu.memory_space<vmem>>, vector<1x128x128xbf16>
    %57 = vector.shape_cast %56 : vector<1x128x128xbf16> to vector<128x128xbf16>
    %cst_33 = arith.constant dense<0.000000e+00> : vector<64x128xf32>
    %58 = tpu.matmul %54, %57, %cst_33 {dimension_numbers = #tpu.dot_dimension_numbers<[1], [0], [0], [1], [0, 0, 1, 1], [], []>} : vector<64x128xbf16>, vector<128x128xbf16>, vector<64x128xf32> -> vector<64x128xf32>
    %59 = arith.addf %52, %58 : vector<64x128xf32>
    %c8 = arith.constant 8 : index
    %c0_34 = arith.constant 0 : index
    %c0_35 = arith.constant 0 : index
    %60 = vector.load %arg15[%c8, %c0_34, %c0_35] : memref<9x64x128xbf16, #tpu.memory_space<vmem>>, vector<1x64x128xbf16>
    %61 = vector.shape_cast %60 : vector<1x64x128xbf16> to vector<64x128xbf16>
    %62 = arith.index_cast %arg1 : i32 to index
    %c1024 = arith.constant 1024 : index
    %c0_36 = arith.constant 0 : index
    %63 = vector.load %arg6[%62, %c1024, %c0_36] : memref<1x1152x128xbf16, #tpu.memory_space<vmem>>, vector<1x128x128xbf16>
    %64 = vector.shape_cast %63 : vector<1x128x128xbf16> to vector<128x128xbf16>
    %cst_37 = arith.constant dense<0.000000e+00> : vector<64x128xf32>
    %65 = tpu.matmul %61, %64, %cst_37 {dimension_numbers = #tpu.dot_dimension_numbers<[1], [0], [0], [1], [0, 0, 1, 1], [], []>} : vector<64x128xbf16>, vector<128x128xbf16>, vector<64x128xf32> -> vector<64x128xf32>
    %66 = arith.addf %59, %65 : vector<64x128xf32>
    %cst_38 = arith.constant dense<0.000000e+00> : vector<128xf32>
    %67 = vector.multi_reduction <add>, %66, %cst_38 [0] : vector<64x128xf32> to vector<128xf32>
    %68 = vector.shape_cast %67 : vector<128xf32> to vector<1x128xf32>
    %69 = vector.shape_cast %68 : vector<1x128xf32> to vector<1x1x128xf32>
    %c0_39 = arith.constant 0 : index
    %c0_40 = arith.constant 0 : index
    %c0_41 = arith.constant 0 : index
    %70 = vector.load %arg11[%c0_39, %c0_40, %c0_41] : memref<1x1x128xf32, #tpu.memory_space<vmem>>, vector<1x1x128xf32>
    tpu.vector_store %arg11[%c0_39, %c0_40, %c0_41], %69 {strides = array<i32>} : memref<1x1x128xf32, #tpu.memory_space<vmem>>, vector<1x1x128xf32>,
    %71 = arith.mulf %66, %66 : vector<64x128xf32>
    %cst_42 = arith.constant dense<0.000000e+00> : vector<128xf32>
    %72 = vector.multi_reduction <add>, %71, %cst_42 [0] : vector<64x128xf32> to vector<128xf32>
    %73 = vector.shape_cast %72 : vector<128xf32> to vector<1x128xf32>
    %74 = vector.shape_cast %73 : vector<1x128xf32> to vector<1x1x128xf32>
    %c0_43 = arith.constant 0 : index
    %c0_44 = arith.constant 0 : index
    %c0_45 = arith.constant 0 : index
    %75 = vector.load %arg12[%c0_43, %c0_44, %c0_45] : memref<1x1x128xf32, #tpu.memory_space<vmem>>, vector<1x1x128xf32>
    tpu.vector_store %arg12[%c0_43, %c0_44, %c0_45], %74 {strides = array<i32>} : memref<1x1x128xf32, #tpu.memory_space<vmem>>, vector<1x1x128xf32>,
    %c4_46 = arith.constant 4 : index
    %c0_47 = arith.constant 0 : index
    %c0_48 = arith.constant 0 : index
    %76 = vector.load %arg15[%c4_46, %c0_47, %c0_48] : memref<9x64x128xbf16, #tpu.memory_space<vmem>>, vector<1x64x128xbf16>
    %77 = vector.shape_cast %76 : vector<1x64x128xbf16> to vector<64x128xbf16>
    %78 = arith.index_cast %arg1 : i32 to index
    %c0_49 = arith.constant 0 : index
    %c0_50 = arith.constant 0 : index
    %79 = vector.load %arg9[%78, %c0_49, %c0_50] : memref<1x128x128xbf16, #tpu.memory_space<vmem>>, vector<1x128x128xbf16>
    %80 = vector.shape_cast %79 : vector<1x128x128xbf16> to vector<128x128xbf16>
    %cst_51 = arith.constant dense<0.000000e+00> : vector<64x128xf32>
    %81 = tpu.matmul %77, %80, %cst_51 {dimension_numbers = #tpu.dot_dimension_numbers<[1], [0], [0], [1], [0, 0, 1, 1], [], []>} : vector<64x128xbf16>, vector<128x128xbf16>, vector<64x128xf32> -> vector<64x128xf32>
    %82 = vector.shape_cast %81 : vector<64x128xf32> to vector<8x8x128xf32>
    %c0_52 = arith.constant 0 : index
    %c0_53 = arith.constant 0 : index
    %c0_54 = arith.constant 0 : index
    %c0_55 = arith.constant 0 : index
    %83 = vector.load %arg13[%c0_52, %c0_53, %c0_54, %c0_55] : memref<1x8x8x128xf32, #tpu.memory_space<vmem>>, vector<1x8x8x128xf32>
    %84 = vector.shape_cast %83 : vector<1x8x8x128xf32> to vector<8x8x128xf32>
    %85 = vector.shape_cast %82 : vector<8x8x128xf32> to vector<1x8x8x128xf32>
    tpu.vector_store %arg13[%c0_52, %c0_53, %c0_54, %c0_55], %85 {strides = array<i32>} : memref<1x8x8x128xf32, #tpu.memory_space<vmem>>, vector<1x8x8x128xf32>,
    %86 = vector.shape_cast %66 : vector<64x128xf32> to vector<8x8x128xf32>
    %87 = arith.truncf %86 : vector<8x8x128xf32> to vector<8x8x128xbf16>
    %c0_56 = arith.constant 0 : index
    %c0_57 = arith.constant 0 : index
    %c0_58 = arith.constant 0 : index
    %c0_59 = arith.constant 0 : index
    %88 = vector.load %arg10[%c0_56, %c0_57, %c0_58, %c0_59] : memref<1x8x8x128xbf16, #tpu.memory_space<vmem>>, vector<1x8x8x128xbf16>
    %89 = vector.shape_cast %88 : vector<1x8x8x128xbf16> to vector<8x8x128xbf16>
    %90 = vector.shape_cast %87 : vector<8x8x128xbf16> to vector<1x8x8x128xbf16>
    tpu.vector_store %arg10[%c0_56, %c0_57, %c0_58, %c0_59], %90 {strides = array<i32>} : memref<1x8x8x128xbf16, #tpu.memory_space<vmem>>, vector<1x8x8x128xbf16>,
    return
  }
  func.func @transform_0(%arg0: i32, %arg1: i32) -> (i32, i32, i32, i32) {
    %c0_i32 = arith.constant 0 : i32
    %c0_i32_0 = arith.constant 0 : i32
    %c0_i32_1 = arith.constant 0 : i32
    %c0_i32_2 = arith.constant 0 : i32
    return %arg0, %c0_i32, %c0_i32_0, %c0_i32_1 : i32, i32, i32, i32
  }
  func.func @transform_1(%arg0: i32, %arg1: i32) -> (i32, i32, i32, i32) {
    %c0_i32 = arith.constant 0 : i32
    %c0_i32_0 = arith.constant 0 : i32
    %c0_i32_1 = arith.constant 0 : i32
    %c0_i32_2 = arith.constant 0 : i32
    return %arg0, %c0_i32, %c0_i32_0, %c0_i32_1 : i32, i32, i32, i32
  }
  func.func @transform_2(%arg0: i32, %arg1: i32) -> (i32, i32, i32, i32) {
    %c0_i32 = arith.constant 0 : i32
    %c0_i32_0 = arith.constant 0 : i32
    %c0_i32_1 = arith.constant 0 : i32
    %c0_i32_2 = arith.constant 0 : i32
    return %arg0, %c0_i32, %c0_i32_0, %c0_i32_1 : i32, i32, i32, i32
  }
  func.func @transform_3(%arg0: i32, %arg1: i32) -> (i32, i32, i32, i32) {
    %c0_i32 = arith.constant 0 : i32
    %c0_i32_0 = arith.constant 0 : i32
    %c0_i32_1 = arith.constant 0 : i32
    %c0_i32_2 = arith.constant 0 : i32
    return %arg0, %c0_i32, %c0_i32_0, %c0_i32_1 : i32, i32, i32, i32
  }
  func.func @transform_4(%arg0: i32, %arg1: i32) -> (i32, i32, i32) {
    %c0_i32 = arith.constant 0 : i32
    %c0_i32_0 = arith.constant 0 : i32
    %c0_i32_1 = arith.constant 0 : i32
    %c0_i32_2 = arith.constant 0 : i32
    return %c0_i32, %c0_i32_0, %c0_i32_1 : i32, i32, i32
  }
  func.func @transform_5(%arg0: i32, %arg1: i32) -> (i32, i32) {
    %c0_i32 = arith.constant 0 : i32
    %c0_i32_0 = arith.constant 0 : i32
    %c0_i32_1 = arith.constant 0 : i32
    return %c0_i32, %c0_i32_0 : i32, i32
  }
  func.func @transform_6(%arg0: i32, %arg1: i32) -> (i32, i32) {
    %c0_i32 = arith.constant 0 : i32
    %c0_i32_0 = arith.constant 0 : i32
    %c0_i32_1 = arith.constant 0 : i32
    return %c0_i32, %c0_i32_0 : i32, i32
  }
  func.func @transform_7(%arg0: i32, %arg1: i32) -> (i32, i32, i32) {
    %c0_i32 = arith.constant 0 : i32
    %c0_i32_0 = arith.constant 0 : i32
    %c0_i32_1 = arith.constant 0 : i32
    %c0_i32_2 = arith.constant 0 : i32
    return %c0_i32, %c0_i32_0, %c0_i32_1 : i32, i32, i32
  }
  func.func @transform_8(%arg0: i32, %arg1: i32) -> (i32, i32, i32, i32) {
    %c0_i32 = arith.constant 0 : i32
    %c0_i32_0 = arith.constant 0 : i32
    %c0_i32_1 = arith.constant 0 : i32
    return %arg0, %c0_i32, %c0_i32_0, %arg1 : i32, i32, i32, i32
  }
  func.func @transform_9(%arg0: i32, %arg1: i32) -> (i32, i32, i32) {
    %c0_i32 = arith.constant 0 : i32
    %c0_i32_0 = arith.constant 0 : i32
    return %arg0, %c0_i32, %arg1 : i32, i32, i32
  }
  func.func @transform_10(%arg0: i32, %arg1: i32) -> (i32, i32, i32) {
    %c0_i32 = arith.constant 0 : i32
    %c0_i32_0 = arith.constant 0 : i32
    return %arg0, %c0_i32, %arg1 : i32, i32, i32
  }
  func.func @transform_11(%arg0: i32, %arg1: i32) -> (i32, i32, i32, i32) {
    %c0_i32 = arith.constant 0 : i32
    %c0_i32_0 = arith.constant 0 : i32
    %c0_i32_1 = arith.constant 0 : i32
    return %arg0, %c0_i32, %c0_i32_0, %arg1 : i32, i32, i32, i32
  }
}

module attributes {stable_mosaic.version = 11 : i64} {
  func.func @kernel(%arg0: i32, %arg1: i32, %arg2: memref<1x8x8x128xbf16, #tpu.memory_space<vmem>>, %arg3: memref<1x1152x128xbf16, #tpu.memory_space<vmem>>, %arg4: memref<1x128xf32, #tpu.memory_space<vmem>>, %arg5: memref<1x128xf32, #tpu.memory_space<vmem>>, %arg6: memref<1x8x8x128xf32, #tpu.memory_space<vmem>>, %arg7: memref<1x8x8x128xf32, #tpu.memory_space<vmem>>, %arg8: memref<1x10x10x128xbf16, #tpu.memory_space<vmem>>, %arg9: memref<9x64x128xbf16, #tpu.memory_space<vmem>>) attributes {dimension_semantics = [#tpu.dimension_semantics<parallel>, #tpu.dimension_semantics<arbitrary>], iteration_bounds = array<i64: 2, 1>, scalar_prefetch = 0 : i64, scratch_operands = 2 : i64, tpu.core_type = #tpu.core_type<tc>, window_params = [{transform_indices = @transform_0, window_bounds = array<i64: 1, 8, 8, 128>}, {pipeline_mode = #tpu.pipeline_mode<synchronous>, transform_indices = @transform_1, window_bounds = array<i64: 1, 1152, 128>}, {pipeline_mode = #tpu.pipeline_mode<synchronous>, transform_indices = @transform_2, window_bounds = array<i64: 1, 128>}, {pipeline_mode = #tpu.pipeline_mode<synchronous>, transform_indices = @transform_3, window_bounds = array<i64: 1, 128>}, {transform_indices = @transform_4, window_bounds = array<i64: 1, 8, 8, 128>}, {transform_indices = @transform_5, window_bounds = array<i64: 1, 8, 8, 128>}]} {
    %c0_i32 = arith.constant 0 : i32
    %0 = arith.cmpi eq, %arg1, %c0_i32 : i32
    %1 = arith.extui %0 : i1 to i32
    %c0_i32_0 = arith.constant 0 : i32
    %2 = arith.cmpi ne, %1, %c0_i32_0 : i32
    scf.if %2 {
      %c0_46 = arith.constant 0 : index
      %c0_47 = arith.constant 0 : index
      %75 = vector.load %arg4[%c0_46, %c0_47] : memref<1x128xf32, #tpu.memory_space<vmem>>, vector<1x128xf32>
      %76 = vector.shape_cast %75 : vector<1x128xf32> to vector<1x1x128xf32>
      %c0_48 = arith.constant 0 : index
      %c0_49 = arith.constant 0 : index
      %77 = vector.load %arg5[%c0_48, %c0_49] : memref<1x128xf32, #tpu.memory_space<vmem>>, vector<1x128xf32>
      %78 = vector.shape_cast %77 : vector<1x128xf32> to vector<1x1x128xf32>
      %cst_50 = arith.constant 0.000000e+00 : bf16
      %79 = vector.broadcast %cst_50 : bf16 to vector<10x10x128xbf16>
      %c0_51 = arith.constant 0 : index
      %c0_52 = arith.constant 0 : index
      %c0_53 = arith.constant 0 : index
      %c0_54 = arith.constant 0 : index
      %80 = vector.load %arg8[%c0_51, %c0_52, %c0_53, %c0_54] : memref<1x10x10x128xbf16, #tpu.memory_space<vmem>>, vector<1x10x10x128xbf16>
      %81 = vector.shape_cast %80 : vector<1x10x10x128xbf16> to vector<10x10x128xbf16>
      %82 = vector.shape_cast %79 : vector<10x10x128xbf16> to vector<1x10x10x128xbf16>
      tpu.vector_store %arg8[%c0_51, %c0_52, %c0_53, %c0_54], %82 {strides = array<i32>} : memref<1x10x10x128xbf16, #tpu.memory_space<vmem>>, vector<1x10x10x128xbf16>,
      %c0_55 = arith.constant 0 : index
      %c0_56 = arith.constant 0 : index
      %c0_57 = arith.constant 0 : index
      %c0_58 = arith.constant 0 : index
      %83 = vector.load %arg2[%c0_55, %c0_56, %c0_57, %c0_58] : memref<1x8x8x128xbf16, #tpu.memory_space<vmem>>, vector<1x8x8x128xbf16>
      %84 = vector.shape_cast %83 : vector<1x8x8x128xbf16> to vector<8x8x128xbf16>
      %85 = arith.extf %84 : vector<8x8x128xbf16> to vector<8x8x128xf32>
      %86 = vector.broadcast %76 : vector<1x1x128xf32> to vector<8x8x128xf32>
      %87 = arith.mulf %85, %86 : vector<8x8x128xf32>
      %88 = vector.broadcast %78 : vector<1x1x128xf32> to vector<8x8x128xf32>
      %89 = arith.addf %87, %88 : vector<8x8x128xf32>
      %cst_59 = arith.constant 0.000000e+00 : f32
      %90 = vector.broadcast %cst_59 : f32 to vector<8x8x128xf32>
      %91 = arith.maximumf %89, %90 : vector<8x8x128xf32>
      %92 = arith.truncf %91 : vector<8x8x128xf32> to vector<8x8x128xbf16>
      %c0_60 = arith.constant 0 : index
      %c1_61 = arith.constant 1 : index
      %c1_62 = arith.constant 1 : index
      %c0_63 = arith.constant 0 : index
      %93 = vector.load %arg8[%c0_60, %c1_61, %c1_62, %c0_63] : memref<1x10x10x128xbf16, #tpu.memory_space<vmem>>, vector<1x8x8x128xbf16>
      %94 = vector.shape_cast %93 : vector<1x8x8x128xbf16> to vector<8x8x128xbf16>
      %95 = vector.shape_cast %92 : vector<8x8x128xbf16> to vector<1x8x8x128xbf16>
      tpu.vector_store %arg8[%c0_60, %c1_61, %c1_62, %c0_63], %95 {strides = array<i32>} : memref<1x10x10x128xbf16, #tpu.memory_space<vmem>>, vector<1x8x8x128xbf16>,
      %c0_64 = arith.constant 0 : index
      %c0_65 = arith.constant 0 : index
      %c0_66 = arith.constant 0 : index
      %c0_67 = arith.constant 0 : index
      %96 = vector.load %arg8[%c0_64, %c0_65, %c0_66, %c0_67] : memref<1x10x10x128xbf16, #tpu.memory_space<vmem>>, vector<1x8x8x128xbf16>
      %97 = vector.shape_cast %96 : vector<1x8x8x128xbf16> to vector<8x8x128xbf16>
      %98 = vector.shape_cast %97 : vector<8x8x128xbf16> to vector<64x128xbf16>
      %c0_68 = arith.constant 0 : index
      %c0_69 = arith.constant 0 : index
      %c0_70 = arith.constant 0 : index
      %99 = vector.load %arg9[%c0_68, %c0_69, %c0_70] : memref<9x64x128xbf16, #tpu.memory_space<vmem>>, vector<1x64x128xbf16>
      %100 = vector.shape_cast %99 : vector<1x64x128xbf16> to vector<64x128xbf16>
      %101 = vector.shape_cast %98 : vector<64x128xbf16> to vector<1x64x128xbf16>
      tpu.vector_store %arg9[%c0_68, %c0_69, %c0_70], %101 {strides = array<i32>} : memref<9x64x128xbf16, #tpu.memory_space<vmem>>, vector<1x64x128xbf16>,
      %c0_71 = arith.constant 0 : index
      %c0_72 = arith.constant 0 : index
      %c1_73 = arith.constant 1 : index
      %c0_74 = arith.constant 0 : index
      %102 = vector.load %arg8[%c0_71, %c0_72, %c1_73, %c0_74] : memref<1x10x10x128xbf16, #tpu.memory_space<vmem>>, vector<1x8x8x128xbf16>
      %103 = vector.shape_cast %102 : vector<1x8x8x128xbf16> to vector<8x8x128xbf16>
      %104 = vector.shape_cast %103 : vector<8x8x128xbf16> to vector<64x128xbf16>
      %c1_75 = arith.constant 1 : index
      %c0_76 = arith.constant 0 : index
      %c0_77 = arith.constant 0 : index
      %105 = vector.load %arg9[%c1_75, %c0_76, %c0_77] : memref<9x64x128xbf16, #tpu.memory_space<vmem>>, vector<1x64x128xbf16>
      %106 = vector.shape_cast %105 : vector<1x64x128xbf16> to vector<64x128xbf16>
      %107 = vector.shape_cast %104 : vector<64x128xbf16> to vector<1x64x128xbf16>
      tpu.vector_store %arg9[%c1_75, %c0_76, %c0_77], %107 {strides = array<i32>} : memref<9x64x128xbf16, #tpu.memory_space<vmem>>, vector<1x64x128xbf16>,
      %c0_78 = arith.constant 0 : index
      %c0_79 = arith.constant 0 : index
      %c2_80 = arith.constant 2 : index
      %c0_81 = arith.constant 0 : index
      %108 = vector.load %arg8[%c0_78, %c0_79, %c2_80, %c0_81] : memref<1x10x10x128xbf16, #tpu.memory_space<vmem>>, vector<1x8x8x128xbf16>
      %109 = vector.shape_cast %108 : vector<1x8x8x128xbf16> to vector<8x8x128xbf16>
      %110 = vector.shape_cast %109 : vector<8x8x128xbf16> to vector<64x128xbf16>
      %c2_82 = arith.constant 2 : index
      %c0_83 = arith.constant 0 : index
      %c0_84 = arith.constant 0 : index
      %111 = vector.load %arg9[%c2_82, %c0_83, %c0_84] : memref<9x64x128xbf16, #tpu.memory_space<vmem>>, vector<1x64x128xbf16>
      %112 = vector.shape_cast %111 : vector<1x64x128xbf16> to vector<64x128xbf16>
      %113 = vector.shape_cast %110 : vector<64x128xbf16> to vector<1x64x128xbf16>
      tpu.vector_store %arg9[%c2_82, %c0_83, %c0_84], %113 {strides = array<i32>} : memref<9x64x128xbf16, #tpu.memory_space<vmem>>, vector<1x64x128xbf16>,
      %c0_85 = arith.constant 0 : index
      %c1_86 = arith.constant 1 : index
      %c0_87 = arith.constant 0 : index
      %c0_88 = arith.constant 0 : index
      %114 = vector.load %arg8[%c0_85, %c1_86, %c0_87, %c0_88] : memref<1x10x10x128xbf16, #tpu.memory_space<vmem>>, vector<1x8x8x128xbf16>
      %115 = vector.shape_cast %114 : vector<1x8x8x128xbf16> to vector<8x8x128xbf16>
      %116 = vector.shape_cast %115 : vector<8x8x128xbf16> to vector<64x128xbf16>
      %c3_89 = arith.constant 3 : index
      %c0_90 = arith.constant 0 : index
      %c0_91 = arith.constant 0 : index
      %117 = vector.load %arg9[%c3_89, %c0_90, %c0_91] : memref<9x64x128xbf16, #tpu.memory_space<vmem>>, vector<1x64x128xbf16>
      %118 = vector.shape_cast %117 : vector<1x64x128xbf16> to vector<64x128xbf16>
      %119 = vector.shape_cast %116 : vector<64x128xbf16> to vector<1x64x128xbf16>
      tpu.vector_store %arg9[%c3_89, %c0_90, %c0_91], %119 {strides = array<i32>} : memref<9x64x128xbf16, #tpu.memory_space<vmem>>, vector<1x64x128xbf16>,
      %c0_92 = arith.constant 0 : index
      %c1_93 = arith.constant 1 : index
      %c1_94 = arith.constant 1 : index
      %c0_95 = arith.constant 0 : index
      %120 = vector.load %arg8[%c0_92, %c1_93, %c1_94, %c0_95] : memref<1x10x10x128xbf16, #tpu.memory_space<vmem>>, vector<1x8x8x128xbf16>
      %121 = vector.shape_cast %120 : vector<1x8x8x128xbf16> to vector<8x8x128xbf16>
      %122 = vector.shape_cast %121 : vector<8x8x128xbf16> to vector<64x128xbf16>
      %c4_96 = arith.constant 4 : index
      %c0_97 = arith.constant 0 : index
      %c0_98 = arith.constant 0 : index
      %123 = vector.load %arg9[%c4_96, %c0_97, %c0_98] : memref<9x64x128xbf16, #tpu.memory_space<vmem>>, vector<1x64x128xbf16>
      %124 = vector.shape_cast %123 : vector<1x64x128xbf16> to vector<64x128xbf16>
      %125 = vector.shape_cast %122 : vector<64x128xbf16> to vector<1x64x128xbf16>
      tpu.vector_store %arg9[%c4_96, %c0_97, %c0_98], %125 {strides = array<i32>} : memref<9x64x128xbf16, #tpu.memory_space<vmem>>, vector<1x64x128xbf16>,
      %c0_99 = arith.constant 0 : index
      %c1_100 = arith.constant 1 : index
      %c2_101 = arith.constant 2 : index
      %c0_102 = arith.constant 0 : index
      %126 = vector.load %arg8[%c0_99, %c1_100, %c2_101, %c0_102] : memref<1x10x10x128xbf16, #tpu.memory_space<vmem>>, vector<1x8x8x128xbf16>
      %127 = vector.shape_cast %126 : vector<1x8x8x128xbf16> to vector<8x8x128xbf16>
      %128 = vector.shape_cast %127 : vector<8x8x128xbf16> to vector<64x128xbf16>
      %c5_103 = arith.constant 5 : index
      %c0_104 = arith.constant 0 : index
      %c0_105 = arith.constant 0 : index
      %129 = vector.load %arg9[%c5_103, %c0_104, %c0_105] : memref<9x64x128xbf16, #tpu.memory_space<vmem>>, vector<1x64x128xbf16>
      %130 = vector.shape_cast %129 : vector<1x64x128xbf16> to vector<64x128xbf16>
      %131 = vector.shape_cast %128 : vector<64x128xbf16> to vector<1x64x128xbf16>
      tpu.vector_store %arg9[%c5_103, %c0_104, %c0_105], %131 {strides = array<i32>} : memref<9x64x128xbf16, #tpu.memory_space<vmem>>, vector<1x64x128xbf16>,
      %c0_106 = arith.constant 0 : index
      %c2_107 = arith.constant 2 : index
      %c0_108 = arith.constant 0 : index
      %c0_109 = arith.constant 0 : index
      %132 = vector.load %arg8[%c0_106, %c2_107, %c0_108, %c0_109] : memref<1x10x10x128xbf16, #tpu.memory_space<vmem>>, vector<1x8x8x128xbf16>
      %133 = vector.shape_cast %132 : vector<1x8x8x128xbf16> to vector<8x8x128xbf16>
      %134 = vector.shape_cast %133 : vector<8x8x128xbf16> to vector<64x128xbf16>
      %c6_110 = arith.constant 6 : index
      %c0_111 = arith.constant 0 : index
      %c0_112 = arith.constant 0 : index
      %135 = vector.load %arg9[%c6_110, %c0_111, %c0_112] : memref<9x64x128xbf16, #tpu.memory_space<vmem>>, vector<1x64x128xbf16>
      %136 = vector.shape_cast %135 : vector<1x64x128xbf16> to vector<64x128xbf16>
      %137 = vector.shape_cast %134 : vector<64x128xbf16> to vector<1x64x128xbf16>
      tpu.vector_store %arg9[%c6_110, %c0_111, %c0_112], %137 {strides = array<i32>} : memref<9x64x128xbf16, #tpu.memory_space<vmem>>, vector<1x64x128xbf16>,
      %c0_113 = arith.constant 0 : index
      %c2_114 = arith.constant 2 : index
      %c1_115 = arith.constant 1 : index
      %c0_116 = arith.constant 0 : index
      %138 = vector.load %arg8[%c0_113, %c2_114, %c1_115, %c0_116] : memref<1x10x10x128xbf16, #tpu.memory_space<vmem>>, vector<1x8x8x128xbf16>
      %139 = vector.shape_cast %138 : vector<1x8x8x128xbf16> to vector<8x8x128xbf16>
      %140 = vector.shape_cast %139 : vector<8x8x128xbf16> to vector<64x128xbf16>
      %c7_117 = arith.constant 7 : index
      %c0_118 = arith.constant 0 : index
      %c0_119 = arith.constant 0 : index
      %141 = vector.load %arg9[%c7_117, %c0_118, %c0_119] : memref<9x64x128xbf16, #tpu.memory_space<vmem>>, vector<1x64x128xbf16>
      %142 = vector.shape_cast %141 : vector<1x64x128xbf16> to vector<64x128xbf16>
      %143 = vector.shape_cast %140 : vector<64x128xbf16> to vector<1x64x128xbf16>
      tpu.vector_store %arg9[%c7_117, %c0_118, %c0_119], %143 {strides = array<i32>} : memref<9x64x128xbf16, #tpu.memory_space<vmem>>, vector<1x64x128xbf16>,
      %c0_120 = arith.constant 0 : index
      %c2_121 = arith.constant 2 : index
      %c2_122 = arith.constant 2 : index
      %c0_123 = arith.constant 0 : index
      %144 = vector.load %arg8[%c0_120, %c2_121, %c2_122, %c0_123] : memref<1x10x10x128xbf16, #tpu.memory_space<vmem>>, vector<1x8x8x128xbf16>
      %145 = vector.shape_cast %144 : vector<1x8x8x128xbf16> to vector<8x8x128xbf16>
      %146 = vector.shape_cast %145 : vector<8x8x128xbf16> to vector<64x128xbf16>
      %c8_124 = arith.constant 8 : index
      %c0_125 = arith.constant 0 : index
      %c0_126 = arith.constant 0 : index
      %147 = vector.load %arg9[%c8_124, %c0_125, %c0_126] : memref<9x64x128xbf16, #tpu.memory_space<vmem>>, vector<1x64x128xbf16>
      %148 = vector.shape_cast %147 : vector<1x64x128xbf16> to vector<64x128xbf16>
      %149 = vector.shape_cast %146 : vector<64x128xbf16> to vector<1x64x128xbf16>
      tpu.vector_store %arg9[%c8_124, %c0_125, %c0_126], %149 {strides = array<i32>} : memref<9x64x128xbf16, #tpu.memory_space<vmem>>, vector<1x64x128xbf16>,
    } else {
    }
    %cst = arith.constant 0.000000e+00 : f32
    %3 = vector.broadcast %cst : f32 to vector<64x128xf32>
    %c0 = arith.constant 0 : index
    %c0_1 = arith.constant 0 : index
    %c0_2 = arith.constant 0 : index
    %4 = vector.load %arg9[%c0, %c0_1, %c0_2] : memref<9x64x128xbf16, #tpu.memory_space<vmem>>, vector<1x64x128xbf16>
    %5 = vector.shape_cast %4 : vector<1x64x128xbf16> to vector<64x128xbf16>
    %6 = arith.index_cast %arg1 : i32 to index
    %c0_3 = arith.constant 0 : index
    %c0_4 = arith.constant 0 : index
    %7 = vector.load %arg3[%6, %c0_3, %c0_4] : memref<1x1152x128xbf16, #tpu.memory_space<vmem>>, vector<1x128x128xbf16>
    %8 = vector.shape_cast %7 : vector<1x128x128xbf16> to vector<128x128xbf16>
    %cst_5 = arith.constant dense<0.000000e+00> : vector<64x128xf32>
    %9 = tpu.matmul %5, %8, %cst_5 {dimension_numbers = #tpu.dot_dimension_numbers<[1], [0], [0], [1], [0, 0, 1, 1], [], []>} : vector<64x128xbf16>, vector<128x128xbf16>, vector<64x128xf32> -> vector<64x128xf32>
    %10 = arith.addf %3, %9 : vector<64x128xf32>
    %c1 = arith.constant 1 : index
    %c0_6 = arith.constant 0 : index
    %c0_7 = arith.constant 0 : index
    %11 = vector.load %arg9[%c1, %c0_6, %c0_7] : memref<9x64x128xbf16, #tpu.memory_space<vmem>>, vector<1x64x128xbf16>
    %12 = vector.shape_cast %11 : vector<1x64x128xbf16> to vector<64x128xbf16>
    %13 = arith.index_cast %arg1 : i32 to index
    %c128 = arith.constant 128 : index
    %c0_8 = arith.constant 0 : index
    %14 = vector.load %arg3[%13, %c128, %c0_8] : memref<1x1152x128xbf16, #tpu.memory_space<vmem>>, vector<1x128x128xbf16>
    %15 = vector.shape_cast %14 : vector<1x128x128xbf16> to vector<128x128xbf16>
    %cst_9 = arith.constant dense<0.000000e+00> : vector<64x128xf32>
    %16 = tpu.matmul %12, %15, %cst_9 {dimension_numbers = #tpu.dot_dimension_numbers<[1], [0], [0], [1], [0, 0, 1, 1], [], []>} : vector<64x128xbf16>, vector<128x128xbf16>, vector<64x128xf32> -> vector<64x128xf32>
    %17 = arith.addf %10, %16 : vector<64x128xf32>
    %c2 = arith.constant 2 : index
    %c0_10 = arith.constant 0 : index
    %c0_11 = arith.constant 0 : index
    %18 = vector.load %arg9[%c2, %c0_10, %c0_11] : memref<9x64x128xbf16, #tpu.memory_space<vmem>>, vector<1x64x128xbf16>
    %19 = vector.shape_cast %18 : vector<1x64x128xbf16> to vector<64x128xbf16>
    %20 = arith.index_cast %arg1 : i32 to index
    %c256 = arith.constant 256 : index
    %c0_12 = arith.constant 0 : index
    %21 = vector.load %arg3[%20, %c256, %c0_12] : memref<1x1152x128xbf16, #tpu.memory_space<vmem>>, vector<1x128x128xbf16>
    %22 = vector.shape_cast %21 : vector<1x128x128xbf16> to vector<128x128xbf16>
    %cst_13 = arith.constant dense<0.000000e+00> : vector<64x128xf32>
    %23 = tpu.matmul %19, %22, %cst_13 {dimension_numbers = #tpu.dot_dimension_numbers<[1], [0], [0], [1], [0, 0, 1, 1], [], []>} : vector<64x128xbf16>, vector<128x128xbf16>, vector<64x128xf32> -> vector<64x128xf32>
    %24 = arith.addf %17, %23 : vector<64x128xf32>
    %c3 = arith.constant 3 : index
    %c0_14 = arith.constant 0 : index
    %c0_15 = arith.constant 0 : index
    %25 = vector.load %arg9[%c3, %c0_14, %c0_15] : memref<9x64x128xbf16, #tpu.memory_space<vmem>>, vector<1x64x128xbf16>
    %26 = vector.shape_cast %25 : vector<1x64x128xbf16> to vector<64x128xbf16>
    %27 = arith.index_cast %arg1 : i32 to index
    %c384 = arith.constant 384 : index
    %c0_16 = arith.constant 0 : index
    %28 = vector.load %arg3[%27, %c384, %c0_16] : memref<1x1152x128xbf16, #tpu.memory_space<vmem>>, vector<1x128x128xbf16>
    %29 = vector.shape_cast %28 : vector<1x128x128xbf16> to vector<128x128xbf16>
    %cst_17 = arith.constant dense<0.000000e+00> : vector<64x128xf32>
    %30 = tpu.matmul %26, %29, %cst_17 {dimension_numbers = #tpu.dot_dimension_numbers<[1], [0], [0], [1], [0, 0, 1, 1], [], []>} : vector<64x128xbf16>, vector<128x128xbf16>, vector<64x128xf32> -> vector<64x128xf32>
    %31 = arith.addf %24, %30 : vector<64x128xf32>
    %c4 = arith.constant 4 : index
    %c0_18 = arith.constant 0 : index
    %c0_19 = arith.constant 0 : index
    %32 = vector.load %arg9[%c4, %c0_18, %c0_19] : memref<9x64x128xbf16, #tpu.memory_space<vmem>>, vector<1x64x128xbf16>
    %33 = vector.shape_cast %32 : vector<1x64x128xbf16> to vector<64x128xbf16>
    %34 = arith.index_cast %arg1 : i32 to index
    %c512 = arith.constant 512 : index
    %c0_20 = arith.constant 0 : index
    %35 = vector.load %arg3[%34, %c512, %c0_20] : memref<1x1152x128xbf16, #tpu.memory_space<vmem>>, vector<1x128x128xbf16>
    %36 = vector.shape_cast %35 : vector<1x128x128xbf16> to vector<128x128xbf16>
    %cst_21 = arith.constant dense<0.000000e+00> : vector<64x128xf32>
    %37 = tpu.matmul %33, %36, %cst_21 {dimension_numbers = #tpu.dot_dimension_numbers<[1], [0], [0], [1], [0, 0, 1, 1], [], []>} : vector<64x128xbf16>, vector<128x128xbf16>, vector<64x128xf32> -> vector<64x128xf32>
    %38 = arith.addf %31, %37 : vector<64x128xf32>
    %c5 = arith.constant 5 : index
    %c0_22 = arith.constant 0 : index
    %c0_23 = arith.constant 0 : index
    %39 = vector.load %arg9[%c5, %c0_22, %c0_23] : memref<9x64x128xbf16, #tpu.memory_space<vmem>>, vector<1x64x128xbf16>
    %40 = vector.shape_cast %39 : vector<1x64x128xbf16> to vector<64x128xbf16>
    %41 = arith.index_cast %arg1 : i32 to index
    %c640 = arith.constant 640 : index
    %c0_24 = arith.constant 0 : index
    %42 = vector.load %arg3[%41, %c640, %c0_24] : memref<1x1152x128xbf16, #tpu.memory_space<vmem>>, vector<1x128x128xbf16>
    %43 = vector.shape_cast %42 : vector<1x128x128xbf16> to vector<128x128xbf16>
    %cst_25 = arith.constant dense<0.000000e+00> : vector<64x128xf32>
    %44 = tpu.matmul %40, %43, %cst_25 {dimension_numbers = #tpu.dot_dimension_numbers<[1], [0], [0], [1], [0, 0, 1, 1], [], []>} : vector<64x128xbf16>, vector<128x128xbf16>, vector<64x128xf32> -> vector<64x128xf32>
    %45 = arith.addf %38, %44 : vector<64x128xf32>
    %c6 = arith.constant 6 : index
    %c0_26 = arith.constant 0 : index
    %c0_27 = arith.constant 0 : index
    %46 = vector.load %arg9[%c6, %c0_26, %c0_27] : memref<9x64x128xbf16, #tpu.memory_space<vmem>>, vector<1x64x128xbf16>
    %47 = vector.shape_cast %46 : vector<1x64x128xbf16> to vector<64x128xbf16>
    %48 = arith.index_cast %arg1 : i32 to index
    %c768 = arith.constant 768 : index
    %c0_28 = arith.constant 0 : index
    %49 = vector.load %arg3[%48, %c768, %c0_28] : memref<1x1152x128xbf16, #tpu.memory_space<vmem>>, vector<1x128x128xbf16>
    %50 = vector.shape_cast %49 : vector<1x128x128xbf16> to vector<128x128xbf16>
    %cst_29 = arith.constant dense<0.000000e+00> : vector<64x128xf32>
    %51 = tpu.matmul %47, %50, %cst_29 {dimension_numbers = #tpu.dot_dimension_numbers<[1], [0], [0], [1], [0, 0, 1, 1], [], []>} : vector<64x128xbf16>, vector<128x128xbf16>, vector<64x128xf32> -> vector<64x128xf32>
    %52 = arith.addf %45, %51 : vector<64x128xf32>
    %c7 = arith.constant 7 : index
    %c0_30 = arith.constant 0 : index
    %c0_31 = arith.constant 0 : index
    %53 = vector.load %arg9[%c7, %c0_30, %c0_31] : memref<9x64x128xbf16, #tpu.memory_space<vmem>>, vector<1x64x128xbf16>
    %54 = vector.shape_cast %53 : vector<1x64x128xbf16> to vector<64x128xbf16>
    %55 = arith.index_cast %arg1 : i32 to index
    %c896 = arith.constant 896 : index
    %c0_32 = arith.constant 0 : index
    %56 = vector.load %arg3[%55, %c896, %c0_32] : memref<1x1152x128xbf16, #tpu.memory_space<vmem>>, vector<1x128x128xbf16>
    %57 = vector.shape_cast %56 : vector<1x128x128xbf16> to vector<128x128xbf16>
    %cst_33 = arith.constant dense<0.000000e+00> : vector<64x128xf32>
    %58 = tpu.matmul %54, %57, %cst_33 {dimension_numbers = #tpu.dot_dimension_numbers<[1], [0], [0], [1], [0, 0, 1, 1], [], []>} : vector<64x128xbf16>, vector<128x128xbf16>, vector<64x128xf32> -> vector<64x128xf32>
    %59 = arith.addf %52, %58 : vector<64x128xf32>
    %c8 = arith.constant 8 : index
    %c0_34 = arith.constant 0 : index
    %c0_35 = arith.constant 0 : index
    %60 = vector.load %arg9[%c8, %c0_34, %c0_35] : memref<9x64x128xbf16, #tpu.memory_space<vmem>>, vector<1x64x128xbf16>
    %61 = vector.shape_cast %60 : vector<1x64x128xbf16> to vector<64x128xbf16>
    %62 = arith.index_cast %arg1 : i32 to index
    %c1024 = arith.constant 1024 : index
    %c0_36 = arith.constant 0 : index
    %63 = vector.load %arg3[%62, %c1024, %c0_36] : memref<1x1152x128xbf16, #tpu.memory_space<vmem>>, vector<1x128x128xbf16>
    %64 = vector.shape_cast %63 : vector<1x128x128xbf16> to vector<128x128xbf16>
    %cst_37 = arith.constant dense<0.000000e+00> : vector<64x128xf32>
    %65 = tpu.matmul %61, %64, %cst_37 {dimension_numbers = #tpu.dot_dimension_numbers<[1], [0], [0], [1], [0, 0, 1, 1], [], []>} : vector<64x128xbf16>, vector<128x128xbf16>, vector<64x128xf32> -> vector<64x128xf32>
    %66 = arith.addf %59, %65 : vector<64x128xf32>
    %c0_38 = arith.constant 0 : index
    %c0_39 = arith.constant 0 : index
    %c0_40 = arith.constant 0 : index
    %c0_41 = arith.constant 0 : index
    %67 = vector.load %arg6[%c0_38, %c0_39, %c0_40, %c0_41] : memref<1x8x8x128xf32, #tpu.memory_space<vmem>>, vector<1x8x8x128xf32>
    %68 = vector.shape_cast %67 : vector<1x8x8x128xf32> to vector<8x8x128xf32>
    %69 = vector.shape_cast %68 : vector<8x8x128xf32> to vector<64x128xf32>
    %70 = arith.addf %66, %69 : vector<64x128xf32>
    %71 = vector.shape_cast %70 : vector<64x128xf32> to vector<8x8x128xf32>
    %c0_42 = arith.constant 0 : index
    %c0_43 = arith.constant 0 : index
    %c0_44 = arith.constant 0 : index
    %c0_45 = arith.constant 0 : index
    %72 = vector.load %arg7[%c0_42, %c0_43, %c0_44, %c0_45] : memref<1x8x8x128xf32, #tpu.memory_space<vmem>>, vector<1x8x8x128xf32>
    %73 = vector.shape_cast %72 : vector<1x8x8x128xf32> to vector<8x8x128xf32>
    %74 = vector.shape_cast %71 : vector<8x8x128xf32> to vector<1x8x8x128xf32>
    tpu.vector_store %arg7[%c0_42, %c0_43, %c0_44, %c0_45], %74 {strides = array<i32>} : memref<1x8x8x128xf32, #tpu.memory_space<vmem>>, vector<1x8x8x128xf32>,
    return
  }
  func.func @transform_0(%arg0: i32, %arg1: i32) -> (i32, i32, i32, i32) {
    %c0_i32 = arith.constant 0 : i32
    %c0_i32_0 = arith.constant 0 : i32
    %c0_i32_1 = arith.constant 0 : i32
    %c0_i32_2 = arith.constant 0 : i32
    return %arg0, %c0_i32, %c0_i32_0, %c0_i32_1 : i32, i32, i32, i32
  }
  func.func @transform_1(%arg0: i32, %arg1: i32) -> (i32, i32, i32) {
    %c0_i32 = arith.constant 0 : i32
    %c0_i32_0 = arith.constant 0 : i32
    %c0_i32_1 = arith.constant 0 : i32
    %c0_i32_2 = arith.constant 0 : i32
    return %c0_i32, %c0_i32_0, %c0_i32_1 : i32, i32, i32
  }
  func.func @transform_2(%arg0: i32, %arg1: i32) -> (i32, i32) {
    %c0_i32 = arith.constant 0 : i32
    %c0_i32_0 = arith.constant 0 : i32
    %c0_i32_1 = arith.constant 0 : i32
    return %c0_i32, %c0_i32_0 : i32, i32
  }
  func.func @transform_3(%arg0: i32, %arg1: i32) -> (i32, i32) {
    %c0_i32 = arith.constant 0 : i32
    %c0_i32_0 = arith.constant 0 : i32
    %c0_i32_1 = arith.constant 0 : i32
    return %c0_i32, %c0_i32_0 : i32, i32
  }
  func.func @transform_4(%arg0: i32, %arg1: i32) -> (i32, i32, i32, i32) {
    %c0_i32 = arith.constant 0 : i32
    %c0_i32_0 = arith.constant 0 : i32
    %c0_i32_1 = arith.constant 0 : i32
    return %arg0, %c0_i32, %c0_i32_0, %arg1 : i32, i32, i32, i32
  }
  func.func @transform_5(%arg0: i32, %arg1: i32) -> (i32, i32, i32, i32) {
    %c0_i32 = arith.constant 0 : i32
    %c0_i32_0 = arith.constant 0 : i32
    %c0_i32_1 = arith.constant 0 : i32
    return %arg0, %c0_i32, %c0_i32_0, %arg1 : i32, i32, i32, i32
  }
}

</mosaic_0001>

<bundles_post_ra>
// kernel: basic_block_forward.3
= control target key start
LH: loop header
LB: loop body
LE: loop exit
PB: predicated region body
PF: predicated region fallthrough
CT: control target
= control target key end

     0   :  { %s354_s9 = smov 0   ;;  %s420_s0 = inlined_call_operand.vmem [shape: f32[2,16,16,128], index: 0, kind: input, shape index: {}]   ;;  %s421_s1 = inlined_call_operand.vmem [shape: f32[1,128], index: 1, kind: output, shape index: {0}]   ;;  %s422_s2 = inlined_call_operand.vmem [shape: f32[1,128], index: 2, kind: output, shape index: {1}]  }
   0x1 LB: > { %s311_s10 = sadd.s32 4294967295, %s336_s9   ;;  %p314_p0 = scmp.ge.s32.totalorder %s336_s9, 1  ;;  %s336_s9 = sphi %s354_s9, %s13_s9  }
   0x2   : > { %p105_p1 = scmp.lt.s32.totalorder %s336_s9, 3 }
   0x4   : > { %p106_p2 = pnand %p314_p0, %p105_p1 }
   0x5   : > { %p122_p3 = scmp.lt.s32.totalorder (!%p106_p2), %s311_s10, 1  ;;  %p317_p4 = scmp.ne.s32.totalorder (!%p106_p2), %s311_s10, 0 }
   0x6   : > { %109 = sbr.rel (%p106_p2) target bundleno = 100 (0x64), region = 24 }
   0xb   : > { %s123_s11 = scalar_select %p122_p3, %s311_s10, 1 }
   0xc   : > { %130 = sbr.rel (%p317_p4) target bundleno = 20 (0x14), region = 28 }
   0xd   : > { %s320_s12 = sshll.u32 %s123_s11, 8 }
   0xe   : > { %s365_s15 = scalar_lea.vmem %s420_s0, %s320_s12 }
  0x11   : > { %v338_v0 = vmov 0.0  }
  0x12   : > { %131 = vst [vmem:[%s421_s1] sm:$0x1] %v338_v0 }
  0x13   : > { %132 = vst [vmem:[%s422_s2] sm:$0x1] %v338_v0 }
  0x14 PF: > { %v133_v1 = vld [vmem:[%s365_s15] sm:$0xff]  ;;  %v134_v2 = vld [vmem:[%s365_s15 + $0x8] sm:$0xff]  ;;  %v135_v3 = vld [vmem:[%s365_s15 + $0x10] sm:$0xff] }
  0x15   : > { %v136_v4 = vld [vmem:[%s365_s15 + $0x18] sm:$0xff]  ;;  %v166_v5 = vadd.f32 %v134_v2, %v133_v1  ;;  %v206_v6 = vmul.f32 %v133_v1, %v133_v1  ;;  %v207_v7 = vmul.f32 %v134_v2, %v134_v2  ;;  %v208_v8 = vmul.f32 %v135_v3, %v135_v3  ;;  %v137_v9 = vld [vmem:[%s365_s15 + $0x20] sm:$0xff]  ;;  %v138_v13 = vld [vmem:[%s365_s15 + $0x28] sm:$0xff] }
  0x16   : > { %v209_v11 = vmul.f32 %v136_v4, %v136_v4  ;;  %v210_v15 = vmul.f32 %v137_v9, %v137_v9  ;;  %v139_v17 = vld [vmem:[%s365_s15 + $0x30] sm:$0xff]  ;;  %v211_v19 = vmul.f32 %v138_v13, %v138_v13  ;;  %v140_v21 = vld [vmem:[%s365_s15 + $0x38] sm:$0xff]  ;;  %v141_v25 = vld [vmem:[%s365_s15 + $0x40] sm:$0xff] }
  0x17   : > { %v167_v10 = vadd.f32 %v166_v5, %v135_v3  ;;  %v238_v12 = vadd.f32 %v207_v7, %v206_v6  ;;  %v212_v23 = vmul.f32 %v139_v17, %v139_v17  ;;  %v213_v27 = vmul.f32 %v140_v21, %v140_v21  ;;  %v142_v29 = vld [vmem:[%s365_s15 + $0x48] sm:$0xff]  ;;  %v143_v33 = vld [vmem:[%s365_s15 + $0x50] sm:$0xff]  ;;  %v144_v37 = vld [vmem:[%s365_s15 + $0x58] sm:$0xff] }
  0x18   : > { %v214_v31 = vmul.f32 %v141_v25, %v141_v25  ;;  %v215_v35 = vmul.f32 %v142_v29, %v142_v29  ;;  %v216_v39 = vmul.f32 %v143_v33, %v143_v33  ;;  %v145_v41 = vld [vmem:[%s365_s15 + $0x60] sm:$0xff]  ;;  %v217_v43 = vmul.f32 %v144_v37, %v144_v37  ;;  %v146_v45 = vld [vmem:[%s365_s15 + $0x68] sm:$0xff]  ;;  %v147_v49 = vld [vmem:[%s365_s15 + $0x70] sm:$0xff] }
  0x19   : > { %v168_v14 = vadd.f32 %v167_v10, %v136_v4  ;;  %v239_v16 = vadd.f32 %v238_v12, %v208_v8  ;;  %v218_v47 = vmul.f32 %v145_v41, %v145_v41  ;;  %v219_v51 = vmul.f32 %v146_v45, %v146_v45  ;;  %v148_v53 = vld [vmem:[%s365_s15 + $0x78] sm:$0xff]  ;;  %v149_v57 = vld [vmem:[%s365_s15 + $0x80] sm:$0xff]  ;;  %v150_v61 = vld [vmem:[%s365_s15 + $0x88] sm:$0xff] }
  0x1a   : > { %v220_v55 = vmul.f32 %v147_v49, %v147_v49  ;;  %v221_v59 = vmul.f32 %v148_v53, %v148_v53  ;;  %v222_v63 = vmul.f32 %v149_v57, %v149_v57  ;;  %v151_v1 = vld [vmem:[%s365_s15 + $0x90] sm:$0xff]  ;;  %v223_v3 = vmul.f32 %v150_v61, %v150_v61  ;;  %v152_v5 = vld [vmem:[%s365_s15 + $0x98] sm:$0xff] }
  0x1b   : > { %v169_v18 = vadd.f32 %v168_v14, %v137_v9  ;;  %v240_v20 = vadd.f32 %v239_v16, %v209_v11  ;;  %v224_v7 = vmul.f32 %v151_v1, %v151_v1  ;;  %v153_v9 = vld [vmem:[%s365_s15 + $0xa0] sm:$0xff]  ;;  %v225_v11 = vmul.f32 %v152_v5, %v152_v5 }
  0x1d   : > { %v170_v22 = vadd.f32 %v169_v18, %v138_v13  ;;  %v241_v24 = vadd.f32 %v240_v20, %v210_v15  ;;  %v154_v13 = vld [vmem:[%s365_s15 + $0xa8] sm:$0xff]  ;;  %v226_v15 = vmul.f32 %v153_v9, %v153_v9 }
  0x1f   : > { %v171_v26 = vadd.f32 %v170_v22, %v139_v17  ;;  %v242_v28 = vadd.f32 %v241_v24, %v211_v19  ;;  %v155_v17 = vld [vmem:[%s365_s15 + $0xb0] sm:$0xff]  ;;  %v227_v19 = vmul.f32 %v154_v13, %v154_v13 }
  0x21   : > { %v172_v30 = vadd.f32 %v171_v26, %v140_v21  ;;  %v243_v32 = vadd.f32 %v242_v28, %v212_v23  ;;  %v156_v21 = vld [vmem:[%s365_s15 + $0xb8] sm:$0xff]  ;;  %v228_v23 = vmul.f32 %v155_v17, %v155_v17 }
  0x23   : > { %v173_v34 = vadd.f32 %v172_v30, %v141_v25  ;;  %v244_v36 = vadd.f32 %v243_v32, %v213_v27  ;;  %v157_v25 = vld [vmem:[%s365_s15 + $0xc0] sm:$0xff]  ;;  %v229_v27 = vmul.f32 %v156_v21, %v156_v21 }
  0x25   : > { %v174_v38 = vadd.f32 %v173_v34, %v142_v29  ;;  %v245_v40 = vadd.f32 %v244_v36, %v214_v31  ;;  %v158_v29 = vld [vmem:[%s365_s15 + $0xc8] sm:$0xff]  ;;  %v230_v31 = vmul.f32 %v157_v25, %v157_v25 }
  0x27   : > { %v175_v42 = vadd.f32 %v174_v38, %v143_v33  ;;  %v246_v44 = vadd.f32 %v245_v40, %v215_v35  ;;  %v159_v33 = vld [vmem:[%s365_s15 + $0xd0] sm:$0xff]  ;;  %v231_v35 = vmul.f32 %v158_v29, %v158_v29 }
  0x29   : > { %v176_v46 = vadd.f32 %v175_v42, %v144_v37  ;;  %v247_v48 = vadd.f32 %v246_v44, %v216_v39  ;;  %v160_v37 = vld [vmem:[%s365_s15 + $0xd8] sm:$0xff]  ;;  %v232_v39 = vmul.f32 %v159_v33, %v159_v33 }
  0x2b   : > { %v177_v50 = vadd.f32 %v176_v46, %v145_v41  ;;  %v248_v52 = vadd.f32 %v247_v48, %v217_v43  ;;  %v161_v41 = vld [vmem:[%s365_s15 + $0xe0] sm:$0xff]  ;;  %v233_v43 = vmul.f32 %v160_v37, %v160_v37 }
  0x2d   : > { %v178_v54 = vadd.f32 %v177_v50, %v146_v45  ;;  %v249_v56 = vadd.f32 %v248_v52, %v218_v47  ;;  %v162_v45 = vld [vmem:[%s365_s15 + $0xe8] sm:$0xff]  ;;  %v234_v47 = vmul.f32 %v161_v41, %v161_v41 }
  0x2f   : > { %v179_v58 = vadd.f32 %v178_v54, %v147_v49  ;;  %v250_v60 = vadd.f32 %v249_v56, %v219_v51  ;;  %v163_v49 = vld [vmem:[%s365_s15 + $0xf0] sm:$0xff]  ;;  %v235_v51 = vmul.f32 %v162_v45, %v162_v45 }
  0x31   : > { %v180_v62 = vadd.f32 %v179_v58, %v148_v53  ;;  %v251_v0 = vadd.f32 %v250_v60, %v220_v55  ;;  %v164_v53 = vld [vmem:[%s365_s15 + $0xf8] sm:$0xff]  ;;  %v236_v55 = vmul.f32 %v163_v49, %v163_v49 }
  0x32   : > { %v237_v58 = vmul.f32 %v164_v53, %v164_v53 }
  0x33   : > { %v181_v2 = vadd.f32 %v180_v62, %v149_v57  ;;  %v252_v4 = vadd.f32 %v251_v0, %v221_v59 }
  0x35   : > { %v182_v6 = vadd.f32 %v181_v2, %v150_v61  ;;  %v253_v8 = vadd.f32 %v252_v4, %v222_v63 }
  0x37   : > { %v183_v10 = vadd.f32 %v182_v6, %v151_v1  ;;  %v254_v12 = vadd.f32 %v253_v8, %v223_v3 }
  0x39   : > { %v184_v14 = vadd.f32 %v183_v10, %v152_v5  ;;  %v255_v16 = vadd.f32 %v254_v12, %v224_v7  ;;  %v165_v7 = vld [vmem:[%s421_s1] sm:$0x1] }
  0x3a   : > { %v205_v12 = vld [vmem:[%s422_s2] sm:$0x1] }
  0x3b   : > { %v185_v18 = vadd.f32 %v184_v14, %v153_v9  ;;  %v256_v20 = vadd.f32 %v255_v16, %v225_v11 }
  0x3d   : > { %v186_v22 = vadd.f32 %v185_v18, %v154_v13  ;;  %v257_v24 = vadd.f32 %v256_v20, %v226_v15 }
  0x3f   : > { %v187_v26 = vadd.f32 %v186_v22, %v155_v17  ;;  %v258_v28 = vadd.f32 %v257_v24, %v227_v19 }
  0x41   : > { %v188_v30 = vadd.f32 %v187_v26, %v156_v21  ;;  %v259_v32 = vadd.f32 %v258_v28, %v228_v23 }
  0x43   : > { %v189_v34 = vadd.f32 %v188_v30, %v157_v25  ;;  %v260_v36 = vadd.f32 %v259_v32, %v229_v27 }
  0x45   : > { %v190_v38 = vadd.f32 %v189_v34, %v158_v29  ;;  %v261_v40 = vadd.f32 %v260_v36, %v230_v31 }
  0x47   : > { %v191_v42 = vadd.f32 %v190_v38, %v159_v33  ;;  %v262_v44 = vadd.f32 %v261_v40, %v231_v35 }
  0x49   : > { %v192_v46 = vadd.f32 %v191_v42, %v160_v37  ;;  %v263_v48 = vadd.f32 %v262_v44, %v232_v39 }
  0x4b   : > { %v193_v50 = vadd.f32 %v192_v46, %v161_v41  ;;  %v264_v52 = vadd.f32 %v263_v48, %v233_v43 }
  0x4d   : > { %v194_v54 = vadd.f32 %v193_v50, %v162_v45  ;;  %v265_v56 = vadd.f32 %v264_v52, %v234_v47 }
  0x4f   : > { %v195_v57 = vadd.f32 %v194_v54, %v163_v49  ;;  %v266_v59 = vadd.f32 %v265_v56, %v235_v51 }
  0x51   : > { %v196_v60 = vadd.f32 %v195_v57, %v164_v53  ;;  %v267_v61 = vadd.f32 %v266_v59, %v236_v55 }
  0x53   : > { %v197_v62 = vrot.slane %v196_v60, 4  ;;  %v268_v63 = vadd.f32 %v267_v61, %v237_v58 }
  0x55   : > { %v198_v0 = vadd.f32 %v197_v62, %v196_v60  ;;  %v269_v1 = vrot.slane %v268_v63, 4 }
  0x57   : > { %v199_v2 = vrot.slane %v198_v0, 2  ;;  %v270_v3 = vadd.f32 %v269_v1, %v268_v63 }
  0x59   : > { %v200_v4 = vadd.f32 %v199_v2, %v198_v0  ;;  %v271_v5 = vrot.slane %v270_v3, 2 }
  0x5b   : > { %v201_v6 = vrot.slane %v200_v4, 1  ;;  %v272_v8 = vadd.f32 %v271_v5, %v270_v3 }
  0x5d   : > { %v202_v9 = vadd.f32 %v201_v6, %v200_v4  ;;  %v273_v10 = vrot.slane %v272_v8, 1 }
  0x5f   : > { %v203_v11 = vadd.f32 %v202_v9, %v165_v7  ;;  %v274_v13 = vadd.f32 %v273_v10, %v272_v8 }
  0x61   : > { %204 = vst [vmem:[%s421_s1] sm:$0x1] %v203_v11  ;;  %v275_v14 = vadd.f32 %v274_v13, %v205_v12 }
  0x63   : > { %276 = vst [vmem:[%s422_s2] sm:$0x1] %v275_v14 }
  0x64 PF: > { %s13_s9 = sadd.s32 1, %s336_s9  }
  0x65   : > { %p10_p5 = scmp.ge.s32.totalorder %s13_s9, 4  }
  0x67   :  { %12 = sbr.rel (!%p10_p5) target bundleno = 1 (0x1), region = 62 }

// kernel: basic_block_forward.5
= control target key start
LH: loop header
LB: loop body
LE: loop exit
PB: predicated region body
PF: predicated region fallthrough
CT: control target
= control target key end

     0   :  { %s3237_s18 = smov 0   ;;  %s3239_s19 = smov 0   ;;  %s3800_s0 = inlined_call_operand.vmem [shape: bf16[2,8,8,128], index: 0, kind: input, shape index: {}]   ;;  %s3801_s1 = inlined_call_operand.vmem [shape: bf16[1,1152,128], index: 1, kind: input, shape index: {}]   ;;  %s3802_s2 = inlined_call_operand.vmem [shape: f32[1,128], index: 2, kind: input, shape index: {}]   ;;  %s3803_s3 = inlined_call_operand.vmem [shape: f32[1,128], index: 3, kind: input, shape index: {}]   ;;  %s3804_s4 = inlined_call_operand.vmem [shape: f32[2,8,8,128], index: 4, kind: input, shape index: {}]   ;;  %s3805_s5 = inlined_call_operand.vmem [shape: f32[2,8,8,128], index: 5, kind: output, shape index: {}]  }
   0x1   :  { %s3241_s20 = smov 0  }
   0x2 LB: > { %s27_s21 = sadd.s32 1, %s3200_s19  ;;  %p2544_p0 = scmp.ge.s32.totalorder %s3204_s20, 1  ;;  %s3204_s20 = sphi %s3241_s20, %s15_s20   ;;  %s3200_s19 = sphi %s3239_s19, %s3815_s19   ;;  %s3196_s18 = sphi %s3237_s18, %s3814_s18  }
   0x3   : > { %p29_p1 = scmp.ge.s32.totalorder %s27_s21, 2  ;;  %p216_p2 = scmp.lt.s32.totalorder %s3204_s20, 3 }
   0x5   : > { %s3817_s21 = smov (%p29_p1, %s27_s21), 0  ;;  %p217_p3 = pnand %p2544_p0, %p216_p2 }
   0x6   : > { %p255_p4 = scmp.lt.s32.totalorder (!%p217_p3), %s3196_s18, 1 }
   0x7   : > { %220 = sbr.rel (%p217_p3) target bundleno = 351 (0x15f), region = 40 }
   0xc   : > { %v3035_v0 = vld [vmem:[%s3801_s1 + $0x78] sm:$0xff]  ;;  %v3206_v2 = vmov 0   ;;  %v3034_v3 = vld [vmem:[%s3801_s1 + $0x70] sm:$0xff]  ;;  %s3819_s18 = smov (!%p255_p4, %s3196_s18), 1  ;;  %v3033_v6 = vld [vmem:[%s3801_s1 + $0x68] sm:$0xff]  ;;  %vm438_vm0 = vcmask 1043456  }
   0xd   : > { %v3047_v1 = vld [vmem:[%s3801_s1 + $0xb8] sm:$0xff]  ;;  %291 = vst [vmem:[#allocation2 + $0x20] sm:$0xf] %v3206_v2  ;;  %3139 = vmatpush.bf16.msra.mxu1 %v3035_v0  ;;  %1351 = vmatpush.bf16.msra.mxu0 %v3035_v0  ;;  %v3046_v4 = vld [vmem:[%s3801_s1 + $0xb0] sm:$0xff]  ;;  %s3009_s7 = sshll.u32 %s3819_s18, 5  ;;  %v3045_v10 = vld [vmem:[%s3801_s1 + $0xa8] sm:$0xff] }
   0xe   : > { %292 = vst [vmem:[#allocation2 + $0x24] sm:$0x1] %v3206_v2  ;;  %1578 = vmatpush.bf16.msra.mxu2 %v3047_v1  ;;  %v3059_v5 = vld [vmem:[%s3801_s1 + $0xf8] sm:$0xff]  ;;  %v3058_v7 = vld [vmem:[%s3801_s1 + $0xf0] sm:$0xff]  ;;  %s259_s14 = scalar_lea.vmem %s3800_s0, %s3009_s7  ;;  %v3292_v13 = vld [vmem:[%s3802_s2] ss:$0 sm:$0xff] }
   0xf   : > { %293 = vst [vmem:[#allocation2 + $0x28] sm:$0xf] %v3206_v2  ;;  %1712 = vmatpush.bf16.msra.mxu3 %v3059_v5  ;;  %v3136_v8 = vld [vmem:[%s259_s14 + $0x8] sm:$0xff]   ;;  %v3137_v9 = vld [vmem:[%s259_s14 + $0x10] sm:$0xff]   ;;  %v3297_v14 = vld [vmem:[%s3803_s3] ss:$0 sm:$0xff] }
  0x10   : > { %294 = vst [vmem:[#allocation2 + $0x2c] sm:$0x1] %v3206_v2  ;;  %v3127_v11 = vunpack.c.h.bf16 %v3136_v8  ;;  %v3130_v12 = vunpack.c.l.bf16 %v3137_v9  ;;  %v3131_v15 = vunpack.c.h.bf16 %v3137_v9  ;;  %v3126_v16 = vunpack.c.l.bf16 %v3136_v8  ;;  %v3057_v17 = vld [vmem:[%s3801_s1 + $0xe8] sm:$0xff]  ;;  %v3121_v20 = vld [vmem:[%s259_s14] sm:$0xff]   ;;  %v3311_v24 = vld [vmem:[%s259_s14 + $0x18] sm:$0xff]   ;;  %s3010_s27 = sshll.u32 %s3819_s18, 6 }
  0x11   : > { %3140 = vmatpush.bf16.msra.mxu1 %v3034_v3  ;;  %1352 = vmatpush.bf16.msra.mxu0 %v3034_v3  ;;  %283 = vst [vmem:[#allocation2] sm:$0xf] %v3206_v2  ;;  %v3032_v22 = vld [vmem:[%s3801_s1 + $0x60] sm:$0xff]  ;;  %v3122_v23 = vunpack.c.l.bf16 %v3121_v20  ;;  %v3134_v30 = vunpack.c.l.bf16 %v3311_v24  ;;  %v3123_v32 = vunpack.c.h.bf16 %v3121_v20  ;;  %vm444_vm1 = vcmask 1040384   ;;  %v3031_v35 = vld [vmem:[%s3801_s1 + $0x58] sm:$0xff]  ;;  %v3030_v50 = vld [vmem:[%s3801_s1 + $0x50] sm:$0xff]  ;;  %s3754_s30 = scalar_lea.vmem %s3804_s4, %s3010_s27  ;;  %s3760_s7 = scalar_lea.vmem %s3805_s5, %s3010_s27 }
  0x12   : > { %1579 = vmatpush.bf16.msra.mxu2 %v3046_v4  ;;  %v325_v18 = vmul.f32 %v3292_v13, %v3127_v11  ;;  %v326_v19 = vmul.f32 %v3292_v13, %v3130_v12  ;;  %284 = vst [vmem:[#allocation2 + $0x4] sm:$0x1] %v3206_v2  ;;  %v327_v21 = vmul.f32 %v3292_v13, %v3131_v15  ;;  %v3044_v25 = vld [vmem:[%s3801_s1 + $0xa0] sm:$0xff]  ;;  %v3043_v36 = vld [vmem:[%s3801_s1 + $0x98] sm:$0xff]  ;;  %vm439_vm2 = vsmask.f32 7938 }
  0x13   : > { %1713 = vmatpush.bf16.msra.mxu3 %v3058_v7  ;;  %285 = vst [vmem:[#allocation2 + $0x8] sm:$0xf] %v3206_v2  ;;  %v324_v28 = vmul.f32 %v3292_v13, %v3126_v16  ;;  %v322_v29 = vmul.f32 %v3292_v13, %v3122_v23  ;;  %vm445_vm3 = vsmask.f32 256  ;;  %v328_v43 = vmul.f32 %v3292_v13, %v3134_v30  ;;  %v3042_v57 = vld [vmem:[%s3801_s1 + $0x90] sm:$0xff]  ;;  %vm3353_vm5 = vmand %vm438_vm0, %vm439_vm2  ;;  %v3029_v62 = vld [vmem:[%s3801_s1 + $0x48] sm:$0xff] }
  0x14   : > { %v336_v26 = vadd.f32 %v3297_v14, %v325_v18  ;;  %v337_v27 = vadd.f32 %v3297_v14, %v326_v19  ;;  %286 = vst [vmem:[#allocation2 + $0xc] sm:$0x1] %v3206_v2  ;;  %v338_v31 = vadd.f32 %v3297_v14, %v327_v21  ;;  %v323_v45 = vmul.f32 %v3292_v13, %v3123_v32  ;;  %v462_v51 = vld [vmem:[#allocation2 + $0x20] sm:$0xf]  ;;  %vm3364_vm6 = vmand %vm444_vm1, %vm445_vm3  ;;  %v3041_v23 = vld [vmem:[%s3801_s1 + $0x88] sm:$0xff] }
  0x15   : > { %3141 = vmatpush.bf16.msra.mxu1 %v3033_v6  ;;  %1353 = vmatpush.bf16.msra.mxu0 %v3033_v6  ;;  %287 = vst [vmem:[#allocation2 + $0x10] sm:$0xf] %v3206_v2  ;;  %v333_v37 = vadd.f32 %v3297_v14, %v322_v29  ;;  %v3337_v41 = vadd.f32 %v3297_v14, %v324_v28  ;;  %v465_v52 = vld [vmem:[#allocation2 + $0x24] sm:$0x1]  ;;  %vm524_vm4 = vsmask.f32 3328 }
  0x16   : > { %1580 = vmatpush.bf16.msra.mxu2 %v3045_v10  ;;  %v344_v33 = vmax.f32 %v336_v26, 0.0  ;;  %v345_v34 = vmax.f32 %v337_v27, 0.0  ;;  %288 = vst [vmem:[#allocation2 + $0x14] sm:$0x1] %v3206_v2  ;;  %v346_v44 = vmax.f32 %v338_v31, 0.0  ;;  %v3056_v0 = vld [vmem:[%s3801_s1 + $0xe0] sm:$0xff]  ;;  %v3375_v5 = vadd.f32 %v3297_v14, %v328_v43 }
  0x17   : > { %1714 = vmatpush.bf16.msra.mxu3 %v3057_v17  ;;  %289 = vst [vmem:[#allocation2 + $0x18] sm:$0xf] %v3206_v2  ;;  %v341_v42 = vmax.f32 %v333_v37, 0.0  ;;  %v468_v53 = vld [vmem:[#allocation2 + $0x28] sm:$0xf]  ;;  %v343_v61 = vmax.f32 %v3337_v41, 0.0  ;;  %v3380_v7 = vadd.f32 %v3297_v14, %v323_v45 }
  0x18   : > { %v352_v38 = vpack.c.bf16 %v344_v33, %v344_v33  ;;  %v353_v39 = vpack.c.bf16 %v345_v34, %v345_v34  ;;  %290 = vst [vmem:[#allocation2 + $0x1c] sm:$0x1] %v3206_v2  ;;  %v3334_v40 = vld [vmem:[#allocation2] sm:$0xf]  ;;  %v471_v54 = vld [vmem:[#allocation2 + $0x2c] sm:$0x1]  ;;  %v3377_v6 = vpack.c.bf16 %v346_v44, %v346_v44 }
  0x19   : > { %3142 = vmatpush.bf16.msra.mxu1 %v3032_v22  ;;  %1354 = vmatpush.bf16.msra.mxu0 %v3032_v22  ;;  %295 = vst [vmem:[#allocation2 + $0x30] sm:$0xf] %v3206_v2  ;;  %v349_v55 = vpack.c.bf16 %v341_v42, %v341_v42  ;;  %v528_v56 = vshrl.u32 %v3334_v40, 16  ;;  %v509_v3 = vld [vmem:[#allocation2 + $0x4] sm:$0x1]  ;;  %v531_v18 = vshll.u32 %v3334_v40, 16  ;;  %v3415_v40 = vpack.c.bf16 %v343_v61, %v343_v61 }
  0x1a   : > { %1581 = vmatpush.bf16.msra.mxu2 %v3044_v25  ;;  %v382_v46 = vshrl.u32 %v352_v38, 16  ;;  %v385_v47 = vshll.u32 %v352_v38, 16  ;;  %v390_v48 = vshrl.u32 %v353_v39, 16  ;;  %v393_v49 = vshll.u32 %v353_v39, 16  ;;  %296 = vst [vmem:[#allocation2 + $0x34] sm:$0x1] %v3206_v2 }
  0x1b   : > { %297 = vst [vmem:[#allocation2 + $0x38] sm:$0xf] %v3206_v2  ;;  %v358_v1 = vshrl.u32 %v349_v55, 16  ;;  %v3372_v4 = vld [vmem:[#allocation2] sm:$0xe]  ;;  %v361_v16 = vshll.u32 %v349_v55, 16  ;;  %1715 = vmatpush.bf16.msra.mxu3 %v3056_v0 }
  0x1c   : > { %v384_v58 = vrot.slane %v382_v46, 7  ;;  %v392_v59 = vrot.slane %v390_v48, 7  ;;  %298 = vst [vmem:[#allocation2 + $0x3c] sm:$0x1] %v3206_v2  ;;  %v657_v12 = vld [vmem:[#allocation2 + $0x4] sm:$0x1] }
  0x1d   : > { %3143 = vmatpush.bf16.msra.mxu1 %v3031_v35  ;;  %1355 = vmatpush.bf16.msra.mxu0 %v3031_v35  ;;  %299 = vst [vmem:[#allocation2 + $0x40] sm:$0xf] %v3206_v2  ;;  %v360_v15 = vrot.slane %v358_v1, 7  ;;  %v530_v17 = vrot.slane %v528_v56, 4  ;;  %v441_v25 = vld [vmem:[#allocation2 + $0x8] sm:$0xf] }
  0x1e   : > { %1582 = vmatpush.bf16.msra.mxu2 %v3043_v36  ;;  %v387_v8 = vor.u32 %v385_v47, %v384_v58  ;;  %v388_v9 = vrot.slane %v384_v58, 4  ;;  %v395_v10 = vor.u32 %v393_v49, %v392_v59  ;;  %v396_v11 = vrot.slane %v392_v59, 4  ;;  %300 = vst [vmem:[#allocation2 + $0x44] sm:$0x1] %v3206_v2  ;;  %v447_v26 = vld [vmem:[#allocation2 + $0xc] sm:$0x1] }
  0x1f   : > { %301 = vst [vmem:[#allocation2 + $0x48] sm:$0xf] %v3206_v2  ;;  %v3028_v27 = vld [vmem:[%s3801_s1 + $0x40] sm:$0xff]  ;;  %v363_v28 = vor.u32 %v361_v16, %v360_v15  ;;  %v364_v29 = vrot.slane %v360_v15, 4  ;;  %v533_v30 = vrot.slane %v531_v18, 5  ;;  %v537_v31 = vshll.u32 %v509_v3, 16 }
  0x20   : > { %v463_v19 = vsel %vm3353_vm5, %v387_v8, %v462_v51  ;;  %v466_v20 = vsel %vm3364_vm6, %v388_v9, %v465_v52  ;;  %v469_v21 = vsel %vm3353_vm5, %v395_v10, %v468_v53  ;;  %v472_v22 = vsel %vm3364_vm6, %v396_v11, %v471_v54  ;;  %v3055_v32 = vld [vmem:[%s3801_s1 + $0xd8] sm:$0xff]  ;;  %v3040_v36 = vld [vmem:[%s3801_s1 + $0x80] sm:$0xff]  ;;  %v3054_v44 = vld [vmem:[%s3801_s1 + $0xd0] sm:$0xff]  ;;  %302 = vst [vmem:[#allocation2 + $0x4c] sm:$0x1] %v3206_v2 }
  0x21   : > { %3144 = vmatpush.bf16.msra.mxu1 %v3030_v50  ;;  %1356 = vmatpush.bf16.msra.mxu0 %v3030_v50  ;;  %464 = vst [vmem:[#allocation2 + $0x20] sm:$0xf] %v463_v19  ;;  %vm688_vm7 = vcmask 1042432   ;;  %vm689_vm8 = vcmask 1046532   ;;  %v2551_v33 = vrot.slane %v3372_v4, 9  ;;  %v693_v34 = vrot.slane %v657_v12, 5 }
  0x22   : > { %1583 = vmatpush.bf16.msra.mxu2 %v3042_v57  ;;  %467 = vst [vmem:[#allocation2 + $0x24] sm:$0x1] %v466_v20  ;;  %vm525_vm9 = vsmask.f32 7440  ;;  %v3023_v35 = vld [vmem:[%s3801_s1 + $0x38] sm:$0xff]  ;;  %v442_v37 = vsel %vm3353_vm5, %v363_v28, %v441_v25  ;;  %v534_v38 = vor.u32 %v533_v30, %v530_v17  ;;  %vm3411_vm10 = vmor %vm688_vm7, %vm689_vm8  ;;  %v448_v41 = vsel %vm3364_vm6, %v364_v29, %v447_v26  ;;  %v3022_v51 = vld [vmem:[%s3801_s1 + $0x30] sm:$0xff] }
  0x23   : > { %470 = vst [vmem:[#allocation2 + $0x28] sm:$0xf] %v469_v21  ;;  %v539_v42 = vrot.slane %v537_v31, 5  ;;  %v3071_v43 = vld [vmem:[%s3801_s1 + $0x138] sm:$0xff]  ;;  %v347_v45 = vmax.f32 %v3375_v5, 0.0  ;;  %1716 = vmatpush.bf16.msra.mxu3 %v3055_v32  ;;  %v398_v47 = vshrl.u32 %v3377_v6, 16  ;;  %vm3432_vm11 = vmor %vm524_vm4, %vm525_vm9  ;;  %v694_v2 = vsel %vm3411_vm10, %v2551_v33, %v693_v34 }
  0x24   : > { %473 = vst [vmem:[#allocation2 + $0x2c] sm:$0x1] %v472_v22  ;;  %v535_v46 = vrot.slane %v534_v38, 4  ;;  %v401_v48 = vshll.u32 %v3377_v6, 16  ;;  %v342_v49 = vmax.f32 %v3380_v7, 0.0  ;;  %v3070_v54 = vld [vmem:[%s3801_s1 + $0x130] sm:$0xff] }
  0x25   : > { %3145 = vmatpush.bf16.msra.mxu1 %v3029_v62  ;;  %1357 = vmatpush.bf16.msra.mxu0 %v3029_v62  ;;  %443 = vst [vmem:[#allocation2 + $0x8] sm:$0xf] %v442_v37  ;;  %v355_v52 = vpack.c.bf16 %v347_v45, %v347_v45  ;;  %v3053_v55 = vld [vmem:[%s3801_s1 + $0xc8] sm:$0xff]  ;;  %v400_v56 = vrot.slane %v398_v47, 7  ;;  %v374_v58 = vshrl.u32 %v3415_v40, 16 }
  0x26   : > { %1584 = vmatpush.bf16.msra.mxu2 %v3041_v23  ;;  %449 = vst [vmem:[#allocation2 + $0xc] sm:$0x1] %v448_v41  ;;  %v540_v53 = vsel %vm3432_vm11, %v535_v46, %v539_v42  ;;  %v3449_v57 = vpack.c.bf16 %v342_v49, %v342_v49  ;;  %v474_v0 = vld [vmem:[#allocation2 + $0x30] sm:$0xf]  ;;  %v3021_v8 = vld [vmem:[%s3801_s1 + $0x28] sm:$0xff]  ;;  %v3020_v41 = vld [vmem:[%s3801_s1 + $0x20] sm:$0xff] }
  0x27   : > { %648 = vst [vmem:[#allocation3 + $0x20] sm:$0xf] %v540_v53  ;;  %v406_v61 = vshrl.u32 %v355_v52, 16  ;;  %v409_v62 = vshll.u32 %v355_v52, 16  ;;  %1717 = vmatpush.bf16.msra.mxu3 %v3054_v44  ;;  %v403_v5 = vor.u32 %v401_v48, %v400_v56  ;;  %v404_v9 = vrot.slane %v400_v56, 4  ;;  %v3069_v23 = vld [vmem:[%s3801_s1 + $0x128] sm:$0xff] }
  0x28   : > { %v516_v59 = vld [vmem:[#allocation2 + $0x20] sm:$0xf]  ;;  %732 = vst [vmem:[#allocation3 + $0x40] sm:$0xf] %v694_v2  ;;  %v477_v11 = vld [vmem:[#allocation2 + $0x34] sm:$0x1] }
  0x29   : > { %3146 = vmatpush.bf16.msra.mxu1 %v3028_v27  ;;  %1358 = vmatpush.bf16.msra.mxu0 %v3028_v27  ;;  %v517_v1 = vld [vmem:[#allocation2 + $0x24] sm:$0x1]  ;;  %v584_v3 = vshrl.u32 %v516_v59, 16  ;;  %v587_v4 = vshll.u32 %v516_v59, 16  ;;  %v408_v10 = vrot.slane %v406_v61, 7  ;;  %v366_v12 = vshrl.u32 %v3449_v57, 16 }
  0x2a   : > { %1585 = vmatpush.bf16.msra.mxu2 %v3040_v36  ;;  %v518_v6 = vld [vmem:[#allocation2 + $0x28] sm:$0xf]  ;;  %v593_v7 = vshll.u32 %v517_v1, 16  ;;  %v480_v20 = vld [vmem:[#allocation2 + $0x38] sm:$0xf]  ;;  %v475_v33 = vsel %vm3353_vm5, %v403_v5, %v474_v0  ;;  %v478_v46 = vsel %vm3364_vm6, %v404_v9, %v477_v11  ;;  %v3052_v56 = vld [vmem:[%s3801_s1 + $0xc0] sm:$0xff] }
  0x2b   : > { %v519_v15 = vld [vmem:[#allocation2 + $0x2c] sm:$0x1]  ;;  %v586_v16 = vrot.slane %v584_v3, 4  ;;  %v589_v17 = vrot.slane %v587_v4, 5  ;;  %v598_v18 = vshrl.u32 %v518_v6, 16  ;;  %v601_v19 = vshll.u32 %v518_v6, 16  ;;  %1718 = vmatpush.bf16.msra.mxu3 %v3053_v55 }
  0x2c   : > { %v595_v21 = vrot.slane %v593_v7, 5  ;;  %v607_v22 = vshll.u32 %v519_v15, 16  ;;  %v411_v25 = vor.u32 %v409_v62, %v408_v10  ;;  %v412_v26 = vrot.slane %v408_v10, 4  ;;  %v483_v27 = vld [vmem:[#allocation2 + $0x3c] sm:$0x1]  ;;  %v3068_v59 = vld [vmem:[%s3801_s1 + $0x120] sm:$0xff] }
  0x2d   : > { %1452 = vmatpush.bf16.msrb.mxu1 %v3023_v35  ;;  %1846 = vmatpush.bf16.msrb.mxu0 %v3071_v43  ;;  %v590_v28 = vor.u32 %v589_v17, %v586_v16  ;;  %v600_v29 = vrot.slane %v598_v18, 4  ;;  %v603_v30 = vrot.slane %v601_v19, 5  ;;  %v510_v31 = vld [vmem:[#allocation2 + $0x8] sm:$0xf]  ;;  %v511_v35 = vld [vmem:[#allocation2 + $0xc] sm:$0x1] }
  0x2e   : > { %v658_v32 = vld [vmem:[#allocation2 + $0x8] sm:$0xe]  ;;  %v609_v34 = vrot.slane %v607_v22, 5  ;;  %v542_v36 = vshrl.u32 %v510_v31, 16  ;;  %v545_v37 = vshll.u32 %v510_v31, 16  ;;  %v551_v44 = vshll.u32 %v511_v35, 16 }
  0x2f   : > { %v2552_v38 = vrot.slane %v658_v32, 9  ;;  %v591_v42 = vrot.slane %v590_v28, 4  ;;  %v604_v43 = vor.u32 %v603_v30, %v600_v29  ;;  %v659_v45 = vld [vmem:[#allocation2 + $0xc] sm:$0x1]  ;;  %476 = vst [vmem:[#allocation2 + $0x30] sm:$0xf] %v475_v33  ;;  %v484_v55 = vsel %vm3364_vm6, %v412_v26, %v483_v27  ;;  %1719 = vmatpush.bf16.msra.mxu3 %v3052_v56 }
  0x30   : > { %v544_v47 = vrot.slane %v542_v36, 4  ;;  %v547_v48 = vrot.slane %v545_v37, 5  ;;  %v697_v49 = vrot.slane %v659_v45, 5  ;;  %479 = vst [vmem:[#allocation2 + $0x34] sm:$0x1] %v478_v46  ;;  %v3095_v2 = vld [vmem:[%s3801_s1 + $0x1b8] sm:$0xff] }
  0x31   : > { %1453 = vmatpush.bf16.msrb.mxu1 %v3022_v51  ;;  %1847 = vmatpush.bf16.msrb.mxu0 %v3070_v54  ;;  %v481_v51 = vsel %vm3353_vm5, %v411_v25, %v480_v20  ;;  %v596_v52 = vsel %vm3432_vm11, %v591_v42, %v595_v21  ;;  %v605_v53 = vrot.slane %v604_v43, 4  ;;  %v553_v54 = vrot.slane %v551_v44, 5  ;;  %v3019_v0 = vld [vmem:[%s3801_s1 + $0x18] sm:$0xff]  ;;  %v450_v7 = vld [vmem:[#allocation2 + $0x10] sm:$0xf]  ;;  %v3017_v45 = vld [vmem:[%s3801_s1 + $0x8] sm:$0xff] }
  0x32   : > { %482 = vst [vmem:[#allocation2 + $0x38] sm:$0xf] %v481_v51  ;;  %v548_v61 = vor.u32 %v547_v48, %v544_v47  ;;  %v698_v62 = vsel %vm3411_vm10, %v2552_v38, %v697_v49  ;;  %2114 = vmatpush.bf16.msrb.mxu2 %v3095_v2  ;;  %v368_v1 = vrot.slane %v366_v12, 7  ;;  %v369_v3 = vshll.u32 %v3449_v57, 16  ;;  %v453_v11 = vld [vmem:[#allocation2 + $0x14] sm:$0x1] }
  0x33   : > { %652 = vst [vmem:[#allocation3 + $0x30] sm:$0xf] %v596_v52  ;;  %v610_v4 = vsel %vm3432_vm11, %v605_v53, %v609_v34  ;;  %v376_v5 = vrot.slane %v374_v58, 7  ;;  %v377_v6 = vshll.u32 %v3415_v40, 16  ;;  %v456_v15 = vld [vmem:[#allocation2 + $0x18] sm:$0xf] }
  0x34   : > { %733 = vst [vmem:[#allocation3 + $0x44] sm:$0xf] %v698_v62  ;;  %v371_v9 = vor.u32 %v369_v3, %v368_v1  ;;  %v372_v10 = vrot.slane %v368_v1, 4  ;;  %v3067_v16 = vld [vmem:[%s3801_s1 + $0x118] sm:$0xff]  ;;  %v740_v25 = vld [vmem:[#allocation2 + $0x8] sm:$0xf] }
  0x35   : > { %1454 = vmatpush.bf16.msrb.mxu1 %v3021_v8  ;;  %1848 = vmatpush.bf16.msrb.mxu0 %v3069_v23  ;;  %653 = vst [vmem:[#allocation3 + $0x34] sm:$0xf] %v610_v4  ;;  %v549_v8 = vrot.slane %v548_v61, 4  ;;  %v379_v57 = vor.u32 %v377_v6, %v376_v5  ;;  %v380_v12 = vrot.slane %v376_v5, 4  ;;  %v459_v19 = vld [vmem:[#allocation2 + $0x1c] sm:$0x1] }
  0x36   : > { %485 = vst [vmem:[#allocation2 + $0x3c] sm:$0x1] %v484_v55  ;;  %v520_v40 = vld [vmem:[#allocation2 + $0x30] sm:$0xf]  ;;  %v451_v17 = vsel %vm3353_vm5, %v371_v9, %v450_v7  ;;  %v454_v18 = vsel %vm3364_vm6, %v372_v10, %v453_v11  ;;  %v3107_v46 = vld [vmem:[%s3801_s1 + $0x1f8] sm:$0xff]  ;;  %v3016_v52 = vld [vmem:[%s3801_s1] sm:$0xff] }
  0x37   : > { %v554_v58 = vsel %vm3432_vm11, %v549_v8, %v553_v54  ;;  %v521_v20 = vld [vmem:[#allocation2 + $0x34] sm:$0x1]  ;;  %v612_v21 = vshrl.u32 %v520_v40, 16  ;;  %v615_v22 = vshll.u32 %v520_v40, 16  ;;  %v457_v23 = vsel %vm3353_vm5, %v379_v57, %v456_v15  ;;  %452 = vst [vmem:[#allocation2 + $0x10] sm:$0xf] %v451_v17  ;;  %2248 = vmatpush.bf16.msrb.mxu3 %v3107_v46 }
  0x38   : > { %649 = vst [vmem:[#allocation3 + $0x24] sm:$0xf] %v554_v58  ;;  %v621_v27 = vshll.u32 %v521_v20, 16  ;;  %v3018_v28 = vld [vmem:[%s3801_s1 + $0x10] sm:$0xff]  ;;  %v460_v29 = vsel %vm3364_vm6, %v380_v12, %v459_v19  ;;  %v492_v51 = vld [vmem:[#allocation2] sm:$0xf] }
  0x39   : > { %1455 = vmatpush.bf16.msrb.mxu1 %v3020_v41  ;;  %1849 = vmatpush.bf16.msrb.mxu0 %v3068_v59  ;;  %v522_v26 = vld [vmem:[#allocation2 + $0x38] sm:$0xf]  ;;  %v614_v30 = vrot.slane %v612_v21, 4  ;;  %v617_v31 = vrot.slane %v615_v22, 5  ;;  %455 = vst [vmem:[#allocation2 + $0x14] sm:$0x1] %v454_v18  ;;  %v3135_v21 = vunpack.c.h.bf16 %v3311_v24 }
  0x3a   : > { %v626_v32 = vshrl.u32 %v522_v26, 16  ;;  %v629_v33 = vshll.u32 %v522_v26, 16  ;;  %458 = vst [vmem:[#allocation2 + $0x18] sm:$0xf] %v457_v23  ;;  %v3094_v35 = vld [vmem:[%s3801_s1 + $0x1b0] sm:$0xff]  ;;  %v623_v41 = vrot.slane %v621_v27, 5 }
  0x3b   : > { %v3036_v34 = vld [vmem:[#allocation3 + $0x40] sm:$0xff]  ;;  %v618_v38 = vor.u32 %v617_v31, %v614_v30  ;;  %461 = vst [vmem:[#allocation2 + $0x1c] sm:$0x1] %v460_v29  ;;  %2115 = vmatpush.bf16.msrb.mxu2 %v3094_v35  ;;  %v3065_v53 = vld [vmem:[%s3801_s1 + $0x108] sm:$0xff]  ;;  %v3064_v9 = vld [vmem:[%s3801_s1 + $0x100] sm:$0xff]  ;;  %v329_v35 = vmul.f32 %v3292_v13, %v3135_v21 }
  0x3c   : > { %v3066_v36 = vld [vmem:[%s3801_s1 + $0x110] sm:$0xff]  ;;  %v3026_v37 = vld [vmem:[#allocation3 + $0x30] sm:$0xff]  ;;  %v628_v42 = vrot.slane %v626_v32, 4  ;;  %v631_v43 = vrot.slane %v629_v33, 5  ;;  %1586 = vmatmul.bf16.vlgmr.msra.gmra.mxu2 %v3036_v34  ;;  %749 = vst [vmem:[#allocation3 + $0x60] sm:$0xf] %v740_v25 }
  0x3d   : > { %1456 = vmatpush.bf16.msrb.mxu1 %v3019_v0  ;;  %1850 = vmatpush.bf16.msrb.mxu0 %v3067_v16  ;;  %v523_v44 = vld [vmem:[#allocation2 + $0x3c] sm:$0x1]  ;;  %v619_v47 = vrot.slane %v618_v38, 4  ;;  %500 = vst [vmem:[#allocation3] sm:$0xf] %v492_v51  ;;  %v3093_v54 = vld [vmem:[%s3801_s1 + $0x1a8] sm:$0xff]  ;;  %v3548_v46 = vadd.f32 %v3297_v14, %v329_v35 }
  0x3e   : > { %1369 = vmatmul.bf16.vlgmr.msra.gmra.mxu1 %v3026_v37  ;;  %v632_v48 = vor.u32 %v631_v43, %v628_v42  ;;  %v635_v49 = vshll.u32 %v523_v44, 16  ;;  %v512_v61 = vld [vmem:[#allocation2 + $0x10] sm:$0xf]  ;;  %v3083_v0 = vld [vmem:[%s3801_s1 + $0x178] sm:$0xff]  ;;  %v493_v5 = vld [vmem:[#allocation2 + $0x8] sm:$0xf] }
  0x3f   : > { %v3024_v2 = vld [vmem:[#allocation3 + $0x20] sm:$0xff]  ;;  %v624_v55 = vsel %vm3432_vm11, %v619_v47, %v623_v41  ;;  %v556_v3 = vshrl.u32 %v512_v61, 16  ;;  %v559_v4 = vshll.u32 %v512_v61, 16  ;;  %2116 = vmatpush.bf16.msrb.mxu2 %v3093_v54  ;;  %501 = vst [vmem:[#allocation3 + $0x4] sm:$0xf] %v493_v5  ;;  %v3117_v60 = vld [vmem:[%s3801_s1 + $0x228] sm:$0xff] }
  0x40   : > { %v633_v56 = vrot.slane %v632_v48, 4  ;;  %v637_v59 = vrot.slane %v635_v49, 5  ;;  %v741_v62 = vld [vmem:[#allocation2 + $0x10] sm:$0xf]  ;;  %1359 = vmatmul.bf16.vlgmr.msra.gmra.mxu0 %v3024_v2  ;;  %654 = vst [vmem:[#allocation3 + $0x38] sm:$0xf] %v624_v55 }
  0x41   : > { %1457 = vmatpush.bf16.msrb.mxu1 %v3018_v28  ;;  %1851 = vmatpush.bf16.msrb.mxu0 %v3066_v36  ;;  %v513_v1 = vld [vmem:[#allocation2 + $0x14] sm:$0x1]  ;;  %v514_v7 = vld [vmem:[#allocation2 + $0x18] sm:$0xf]  ;;  %750 = vst [vmem:[#allocation3 + $0x64] sm:$0xf] %v741_v62 }
  0x42   : > { %v638_v6 = vsel %vm3432_vm11, %v633_v56, %v637_v59  ;;  %v565_v8 = vshll.u32 %v513_v1, 16  ;;  %v515_v10 = vld [vmem:[#allocation2 + $0x1c] sm:$0x1]  ;;  %v558_v11 = vrot.slane %v556_v3, 4  ;;  %v561_v57 = vrot.slane %v559_v4, 5  ;;  %v3082_v55 = vld [vmem:[%s3801_s1 + $0x170] sm:$0xff] }
  0x43   : > { %655 = vst [vmem:[#allocation3 + $0x3c] sm:$0xf] %v638_v6  ;;  %v570_v15 = vshrl.u32 %v514_v7, 16  ;;  %v573_v16 = vshll.u32 %v514_v7, 16  ;;  %v579_v58 = vshll.u32 %v515_v10, 16  ;;  %v3092_v62 = vld [vmem:[%s3801_s1 + $0x1a0] sm:$0xff] }
  0x44   : > { %v567_v12 = vrot.slane %v565_v8, 5  ;;  %v660_v40 = vld [vmem:[#allocation2 + $0x10] sm:$0xe]  ;;  %v562_v17 = vor.u32 %v561_v57, %v558_v11  ;;  %v661_v18 = vld [vmem:[#allocation2 + $0x14] sm:$0x1]  ;;  %2117 = vmatpush.bf16.msrb.mxu2 %v3092_v62  ;;  %v3105_v11 = vld [vmem:[%s3801_s1 + $0x1e8] sm:$0xff] }
  0x45   : > { %1458 = vmatpush.bf16.msrb.mxu1 %v3017_v45  ;;  %1852 = vmatpush.bf16.msrb.mxu0 %v3065_v53  ;;  %v662_v19 = vld [vmem:[#allocation2 + $0x18] sm:$0xe]  ;;  %v663_v20 = vld [vmem:[#allocation2 + $0x1c] sm:$0x1]  ;;  %v572_v22 = vrot.slane %v570_v15, 4  ;;  %v575_v23 = vrot.slane %v573_v16, 5 }
  0x46   : > { %v581_v25 = vrot.slane %v579_v58, 5  ;;  %v2553_v26 = vrot.slane %v660_v40, 9  ;;  %v563_v27 = vrot.slane %v562_v17, 4  ;;  %v701_v28 = vrot.slane %v661_v18, 5  ;;  %v742_v31 = vld [vmem:[#allocation2 + $0x18] sm:$0xf] }
  0x47   : > { %v2554_v29 = vrot.slane %v662_v19, 9  ;;  %v705_v30 = vrot.slane %v663_v20, 5  ;;  %v576_v32 = vor.u32 %v575_v23, %v572_v22  ;;  %v743_v33 = vld [vmem:[#allocation2 + $0x20] sm:$0xf]  ;;  %751 = vst [vmem:[#allocation3 + $0x68] sm:$0xf] %v742_v31 }
  0x48   : > { %v757_v34 = vld [vmem:[#allocation2 + $0x8] sm:$0xf]  ;;  %v568_v24 = vsel %vm3432_vm11, %v563_v27, %v567_v12  ;;  %v3048_v36 = vld [vmem:[#allocation3 + $0x60] sm:$0xff]  ;;  %v702_v37 = vsel %vm3411_vm10, %v2553_v26, %v701_v28  ;;  %752 = vst [vmem:[#allocation3 + $0x6c] sm:$0xf] %v743_v33  ;;  %v3091_v18 = vld [vmem:[%s3801_s1 + $0x198] sm:$0xff] }
  0x49   : > { %1459 = vmatpush.bf16.msrb.mxu1 %v3016_v52  ;;  %1853 = vmatpush.bf16.msrb.mxu0 %v3064_v9  ;;  %v706_v38 = vsel %vm3411_vm10, %v2554_v29, %v705_v30  ;;  %v758_v41 = vld [vmem:[#allocation2 + $0xc] sm:$0x1]  ;;  %v774_v42 = vshrl.u32 %v757_v34, 16  ;;  %v577_v44 = vrot.slane %v576_v32, 4  ;;  %650 = vst [vmem:[#allocation3 + $0x28] sm:$0xf] %v568_v24 }
  0x4a   : > { %v3027_v43 = vld [vmem:[#allocation3 + $0x38] sm:$0xff]  ;;  %v759_v45 = vld [vmem:[#allocation2 + $0x10] sm:$0xf]  ;;  %1720 = vmatmul.bf16.vlgmr.msra.gmra.mxu3 %v3048_v36  ;;  %734 = vst [vmem:[#allocation3 + $0x48] sm:$0xf] %v702_v37  ;;  %v777_v48 = vshll.u32 %v757_v34, 16  ;;  %2118 = vmatpush.bf16.msrb.mxu2 %v3091_v18 }
  0x4b   : > { %v760_v13 = vld [vmem:[#allocation2 + $0x14] sm:$0x1]  ;;  %v776_v47 = vrot.slane %v774_v42, 4  ;;  %v582_v49 = vsel %vm3432_vm11, %v577_v44, %v581_v25  ;;  %735 = vst [vmem:[#allocation3 + $0x4c] sm:$0xf] %v706_v38  ;;  %v783_v51 = vshll.u32 %v758_v41, 16 }
  0x4c   : > { %v788_v2 = vshrl.u32 %v759_v45, 16  ;;  %v791_v52 = vshll.u32 %v759_v45, 16  ;;  %v3106_v53 = vld [vmem:[%s3801_s1 + $0x1f0] sm:$0xff]  ;;  %651 = vst [vmem:[#allocation3 + $0x2c] sm:$0xf] %v582_v49  ;;  %v779_v54 = vrot.slane %v777_v48, 5 }
  0x4d   : > { %1980 = vmatpush.bf16.msra.mxu1 %v3083_v0  ;;  %v797_v14 = vshll.u32 %v760_v13, 16  ;;  %2249 = vmatpush.bf16.msrb.mxu3 %v3106_v53  ;;  %v664_v61 = vld [vmem:[#allocation2 + $0x20] sm:$0xe]  ;;  %v785_v1 = vrot.slane %v783_v51, 5  ;;  %v665_v3 = vld [vmem:[#allocation2 + $0x24] sm:$0x1] }
  0x4e   : > { %1374 = vmatmul.bf16.gmra.mxu1 %v3027_v43  ;;  %v790_v56 = vrot.slane %v788_v2, 4  ;;  %v793_v59 = vrot.slane %v791_v52, 5  ;;  %v780_v0 = vor.u32 %v779_v54, %v776_v47  ;;  %v666_v4 = vld [vmem:[#allocation2 + $0x28] sm:$0xe]  ;;  %v2555_v5 = vrot.slane %v664_v61, 9  ;;  %v3012_v36 = vld [vmem:[#allocation3] sm:$0xff] }
  0x4f   : > { %v799_v7 = vrot.slane %v797_v14, 5  ;;  %v667_v8 = vld [vmem:[#allocation2 + $0x2c] sm:$0x1]  ;;  %v709_v9 = vrot.slane %v665_v3, 5  ;;  %v2556_v10 = vrot.slane %v666_v4, 9  ;;  %v348_v27 = vmax.f32 %v3548_v46, 0.0 }
  0x50   : > { %v794_v6 = vor.u32 %v793_v59, %v790_v56  ;;  %v781_v57 = vrot.slane %v780_v0, 4  ;;  %v713_v12 = vrot.slane %v667_v8, 5  ;;  %v494_v15 = vld [vmem:[#allocation2 + $0x10] sm:$0xf]  ;;  %v495_v40 = vld [vmem:[#allocation2 + $0x18] sm:$0xf] }
  0x51   : > { %1981 = vmatpush.bf16.msra.mxu1 %v3082_v55  ;;  %v710_v58 = vsel %vm3411_vm10, %v2555_v5, %v709_v9  ;;  %2250 = vmatpush.bf16.msrb.mxu3 %v3105_v11  ;;  %502 = vst [vmem:[#allocation3 + $0x8] sm:$0xf] %v494_v15  ;;  %v3081_v17 = vld [vmem:[%s3801_s1 + $0x168] sm:$0xff]  ;;  %v745_v26 = vld [vmem:[#allocation2 + $0x30] sm:$0xf]  ;;  %v3049_v28 = vld [vmem:[#allocation3 + $0x68] sm:$0xff]  ;;  %v356_v43 = vpack.c.bf16 %v348_v27, %v348_v27 }
  0x52   : > { %v795_v16 = vrot.slane %v794_v6, 4  ;;  %v3037_v19 = vld [vmem:[#allocation3 + $0x48] sm:$0xff]  ;;  %v786_v20 = vsel %vm3432_vm11, %v781_v57, %v785_v1  ;;  %v714_v21 = vsel %vm3411_vm10, %v2556_v10, %v713_v12  ;;  %736 = vst [vmem:[#allocation3 + $0x50] sm:$0xf] %v710_v58  ;;  %v744_v22 = vld [vmem:[#allocation2 + $0x28] sm:$0xf] }
  0x53   : > { %v3025_v23 = vld [vmem:[#allocation3 + $0x28] sm:$0xff]  ;;  %894 = vst [vmem:[#allocation3 + $0x80] sm:$0xf] %v786_v20  ;;  %1591 = vmatmul.bf16.gmra.mxu2 %v3037_v19  ;;  %v763_v31 = vld [vmem:[#allocation2 + $0x20] sm:$0xf]  ;;  %v3090_v62 = vld [vmem:[%s3801_s1 + $0x190] sm:$0xff] }
  0x54   : > { %v800_v25 = vsel %vm3432_vm11, %v795_v16, %v799_v7  ;;  %v761_v29 = vld [vmem:[#allocation2 + $0x18] sm:$0xf]  ;;  %v762_v30 = vld [vmem:[#allocation2 + $0x1c] sm:$0x1]  ;;  %1364 = vmatmul.bf16.gmra.mxu0 %v3025_v23  ;;  %737 = vst [vmem:[#allocation3 + $0x54] sm:$0xf] %v714_v21  ;;  %2119 = vmatpush.bf16.msrb.mxu2 %v3090_v62 }
  0x55   : > { %1982 = vmatpush.bf16.msra.mxu1 %v3081_v17  ;;  %895 = vst [vmem:[#allocation3 + $0x84] sm:$0xf] %v800_v25  ;;  %v764_v32 = vld [vmem:[#allocation2 + $0x24] sm:$0x1]  ;;  %v802_v33 = vshrl.u32 %v761_v29, 16  ;;  %v805_v34 = vshll.u32 %v761_v29, 16 }
  0x56   : > { %503 = vst [vmem:[#allocation3 + $0xc] sm:$0xf] %v495_v40  ;;  %v811_v35 = vshll.u32 %v762_v30, 16  ;;  %v816_v24 = vshrl.u32 %v763_v31, 16  ;;  %v819_v37 = vshll.u32 %v763_v31, 16  ;;  %v825_v38 = vshll.u32 %v764_v32, 16 }
  0x57   : > { %753 = vst [vmem:[#allocation3 + $0x70] sm:$0xf] %v744_v22  ;;  %v3104_v41 = vld [vmem:[%s3801_s1 + $0x1e0] sm:$0xff]  ;;  %v3585_v42 = vld [vmem:[%s3801_s1 + $0x238] sm:$0xff]  ;;  %v804_v44 = vrot.slane %v802_v33, 4  ;;  %v807_v45 = vrot.slane %v805_v34, 5 }
  0x58   : > { %754 = vst [vmem:[#allocation3 + $0x74] sm:$0xf] %v745_v26  ;;  %v813_v46 = vrot.slane %v811_v35, 5  ;;  %v818_v13 = vrot.slane %v816_v24, 4  ;;  %v821_v47 = vrot.slane %v819_v37, 5  ;;  %v827_v48 = vrot.slane %v825_v38, 5  ;;  %2251 = vmatpush.bf16.msrb.mxu3 %v3104_v41  ;;  %2382 = vmatpush.bf16.msra.mxu0 %v3585_v42 }
  0x59   : > { %v668_v49 = vld [vmem:[#allocation2 + $0x30] sm:$0xe]  ;;  %v669_v51 = vld [vmem:[#allocation2 + $0x34] sm:$0x1]  ;;  %v808_v2 = vor.u32 %v807_v45, %v804_v44  ;;  %v670_v52 = vld [vmem:[#allocation2 + $0x38] sm:$0xe] }
  0x5a   : > { %1725 = vmatmul.bf16.gmra.mxu3 %v3049_v28  ;;  %v671_v53 = vld [vmem:[#allocation2 + $0x3c] sm:$0x1]  ;;  %v2557_v54 = vrot.slane %v668_v49, 9  ;;  %v717_v14 = vrot.slane %v669_v51, 5  ;;  %v822_v55 = vor.u32 %v821_v47, %v818_v13  ;;  %v2558_v56 = vrot.slane %v670_v52, 9  ;;  %v3080_v61 = vld [vmem:[%s3801_s1 + $0x160] sm:$0xff] }
  0x5b   : > { %v721_v59 = vrot.slane %v671_v53, 5  ;;  %v414_v0 = vshrl.u32 %v356_v43, 16  ;;  %v809_v1 = vrot.slane %v808_v2, 4  ;;  %v3103_v4 = vld [vmem:[%s3801_s1 + $0x1d8] sm:$0xff]  ;;  %v3602_v5 = vld [vmem:[%s3801_s1 + $0x230] sm:$0xff]  ;;  %v417_v8 = vshll.u32 %v356_v43, 16  ;;  %1983 = vmatpush.bf16.msra.mxu1 %v3080_v61 }
  0x5c   : > { %v718_v3 = vsel %vm3411_vm10, %v2557_v54, %v717_v14  ;;  %v823_v6 = vrot.slane %v822_v55, 4  ;;  %2252 = vmatpush.bf16.msrb.mxu3 %v3103_v4  ;;  %v496_v10 = vld [vmem:[#allocation2 + $0x20] sm:$0xf]  ;;  %v3079_v11 = vld [vmem:[%s3801_s1 + $0x158] sm:$0xff]  ;;  %v3089_v57 = vld [vmem:[%s3801_s1 + $0x188] sm:$0xff]  ;;  %2383 = vmatpush.bf16.msra.mxu0 %v3602_v5 }
  0x5d   : > { %v722_v7 = vsel %vm3411_vm10, %v2558_v56, %v721_v59  ;;  %738 = vst [vmem:[#allocation3 + $0x58] sm:$0xf] %v718_v3  ;;  %v814_v9 = vsel %vm3432_vm11, %v809_v1, %v813_v46  ;;  %v3038_v12 = vld [vmem:[#allocation3 + $0x50] sm:$0xff]  ;;  %v497_v16 = vld [vmem:[#allocation2 + $0x28] sm:$0xf]  ;;  %v3617_v58 = vrot.slane %v414_v0, 7  ;;  %2120 = vmatpush.bf16.msrb.mxu2 %v3089_v57 }
  0x5e   : > { %1460 = vmatmul.bf16.vlgmr.msrb.gmra.mxu1 %v3012_v36  ;;  %739 = vst [vmem:[#allocation3 + $0x5c] sm:$0xf] %v722_v7  ;;  %v828_v15 = vsel %vm3432_vm11, %v823_v6, %v827_v48  ;;  %v486_v40 = vld [vmem:[#allocation2 + $0x40] sm:$0xf]  ;;  %v746_v17 = vld [vmem:[#allocation2 + $0x38] sm:$0xf] }
  0x5f   : > { %896 = vst [vmem:[#allocation3 + $0x88] sm:$0xf] %v814_v9  ;;  %v3060_v18 = vld [vmem:[#allocation3 + $0x80] sm:$0xff]  ;;  %v3088_v19 = vld [vmem:[%s3801_s1 + $0x180] sm:$0xff]  ;;  %v419_v20 = vor.u32 %v417_v8, %v3617_v58  ;;  %v765_v21 = vld [vmem:[#allocation2 + $0x28] sm:$0xf]  ;;  %1984 = vmatpush.bf16.msra.mxu1 %v3079_v11 }
  0x60   : > { %897 = vst [vmem:[#allocation3 + $0x8c] sm:$0xf] %v828_v15  ;;  %v766_v22 = vld [vmem:[#allocation2 + $0x2c] sm:$0x1]  ;;  %v767_v23 = vld [vmem:[#allocation2 + $0x30] sm:$0xf]  ;;  %2384 = vmatpush.bf16.msra.mxu0 %v3117_v60 }
  0x61   : > { %504 = vst [vmem:[#allocation3 + $0x10] sm:$0xf] %v496_v10  ;;  %v487_v25 = vsel %vm3353_vm5, %v419_v20, %v486_v40  ;;  %v768_v26 = vld [vmem:[#allocation2 + $0x34] sm:$0x1]  ;;  %v830_v27 = vshrl.u32 %v765_v21, 16  ;;  %v833_v28 = vshll.u32 %v765_v21, 16  ;;  %2121 = vmatpush.bf16.msrb.mxu2 %v3088_v19 }
  0x62   : > { %505 = vst [vmem:[#allocation3 + $0x14] sm:$0xf] %v497_v16  ;;  %v839_v29 = vshll.u32 %v766_v22, 16  ;;  %v844_v30 = vshrl.u32 %v767_v23, 16  ;;  %v847_v31 = vshll.u32 %v767_v23, 16  ;;  %v853_v32 = vshll.u32 %v768_v26, 16 }
  0x63   : > { %755 = vst [vmem:[#allocation3 + $0x78] sm:$0xf] %v746_v17  ;;  %1596 = vmatmul.bf16.gmra.mxu2 %v3038_v12  ;;  %v832_v33 = vrot.slane %v830_v27, 4  ;;  %v835_v34 = vrot.slane %v833_v28, 5  ;;  %v3102_v35 = vld [vmem:[%s3801_s1 + $0x1d0] sm:$0xff]  ;;  %v3050_v24 = vld [vmem:[#allocation3 + $0x70] sm:$0xff] }
  0x64   : > { %488 = vst [vmem:[#allocation2 + $0x40] sm:$0xf] %v487_v25  ;;  %1854 = vmatmul.bf16.vlgmr.msrb.gmra.mxu0 %v3060_v18  ;;  %v420_v36 = vrot.slane %v3617_v58, 4  ;;  %v846_v37 = vrot.slane %v844_v30, 4  ;;  %v849_v38 = vrot.slane %v847_v31, 5  ;;  %v3078_v41 = vld [vmem:[%s3801_s1 + $0x150] sm:$0xff]  ;;  %2253 = vmatpush.bf16.msrb.mxu3 %v3102_v35 }
  0x65   : > { %3147 = vmatpush.bf16.msra.mxu2 %v3585_v42  ;;  %v836_v43 = vor.u32 %v835_v34, %v832_v33  ;;  %v841_v44 = vrot.slane %v839_v29, 5  ;;  %v984_v45 = vld [vmem:[#allocation2 + $0x10] sm:$0xf]  ;;  %v985_v46 = vld [vmem:[#allocation2 + $0x18] sm:$0xf]  ;;  %v3101_v13 = vld [vmem:[%s3801_s1 + $0x1c8] sm:$0xff]  ;;  %1985 = vmatpush.bf16.msra.mxu1 %v3078_v41 }
  0x66   : > { %v850_v47 = vor.u32 %v849_v38, %v846_v37  ;;  %v855_v48 = vrot.slane %v853_v32, 5  ;;  %993 = vst [vmem:[#allocation3 + $0xc0] sm:$0xf] %v984_v45  ;;  %v3116_v49 = vld [vmem:[%s3801_s1 + $0x220] sm:$0xff]  ;;  %v498_v51 = vld [vmem:[#allocation2 + $0x30] sm:$0xf] }
  0x67   : > { %v3013_v42 = vld [vmem:[#allocation3 + $0x8] sm:$0xff]  ;;  %v837_v2 = vrot.slane %v836_v43, 4  ;;  %994 = vst [vmem:[#allocation3 + $0xc4] sm:$0xf] %v985_v46  ;;  %v489_v54 = vld [vmem:[#allocation2 + $0x44] sm:$0x1]  ;;  %2385 = vmatpush.bf16.msra.mxu0 %v3116_v49 }
  0x68   : > { %v499_v52 = vld [vmem:[#allocation2 + $0x38] sm:$0xf]  ;;  %v851_v53 = vrot.slane %v850_v47, 4  ;;  %506 = vst [vmem:[#allocation3 + $0x18] sm:$0xf] %v498_v51  ;;  %2254 = vmatpush.bf16.msrb.mxu3 %v3101_v13  ;;  %v490_v61 = vsel %vm3364_vm6, %v420_v36, %v489_v54  ;;  %v3077_v1 = vld [vmem:[%s3801_s1 + $0x148] sm:$0xff] }
  0x69   : > { %3148 = vmatpush.bf16.msra.mxu2 %v3602_v5  ;;  %v842_v55 = vsel %vm3432_vm11, %v837_v2, %v841_v44  ;;  %507 = vst [vmem:[#allocation3 + $0x1c] sm:$0xf] %v499_v52  ;;  %v769_v56 = vld [vmem:[#allocation2 + $0x38] sm:$0xf]  ;;  %v770_v62 = vld [vmem:[#allocation2 + $0x3c] sm:$0x1]  ;;  %1986 = vmatpush.bf16.msra.mxu1 %v3077_v1 }
  0x6a   : > { %1730 = vmatmul.bf16.gmra.mxu3 %v3050_v24  ;;  %v856_v59 = vsel %vm3432_vm11, %v851_v53, %v855_v48  ;;  %898 = vst [vmem:[#allocation3 + $0x90] sm:$0xf] %v842_v55  ;;  %v3100_v3 = vld [vmem:[%s3801_s1 + $0x1c0] sm:$0xff]  ;;  %v858_v4 = vshrl.u32 %v769_v56, 16  ;;  %v861_v5 = vshll.u32 %v769_v56, 16  ;;  %v3039_v6 = vld [vmem:[#allocation3 + $0x58] sm:$0xff] }
  0x6b   : > { %v747_v14 = vld [vmem:[#allocation2 + $0x40] sm:$0xf]  ;;  %899 = vst [vmem:[#allocation3 + $0x94] sm:$0xf] %v856_v59  ;;  %v867_v7 = vshll.u32 %v770_v62, 16  ;;  %v3061_v57 = vld [vmem:[#allocation3 + $0x88] sm:$0xff] }
  0x6c   : > { %756 = vst [vmem:[#allocation3 + $0x7c] sm:$0xf] %v747_v14  ;;  %v771_v0 = vld [vmem:[#allocation2 + $0x40] sm:$0xf]  ;;  %2255 = vmatpush.bf16.msrb.mxu3 %v3100_v3  ;;  %v860_v9 = vrot.slane %v858_v4, 4  ;;  %v863_v10 = vrot.slane %v861_v5, 5 }
  0x6d   : > { %v872_v8 = vshrl.u32 %v771_v0, 16  ;;  %v875_v63 = vshll.u32 %v771_v0, 16  ;;  %3149 = vmatpush.bf16.msra.mxu2 %v3117_v60  ;;  %491 = vst [vmem:[#allocation2 + $0x44] sm:$0x1] %v490_v61  ;;  %v1001_v11 = vld [vmem:[#allocation2 + $0x10] sm:$0xf] }
  0x6e   : > { %1465 = vmatmul.bf16.gmra.mxu1 %v3013_v42  ;;  %v869_v12 = vrot.slane %v867_v7, 5  ;;  %v1002_v58 = vld [vmem:[#allocation2 + $0x14] sm:$0x1]  ;;  %v864_v40 = vor.u32 %v863_v10, %v860_v9  ;;  %v1003_v17 = vld [vmem:[#allocation2 + $0x18] sm:$0xf]  ;;  %v1018_v19 = vshrl.u32 %v1001_v11, 16 }
  0x6f   : > { %v874_v15 = vrot.slane %v872_v8, 4  ;;  %v877_v16 = vrot.slane %v875_v63, 5  ;;  %v1004_v18 = vld [vmem:[#allocation2 + $0x1c] sm:$0x1]  ;;  %v1021_v20 = vshll.u32 %v1001_v11, 16  ;;  %v1027_v22 = vshll.u32 %v1002_v58, 16 }
  0x70   : > { %v1032_v23 = vshrl.u32 %v1003_v17, 16  ;;  %v1035_v25 = vshll.u32 %v1003_v17, 16  ;;  %v865_v26 = vrot.slane %v864_v40, 4  ;;  %v1020_v27 = vrot.slane %v1018_v19, 4  ;;  %v3115_v32 = vld [vmem:[%s3801_s1 + $0x218] sm:$0xff]  ;;  %v3076_v37 = vld [vmem:[%s3801_s1 + $0x140] sm:$0xff] }
  0x71   : > { %v878_v21 = vor.u32 %v877_v16, %v874_v15  ;;  %3150 = vmatpush.bf16.msra.mxu2 %v3116_v49  ;;  %v1023_v28 = vrot.slane %v1021_v20, 5  ;;  %v1041_v29 = vshll.u32 %v1004_v18, 16  ;;  %v986_v33 = vld [vmem:[#allocation2 + $0x20] sm:$0xf]  ;;  %v1029_v36 = vrot.slane %v1027_v22, 5  ;;  %2386 = vmatpush.bf16.msra.mxu0 %v3115_v32  ;;  %v3114_v45 = vld [vmem:[%s3801_s1 + $0x210] sm:$0xff] }
  0x72   : > { %v1034_v30 = vrot.slane %v1032_v23, 4  ;;  %v1037_v31 = vrot.slane %v1035_v25, 5  ;;  %v870_v35 = vsel %vm3432_vm11, %v865_v26, %v869_v12  ;;  %v987_v38 = vld [vmem:[#allocation2 + $0x28] sm:$0xf]  ;;  %v3014_v46 = vld [vmem:[#allocation3 + $0x10] sm:$0xff]  ;;  %1987 = vmatpush.bf16.msra.mxu1 %v3076_v37  ;;  %v3084_v11 = vld [vmem:[#allocation3 + $0xc0] sm:$0xff] }
  0x73   : > { %1601 = vmatmul.bf16.gmra.mxu2 %v3039_v6  ;;  %v3051_v34 = vld [vmem:[#allocation3 + $0x78] sm:$0xff]  ;;  %v879_v60 = vrot.slane %v878_v21, 4  ;;  %v1024_v24 = vor.u32 %v1023_v28, %v1020_v27  ;;  %900 = vst [vmem:[#allocation3 + $0x98] sm:$0xf] %v870_v35  ;;  %v1043_v44 = vrot.slane %v1041_v29, 5  ;;  %v3062_v58 = vld [vmem:[#allocation3 + $0x90] sm:$0xff] }
  0x74   : > { %1859 = vmatmul.bf16.gmra.mxu0 %v3061_v57  ;;  %v772_v41 = vld [vmem:[#allocation2 + $0x44] sm:$0x1]  ;;  %v1038_v43 = vor.u32 %v1037_v31, %v1034_v30  ;;  %995 = vst [vmem:[#allocation3 + $0xc8] sm:$0xf] %v986_v33  ;;  %v902_v48 = vld [vmem:[#allocation2 + $0x8] sm:$0xe] }
  0x75   : > { %3151 = vmatpush.bf16.msra.mxu2 %v3115_v32  ;;  %v881_v13 = vshll.u32 %v772_v41, 16  ;;  %v1025_v47 = vrot.slane %v1024_v24, 4  ;;  %996 = vst [vmem:[#allocation3 + $0xcc] sm:$0xf] %v987_v38  ;;  %v3113_v51 = vld [vmem:[%s3801_s1 + $0x208] sm:$0xff]  ;;  %v2559_v2 = vrot.slane %v902_v48, 9  ;;  %2387 = vmatpush.bf16.msra.mxu0 %v3114_v45 }
  0x76   : > { %v1039_v49 = vrot.slane %v1038_v43, 4  ;;  %v903_v42 = vld [vmem:[#allocation2 + $0xc] sm:$0x1]  ;;  %v904_v54 = vld [vmem:[#allocation2 + $0x10] sm:$0xe]  ;;  %v3112_v57 = vld [vmem:[%s3801_s1 + $0x200] sm:$0xff] }
  0x77   : > { %v883_v52 = vrot.slane %v881_v13, 5  ;;  %v1030_v53 = vsel %vm3432_vm11, %v1025_v47, %v1029_v36  ;;  %v905_v14 = vld [vmem:[#allocation2 + $0x14] sm:$0x1]  ;;  %v936_v55 = vrot.slane %v903_v42, 5  ;;  %v2560_v59 = vrot.slane %v904_v54, 9  ;;  %v3015_v48 = vld [vmem:[#allocation3 + $0x18] sm:$0xff] }
  0x78   : > { %v1044_v56 = vsel %vm3432_vm11, %v1039_v49, %v1043_v44  ;;  %1138 = vst [vmem:[#allocation3 + $0xe0] sm:$0xf] %v1030_v53  ;;  %v940_v61 = vrot.slane %v905_v14, 5  ;;  %v1005_v62 = vld [vmem:[#allocation2 + $0x20] sm:$0xf] }
  0x79   : > { %v884_v0 = vsel %vm3432_vm11, %v879_v60, %v883_v52  ;;  %1139 = vst [vmem:[#allocation3 + $0xe4] sm:$0xf] %v1044_v56  ;;  %v937_v1 = vsel %vm3411_vm10, %v2559_v2, %v936_v55  ;;  %v1006_v3 = vld [vmem:[#allocation2 + $0x24] sm:$0x1]  ;;  %v1007_v4 = vld [vmem:[#allocation2 + $0x28] sm:$0xf]  ;;  %3152 = vmatpush.bf16.msra.mxu2 %v3114_v45  ;;  %2388 = vmatpush.bf16.msra.mxu0 %v3113_v51 }
  0x7a   : > { %1735 = vmatmul.bf16.gmra.mxu3 %v3051_v34  ;;  %901 = vst [vmem:[#allocation3 + $0x9c] sm:$0xf] %v884_v0  ;;  %v941_v5 = vsel %vm3411_vm10, %v2560_v59, %v940_v61  ;;  %v1008_v6 = vld [vmem:[#allocation2 + $0x2c] sm:$0x1]  ;;  %v1046_v7 = vshrl.u32 %v1005_v62, 16  ;;  %v1049_v8 = vshll.u32 %v1005_v62, 16 }
  0x7b   : > { %975 = vst [vmem:[#allocation3 + $0xa0] sm:$0xf] %v937_v1  ;;  %v1055_v63 = vshll.u32 %v1006_v3, 16  ;;  %v1060_v9 = vshrl.u32 %v1007_v4, 16  ;;  %v1063_v10 = vshll.u32 %v1007_v4, 16  ;;  %v1069_v16 = vshll.u32 %v1008_v6, 16 }
  0x7c   : > { %976 = vst [vmem:[#allocation3 + $0xa4] sm:$0xf] %v941_v5  ;;  %v1048_v12 = vrot.slane %v1046_v7, 4  ;;  %v1051_v15 = vrot.slane %v1049_v8, 5  ;;  %v1146_v19 = vld [vmem:[#allocation2 + $0x10] sm:$0xe] }
  0x7d   : > { %v1057_v40 = vrot.slane %v1055_v63, 5  ;;  %v1062_v17 = vrot.slane %v1060_v9, 4  ;;  %v1065_v18 = vrot.slane %v1063_v10, 5  ;;  %3153 = vmatpush.bf16.msra.mxu2 %v3113_v51  ;;  %v1071_v21 = vrot.slane %v1069_v16, 5  ;;  %v1147_v22 = vld [vmem:[#allocation2 + $0x14] sm:$0x1]  ;;  %2389 = vmatpush.bf16.msra.mxu0 %v3112_v57 }
  0x7e   : > { %1470 = vmatmul.bf16.gmra.mxu1 %v3014_v46  ;;  %v1052_v20 = vor.u32 %v1051_v15, %v1048_v12  ;;  %v1148_v23 = vld [vmem:[#allocation2 + $0x18] sm:$0xe]  ;;  %v2567_v25 = vrot.slane %v1146_v19, 9  ;;  %v1149_v27 = vld [vmem:[#allocation2 + $0x1c] sm:$0x1]  ;;  %v1180_v28 = vrot.slane %v1147_v22, 5 }
  0x7f   : > { %v1066_v26 = vor.u32 %v1065_v18, %v1062_v17  ;;  %v2568_v29 = vrot.slane %v1148_v23, 9  ;;  %v988_v30 = vld [vmem:[#allocation2 + $0x30] sm:$0xf]  ;;  %v1184_v32 = vrot.slane %v1149_v27, 5  ;;  %v989_v35 = vld [vmem:[#allocation2 + $0x38] sm:$0xf] }
  0x80   : > { %v1053_v31 = vrot.slane %v1052_v20, 4  ;;  %v1181_v34 = vsel %vm3411_vm10, %v2567_v25, %v1180_v28  ;;  %997 = vst [vmem:[#allocation3 + $0xd0] sm:$0xf] %v988_v30  ;;  %v906_v60 = vld [vmem:[#allocation2 + $0x18] sm:$0xe]  ;;  %v3096_v45 = vld [vmem:[#allocation3 + $0xe0] sm:$0xff] }
  0x81   : > { %v1067_v33 = vrot.slane %v1066_v26, 4  ;;  %3154 = vmatpush.bf16.msra.mxu2 %v3112_v57  ;;  %v1185_v36 = vsel %vm3411_vm10, %v2568_v29, %v1184_v32  ;;  %1219 = vst [vmem:[#allocation3 + $0x100] sm:$0xf] %v1181_v34  ;;  %v907_v37 = vld [vmem:[#allocation2 + $0x1c] sm:$0x1]  ;;  %v2561_v44 = vrot.slane %v906_v60, 9 }
  0x82   : > { %v1058_v24 = vsel %vm3432_vm11, %v1053_v31, %v1057_v40  ;;  %v908_v38 = vld [vmem:[#allocation2 + $0x20] sm:$0xe]  ;;  %v909_v43 = vld [vmem:[#allocation2 + $0x24] sm:$0x1]  ;;  %v944_v46 = vrot.slane %v907_v37, 5  ;;  %v3085_v18 = vld [vmem:[#allocation3 + $0xc8] sm:$0xff] }
  0x83   : > { %2122 = vmatmul.bf16.vlgmr.msrb.gmra.mxu2 %v3084_v11  ;;  %v1072_v41 = vsel %vm3432_vm11, %v1067_v33, %v1071_v21  ;;  %1140 = vst [vmem:[#allocation3 + $0xe8] sm:$0xf] %v1058_v24  ;;  %v2562_v13 = vrot.slane %v908_v38, 9  ;;  %v948_v47 = vrot.slane %v909_v43, 5  ;;  %v1009_v49 = vld [vmem:[#allocation2 + $0x30] sm:$0xf] }
  0x84   : > { %1864 = vmatmul.bf16.gmra.mxu0 %v3062_v58  ;;  %1141 = vst [vmem:[#allocation3 + $0xec] sm:$0xf] %v1072_v41  ;;  %v1010_v51 = vld [vmem:[#allocation2 + $0x34] sm:$0x1]  ;;  %v945_v42 = vsel %vm3411_vm10, %v2561_v44, %v944_v46  ;;  %v1011_v52 = vld [vmem:[#allocation2 + $0x38] sm:$0xf] }
  0x85   : > { %1220 = vst [vmem:[#allocation3 + $0x104] sm:$0xf] %v1185_v36  ;;  %v949_v2 = vsel %vm3411_vm10, %v2562_v13, %v948_v47  ;;  %v1012_v53 = vld [vmem:[#allocation2 + $0x3c] sm:$0x1]  ;;  %v1074_v54 = vshrl.u32 %v1009_v49, 16  ;;  %v1077_v14 = vshll.u32 %v1009_v49, 16 }
  0x86   : > { %998 = vst [vmem:[#allocation3 + $0xd4] sm:$0xf] %v989_v35  ;;  %v1083_v55 = vshll.u32 %v1010_v51, 16  ;;  %v1088_v56 = vshrl.u32 %v1011_v52, 16  ;;  %v1091_v59 = vshll.u32 %v1011_v52, 16  ;;  %v1097_v61 = vshll.u32 %v1012_v53, 16 }
  0x87   : > { %977 = vst [vmem:[#allocation3 + $0xa8] sm:$0xf] %v945_v42  ;;  %v1150_v62 = vld [vmem:[#allocation2 + $0x20] sm:$0xe]  ;;  %v1076_v0 = vrot.slane %v1074_v54, 4  ;;  %v1079_v1 = vrot.slane %v1077_v14, 5 }
  0x88   : > { %978 = vst [vmem:[#allocation3 + $0xac] sm:$0xf] %v949_v2  ;;  %v1090_v3 = vrot.slane %v1088_v56, 4  ;;  %v1151_v4 = vld [vmem:[#allocation2 + $0x24] sm:$0x1]  ;;  %v1085_v5 = vrot.slane %v1083_v55, 5 }
  0x89   : > { %v1093_v6 = vrot.slane %v1091_v59, 5  ;;  %v1152_v7 = vld [vmem:[#allocation2 + $0x28] sm:$0xe]  ;;  %v1153_v8 = vld [vmem:[#allocation2 + $0x2c] sm:$0x1]  ;;  %v1080_v63 = vor.u32 %v1079_v1, %v1076_v0  ;;  %v2569_v9 = vrot.slane %v1150_v62, 9 }
  0x8a   : > { %2256 = vmatmul.bf16.vlgmr.msrb.gmra.mxu3 %v3096_v45  ;;  %v1188_v10 = vrot.slane %v1151_v4, 5  ;;  %v2570_v11 = vrot.slane %v1152_v7, 9  ;;  %v990_v57 = vld [vmem:[#allocation2 + $0x40] sm:$0xf]  ;;  %v1099_v15 = vrot.slane %v1097_v61, 5  ;;  %v1192_v16 = vrot.slane %v1153_v8, 5 }
  0x8b   : > { %v1094_v12 = vor.u32 %v1093_v6, %v1090_v3  ;;  %v991_v58 = vld [vmem:[#allocation2 + $0x48] sm:$0xf]  ;;  %999 = vst [vmem:[#allocation3 + $0xd8] sm:$0xf] %v990_v57  ;;  %v1081_v40 = vrot.slane %v1080_v63, 4  ;;  %v3097_v24 = vld [vmem:[#allocation3 + $0xe8] sm:$0xff] }
  0x8c   : > { %v1189_v17 = vsel %vm3411_vm10, %v2569_v9, %v1188_v10  ;;  %1000 = vst [vmem:[#allocation3 + $0xdc] sm:$0xf] %v991_v58  ;;  %v1193_v20 = vsel %vm3411_vm10, %v2570_v11, %v1192_v16  ;;  %v3063_v21 = vld [vmem:[#allocation3 + $0x98] sm:$0xff]  ;;  %v912_v27 = vld [vmem:[#allocation2 + $0x30] sm:$0xe] }
  0x8d   : > { %v1095_v19 = vrot.slane %v1094_v12, 4  ;;  %1221 = vst [vmem:[#allocation3 + $0x108] sm:$0xf] %v1189_v17  ;;  %v1086_v22 = vsel %vm3432_vm11, %v1081_v40, %v1085_v5  ;;  %v910_v25 = vld [vmem:[#allocation2 + $0x28] sm:$0xe]  ;;  %v2564_v31 = vrot.slane %v912_v27, 9 }
  0x8e   : > { %1475 = vmatmul.bf16.gmra.mxu1 %v3015_v48  ;;  %1222 = vst [vmem:[#allocation3 + $0x10c] sm:$0xf] %v1193_v20  ;;  %v911_v26 = vld [vmem:[#allocation2 + $0x2c] sm:$0x1]  ;;  %v913_v28 = vld [vmem:[#allocation2 + $0x34] sm:$0x1] }
  0x8f   : > { %v1100_v23 = vsel %vm3432_vm11, %v1095_v19, %v1099_v15  ;;  %1142 = vst [vmem:[#allocation3 + $0xf0] sm:$0xf] %v1086_v22  ;;  %v2563_v29 = vrot.slane %v910_v25, 9  ;;  %v952_v30 = vrot.slane %v911_v26, 5  ;;  %v956_v32 = vrot.slane %v913_v28, 5  ;;  %v3072_v47 = vld [vmem:[#allocation3 + $0xa0] sm:$0xff] }
  0x90   : > { %1143 = vst [vmem:[#allocation3 + $0xf4] sm:$0xf] %v1100_v23  ;;  %v1013_v33 = vld [vmem:[#allocation2 + $0x40] sm:$0xf]  ;;  %v1015_v34 = vld [vmem:[#allocation2 + $0x48] sm:$0xf] }
  0x91   : > { %v1102_v35 = vshrl.u32 %v1013_v33, 16  ;;  %v1105_v60 = vshll.u32 %v1013_v33, 16  ;;  %v953_v36 = vsel %vm3411_vm10, %v2563_v29, %v952_v30  ;;  %v957_v37 = vsel %vm3411_vm10, %v2564_v31, %v956_v32  ;;  %v1014_v38 = vld [vmem:[#allocation2 + $0x44] sm:$0x1]  ;;  %v1016_v41 = vld [vmem:[#allocation2 + $0x4c] sm:$0x1] }
  0x92   : > { %v1116_v43 = vshrl.u32 %v1015_v34, 16  ;;  %979 = vst [vmem:[#allocation3 + $0xb0] sm:$0xf] %v953_v36  ;;  %v1111_v46 = vshll.u32 %v1014_v38, 16  ;;  %v1119_v13 = vshll.u32 %v1015_v34, 16  ;;  %v1125_v49 = vshll.u32 %v1016_v41, 16 }
  0x93   : > { %2127 = vmatmul.bf16.gmra.mxu2 %v3085_v18  ;;  %v1104_v44 = vrot.slane %v1102_v35, 4  ;;  %v1107_v45 = vrot.slane %v1105_v60, 5  ;;  %980 = vst [vmem:[#allocation3 + $0xb4] sm:$0xf] %v957_v37  ;;  %v1154_v52 = vld [vmem:[#allocation2 + $0x30] sm:$0xe] }
  0x94   : > { %1869 = vmatmul.bf16.gmra.mxu0 %v3063_v21  ;;  %v1118_v48 = vrot.slane %v1116_v43, 4  ;;  %v1113_v42 = vrot.slane %v1111_v46, 5  ;;  %v1121_v2 = vrot.slane %v1119_v13, 5  ;;  %v1155_v53 = vld [vmem:[#allocation2 + $0x34] sm:$0x1]  ;;  %v1127_v54 = vrot.slane %v1125_v49, 5 }
  0x95   : > { %v1108_v51 = vor.u32 %v1107_v45, %v1104_v44  ;;  %v1156_v14 = vld [vmem:[#allocation2 + $0x38] sm:$0xe]  ;;  %v1157_v55 = vld [vmem:[#allocation2 + $0x3c] sm:$0x1]  ;;  %v2571_v61 = vrot.slane %v1154_v52, 9  ;;  %v1196_v62 = vrot.slane %v1155_v53, 5 }
  0x96   : > { %v1122_v59 = vor.u32 %v1121_v2, %v1118_v48  ;;  %v1158_v0 = vld [vmem:[#allocation2 + $0x40] sm:$0xe]  ;;  %v2572_v1 = vrot.slane %v1156_v14, 9  ;;  %v1200_v3 = vrot.slane %v1157_v55, 5  ;;  %v1159_v4 = vld [vmem:[#allocation2 + $0x44] sm:$0x1] }
  0x97   : > { %v1109_v56 = vrot.slane %v1108_v51, 4  ;;  %v1160_v5 = vld [vmem:[#allocation2 + $0x48] sm:$0xe]  ;;  %v1197_v8 = vsel %vm3411_vm10, %v2571_v61, %v1196_v62  ;;  %v1161_v63 = vld [vmem:[#allocation2 + $0x4c] sm:$0x1]  ;;  %v2573_v9 = vrot.slane %v1158_v0, 9 }
  0x98   : > { %v1123_v7 = vrot.slane %v1122_v59, 4  ;;  %v1201_v10 = vsel %vm3411_vm10, %v2572_v1, %v1200_v3  ;;  %v1204_v11 = vrot.slane %v1159_v4, 5  ;;  %v2574_v57 = vrot.slane %v1160_v5, 9  ;;  %1223 = vst [vmem:[#allocation3 + $0x110] sm:$0xf] %v1197_v8  ;;  %v3086_v16 = vld [vmem:[#allocation3 + $0xd0] sm:$0xff] }
  0x99   : > { %v1114_v6 = vsel %vm3432_vm11, %v1109_v56, %v1113_v42  ;;  %v1208_v12 = vrot.slane %v1161_v63, 5  ;;  %v3108_v17 = vld [vmem:[#allocation3 + $0x100] sm:$0xff]  ;;  %1224 = vst [vmem:[#allocation3 + $0x114] sm:$0xf] %v1201_v10  ;;  %v914_v18 = vld [vmem:[#allocation2 + $0x38] sm:$0xe] }
  0x9a   : > { %2261 = vmatmul.bf16.gmra.mxu3 %v3097_v24  ;;  %1144 = vst [vmem:[#allocation3 + $0xf8] sm:$0xf] %v1114_v6  ;;  %v1128_v15 = vsel %vm3432_vm11, %v1123_v7, %v1127_v54  ;;  %v1205_v58 = vsel %vm3411_vm10, %v2573_v9, %v1204_v11  ;;  %v915_v19 = vld [vmem:[#allocation2 + $0x3c] sm:$0x1]  ;;  %v916_v20 = vld [vmem:[#allocation2 + $0x40] sm:$0xe] }
  0x9b   : > { %1145 = vst [vmem:[#allocation3 + $0xfc] sm:$0xf] %v1128_v15  ;;  %v1209_v40 = vsel %vm3411_vm10, %v2574_v57, %v1208_v12  ;;  %v917_v21 = vld [vmem:[#allocation2 + $0x44] sm:$0x1]  ;;  %v2565_v50 = vrot.slane %v914_v18, 9  ;;  %v960_v22 = vrot.slane %v915_v19, 5 }
  0x9c   : > { %1225 = vst [vmem:[#allocation3 + $0x118] sm:$0xf] %v1205_v58  ;;  %v2566_v23 = vrot.slane %v916_v20, 9  ;;  %v964_v25 = vrot.slane %v917_v21, 5  ;;  %v3098_v26 = vld [vmem:[#allocation3 + $0xf0] sm:$0xff]  ;;  %v3073_v29 = vld [vmem:[#allocation3 + $0xa8] sm:$0xff] }
  0x9d   : > { %1226 = vst [vmem:[#allocation3 + $0x11c] sm:$0xf] %v1209_v40  ;;  %v961_v27 = vsel %vm3411_vm10, %v2565_v50, %v960_v22  ;;  %v3087_v30 = vld [vmem:[#allocation3 + $0xd8] sm:$0xff]  ;;  %v3109_v31 = vld [vmem:[#allocation3 + $0x108] sm:$0xff]  ;;  %v3074_v33 = vld [vmem:[#allocation3 + $0xb0] sm:$0xff] }
  0x9e   : > { %1988 = vmatmul.bf16.vlgmr.msra.gmra.mxu1 %v3072_v47  ;;  %v965_v28 = vsel %vm3411_vm10, %v2566_v23, %v964_v25  ;;  %981 = vst [vmem:[#allocation3 + $0xb8] sm:$0xf] %v961_v27 }
  0x9f   : > { %982 = vst [vmem:[#allocation3 + $0xbc] sm:$0xf] %v965_v28 }
  0xa0   : > { %v3110_v24 = vld [vmem:[#allocation3 + $0x110] sm:$0xff] }
  0xa2   : > { %v3099_v32 = vld [vmem:[#allocation3 + $0xf8] sm:$0xff] }
  0xa3   : > { %2132 = vmatmul.bf16.gmra.mxu2 %v3086_v16 }
  0xa4   : > { %2390 = vmatmul.bf16.vlgmr.msra.gmra.mxu0 %v3108_v17  ;;  %v3111_v60 = vld [vmem:[#allocation3 + $0x118] sm:$0xff] }
  0xa6   : > { %v3075_v38 = vld [vmem:[#allocation3 + $0xb8] sm:$0xff] }
  0xaa   : > { %2266 = vmatmul.bf16.gmra.mxu3 %v3098_v26 }
  0xae   : > { %1993 = vmatmul.bf16.gmra.mxu1 %v3073_v29 }
  0xb3   : > { %2137 = vmatmul.bf16.gmra.mxu2 %v3087_v30 }
  0xb4   : > { %2395 = vmatmul.bf16.gmra.mxu0 %v3109_v31 }
  0xba   : > { %2271 = vmatmul.bf16.gmra.mxu3 %v3099_v32 }
  0xbb   : > { %v1370_v34 = vpop.f32.mrf.mxu1 }
  0xbd   : > { %v1360_v35 = vpop.f32.mrf.mxu0 }
  0xbe   : > { %1998 = vmatmul.bf16.gmra.mxu1 %v3074_v33 }
  0xbf   : > { %v1587_v39 = vpop.f32.mrf.mxu2 }
  0xc3   : > { %v1372_v36 = vpop.f32.mrf.mxu1  ;;  %2405 = vmatmul.bf16.vlgmr.msra.gmra.mxu2 %v3111_v60 }
  0xc4   : > { %2400 = vmatmul.bf16.gmra.mxu0 %v3110_v24 }
  0xc5   : > { %v1362_v37 = vpop.f32.mrf.mxu0 }
  0xc7   : > { %v1589_v43 = vpop.f32.mrf.mxu2 }
  0xcb   : > { %v1375_v41 = vpop.f32.mrf.mxu1 }
  0xcd   : > { %v1721_v44 = vpop.f32.mrf.mxu3 }
  0xce   : > { %2003 = vmatmul.bf16.gmra.mxu1 %v3075_v38 }
  0xd1   : > { %v1365_v45 = vpop.f32.mrf.mxu0 }
  0xd3   : > { %v1377_v46 = vpop.f32.mrf.mxu1 }
  0xd5   : > { %v1723_v13 = vpop.f32.mrf.mxu3 }
  0xd6   : > { %v1592_v47 = vpop.f32.mrf.mxu2 }
  0xd9   : > { %v1367_v48 = vpop.f32.mrf.mxu0 }
  0xdb   : > { %v1461_v49 = vpop.f32.mrf.mxu1 }
  0xdc   : > { %v1462_v51 = vadd.f32 %v1461_v49, %v1360_v35 }
  0xdd   : > { %v3722_v2 = vpop.f32.mrf.mxu3 }
  0xde   : > { %v1607_v42 = vadd.f32 %v1587_v39, %v1462_v51  ;;  %v1594_v52 = vpop.f32.mrf.mxu2 }
  0xe0   : > { %v1741_v30 = vadd.f32 %v1721_v44, %v1607_v42  ;;  %v2419_v44 = vld [vmem:[%s3754_s30] sm:$0xff] }
  0xe1   : > { %v1855_v53 = vpop.f32.mrf.mxu0 }
  0xe2   : > { %v1875_v33 = vadd.f32 %v1855_v53, %v1741_v30 }
  0xe3   : > { %v1463_v54 = vpop.f32.mrf.mxu1 }
  0xe4   : > { %v1464_v14 = vadd.f32 %v1463_v54, %v1362_v37 }
  0xe5   : > { %v3724_v56 = vpop.f32.mrf.mxu3 }
  0xe6   : > { %v1608_v55 = vadd.f32 %v1589_v43, %v1464_v14  ;;  %v1597_v59 = vpop.f32.mrf.mxu2  ;;  %v2420_v14 = vld [vmem:[%s3754_s30 + $0x8] sm:$0xff] }
  0xe9   : > { %v1857_v61 = vpop.f32.mrf.mxu0 }
  0xeb   : > { %v1466_v62 = vpop.f32.mrf.mxu1 }
  0xec   : > { %v1467_v0 = vadd.f32 %v1466_v62, %v1365_v45 }
  0xed   : > { %v3726_v3 = vpop.f32.mrf.mxu3 }
  0xee   : > { %v1609_v1 = vadd.f32 %v1592_v47, %v1467_v0  ;;  %v1599_v4 = vpop.f32.mrf.mxu2 }
  0xf1   : > { %v1860_v5 = vpop.f32.mrf.mxu0 }
  0xf3   : > { %v1468_v6 = vpop.f32.mrf.mxu1 }
  0xf4   : > { %v1469_v7 = vadd.f32 %v1468_v6, %v1367_v48 }
  0xf5   : > { %v3728_v63 = vpop.f32.mrf.mxu3 }
  0xf6   : > { %v1610_v8 = vadd.f32 %v1594_v52, %v1469_v7  ;;  %v1602_v9 = vpop.f32.mrf.mxu2 }
  0xf8   : > { %v1744_v62 = vadd.f32 %v3724_v56, %v1610_v8 }
  0xf9   : > { %v1862_v10 = vpop.f32.mrf.mxu0 }
  0xfa   : > { %v1878_v7 = vadd.f32 %v1862_v10, %v1744_v62  ;;  %v2422_v10 = vld [vmem:[%s3754_s30 + $0x18] sm:$0xff] }
  0xfb   : > { %v1471_v11 = vpop.f32.mrf.mxu1 }
  0xfc   : > { %v1472_v57 = vadd.f32 %v1471_v11, %v1370_v34  ;;  %v2421_v11 = vld [vmem:[%s3754_s30 + $0x10] sm:$0xff] }
  0xfd   : > { %v3732_v15 = vpop.f32.mrf.mxu3 }
  0xfe   : > { %v3730_v12 = vadd.f32 %v1597_v59, %v1472_v57  ;;  %v1604_v16 = vpop.f32.mrf.mxu2 }
 0x101   : > { %v3734_v58 = vpop.f32.mrf.mxu0 }
 0x103   : > { %v1473_v40 = vpop.f32.mrf.mxu1 }
 0x104   : > { %v1474_v17 = vadd.f32 %v1473_v40, %v1372_v36  ;;  %v1742_v36 = vadd.f32 %v1723_v13, %v1608_v55  ;;  %v1743_v13 = vadd.f32 %v3722_v2, %v1609_v1  ;;  %v1745_v40 = vadd.f32 %v3726_v3, %v3730_v12 }
 0x105   : > { %v3738_v19 = vpop.f32.mrf.mxu3 }
 0x106   : > { %v3736_v18 = vadd.f32 %v1599_v4, %v1474_v17  ;;  %v2123_v20 = vpop.f32.mrf.mxu2  ;;  %v1877_v53 = vadd.f32 %v1860_v5, %v1743_v13 }
 0x108   : > { %v1746_v30 = vadd.f32 %v3728_v63, %v3736_v18 }
 0x109   : > { %v3740_v21 = vpop.f32.mrf.mxu0 }
 0x10b   : > { %v1476_v50 = vpop.f32.mrf.mxu1 }
 0x10c   : > { %v1477_v22 = vadd.f32 %v1476_v50, %v1375_v41  ;;  %v1876_v41 = vadd.f32 %v1857_v61, %v1742_v36  ;;  %v1879_v50 = vadd.f32 %v3734_v58, %v1745_v40  ;;  %v2423_v58 = vld [vmem:[%s3754_s30 + $0x20] sm:$0xff] }
 0x10d   : > { %v2257_v26 = vpop.f32.mrf.mxu3 }
 0x10e   : > { %v3742_v23 = vadd.f32 %v1602_v9, %v1477_v22  ;;  %v2125_v25 = vpop.f32.mrf.mxu2 }
 0x111   : > { %v3744_v27 = vpop.f32.mrf.mxu0 }
 0x113   : > { %v1478_v28 = vpop.f32.mrf.mxu1 }
 0x114   : > { %v1479_v29 = vadd.f32 %v1478_v28, %v1377_v46 }
 0x115   : > { %v2259_v34 = vpop.f32.mrf.mxu3 }
 0x116   : > { %v3746_v31 = vadd.f32 %v1604_v16, %v1479_v29  ;;  %v2128_v32 = vpop.f32.mrf.mxu2 }
 0x118   : > { %v1748_v13 = vadd.f32 %v3738_v19, %v3746_v31  ;;  %v2426_v19 = vld [vmem:[%s3754_s30 + $0x38] sm:$0xff] }
 0x119   : > { %v3748_v35 = vpop.f32.mrf.mxu0 }
 0x11b   : > { %v1989_v60 = vpop.f32.mrf.mxu1 }
 0x11c   : > { %v2009_v24 = vadd.f32 %v1989_v60, %v1875_v33  ;;  %v1880_v33 = vadd.f32 %v3740_v21, %v1746_v30  ;;  %v2424_v21 = vld [vmem:[%s3754_s30 + $0x28] sm:$0xff] }
 0x11d   : > { %v2262_v48 = vpop.f32.mrf.mxu3 }
 0x11e   : > { %v2143_v39 = vadd.f32 %v2123_v20, %v2009_v24  ;;  %v2130_v37 = vpop.f32.mrf.mxu2 }
 0x120   : > { %v2277_v38 = vadd.f32 %v2257_v26, %v2143_v39 }
 0x121   : > { %v2391_v43 = vpop.f32.mrf.mxu0 }
 0x122   : > { %v2411_v46 = vadd.f32 %v2391_v43, %v2277_v38  ;;  %v1747_v38 = vadd.f32 %v3732_v15, %v3742_v23 }
 0x123   : > { %v1991_v45 = vpop.f32.mrf.mxu1 }
 0x124   : > { %v2010_v47 = vadd.f32 %v1991_v45, %v1876_v41  ;;  %v2427_v49 = vadd.f32 %v2419_v44, %v2411_v46  ;;  %v1881_v43 = vadd.f32 %v3744_v27, %v1747_v38  ;;  %v1882_v27 = vadd.f32 %v3748_v35, %v1748_v13 }
 0x125   : > { %v2264_v6 = vpop.f32.mrf.mxu3 }
 0x126   : > { %v2144_v51 = vadd.f32 %v2125_v25, %v2010_v47  ;;  %2435 = vst [vmem:[%s3760_s7] sm:$0xff] %v2427_v49  ;;  %v2133_v42 = vpop.f32.mrf.mxu2 }
 0x128   : > { %v2278_v52 = vadd.f32 %v2259_v34, %v2144_v51 }
 0x129   : > { %v2393_v54 = vpop.f32.mrf.mxu0 }
 0x12a   : > { %v2412_v59 = vadd.f32 %v2393_v54, %v2278_v52 }
 0x12b   : > { %v1994_v55 = vpop.f32.mrf.mxu1 }
 0x12c   : > { %v2011_v61 = vadd.f32 %v1994_v55, %v1877_v53  ;;  %v2428_v0 = vadd.f32 %v2420_v14, %v2412_v59 }
 0x12d   : > { %v2267_v8 = vpop.f32.mrf.mxu3 }
 0x12e   : > { %v2145_v4 = vadd.f32 %v2128_v32, %v2011_v61  ;;  %2436 = vst [vmem:[%s3760_s7 + $0x8] sm:$0xff] %v2428_v0  ;;  %v2135_v2 = vpop.f32.mrf.mxu2 }
 0x130   : > { %v2279_v1 = vadd.f32 %v2262_v48, %v2145_v4 }
 0x131   : > { %v2396_v9 = vpop.f32.mrf.mxu0 }
 0x132   : > { %v2413_v5 = vadd.f32 %v2396_v9, %v2279_v1 }
 0x133   : > { %v1996_v57 = vpop.f32.mrf.mxu1 }
 0x134   : > { %v2012_v16 = vadd.f32 %v1996_v57, %v1878_v7  ;;  %v2429_v17 = vadd.f32 %v2421_v11, %v2413_v5 }
 0x135   : > { %v2269_v34 = vpop.f32.mrf.mxu3 }
 0x136   : > { %v2146_v56 = vadd.f32 %v2130_v37, %v2012_v16  ;;  %2437 = vst [vmem:[%s3760_s7 + $0x10] sm:$0xff] %v2429_v17  ;;  %v2138_v22 = vpop.f32.mrf.mxu2 }
 0x138   : > { %v2280_v20 = vadd.f32 %v2264_v6, %v2146_v56 }
 0x139   : > { %v2398_v25 = vpop.f32.mrf.mxu0 }
 0x13a   : > { %v2414_v28 = vadd.f32 %v2398_v25, %v2280_v20 }
 0x13b   : > { %v1999_v26 = vpop.f32.mrf.mxu1 }
 0x13c   : > { %v2013_v29 = vadd.f32 %v1999_v26, %v1879_v50  ;;  %v2430_v3 = vadd.f32 %v2422_v10, %v2414_v28 }
 0x13d   : > { %v2272_v48 = vpop.f32.mrf.mxu3 }
 0x13e   : > { %v2147_v12 = vadd.f32 %v2133_v42, %v2013_v29  ;;  %2438 = vst [vmem:[%s3760_s7 + $0x18] sm:$0xff] %v2430_v3  ;;  %v2140_v37 = vpop.f32.mrf.mxu2  ;;  %v2425_v42 = vld [vmem:[%s3754_s30 + $0x30] sm:$0xff] }
 0x140   : > { %v2281_v32 = vadd.f32 %v2267_v8, %v2147_v12 }
 0x141   : > { %v2401_v60 = vpop.f32.mrf.mxu0 }
 0x142   : > { %v2415_v36 = vadd.f32 %v2401_v60, %v2281_v32 }
 0x143   : > { %v2001_v24 = vpop.f32.mrf.mxu1 }
 0x144   : > { %v2014_v39 = vadd.f32 %v2001_v24, %v1880_v33  ;;  %v2431_v63 = vadd.f32 %v2423_v58, %v2415_v36 }
 0x145   : > { %v2274_v59 = vpop.f32.mrf.mxu3 }
 0x146   : > { %v2148_v18 = vadd.f32 %v2135_v2, %v2014_v39  ;;  %2439 = vst [vmem:[%s3760_s7 + $0x20] sm:$0xff] %v2431_v63  ;;  %v2406_v23 = vpop.f32.mrf.mxu2 }
 0x148   : > { %v2282_v41 = vadd.f32 %v2269_v34, %v2148_v18 }
 0x149   : > { %v2403_v44 = vpop.f32.mrf.mxu0 }
 0x14a   : > { %v2416_v46 = vadd.f32 %v2403_v44, %v2282_v41 }
 0x14b   : > { %v2004_v45 = vpop.f32.mrf.mxu1 }
 0x14c   : > { %v2015_v47 = vadd.f32 %v2004_v45, %v1881_v43  ;;  %v2432_v49 = vadd.f32 %v2424_v21, %v2416_v46 }
 0x14e   : > { %v2149_v15 = vadd.f32 %v2138_v22, %v2015_v47  ;;  %2440 = vst [vmem:[%s3760_s7 + $0x28] sm:$0xff] %v2432_v49  ;;  %v2408_v62 = vpop.f32.mrf.mxu2 }
 0x150   : > { %v2283_v51 = vadd.f32 %v2272_v48, %v2149_v15 }
 0x152   : > { %v2417_v52 = vadd.f32 %v2406_v23, %v2283_v51 }
 0x153   : > { %v2006_v53 = vpop.f32.mrf.mxu1 }
 0x154   : > { %v2433_v54 = vadd.f32 %v2425_v42, %v2417_v52  ;;  %v2016_v14 = vadd.f32 %v2006_v53, %v1882_v27 }
 0x156   : > { %2441 = vst [vmem:[%s3760_s7 + $0x30] sm:$0xff] %v2433_v54  ;;  %v2150_v55 = vadd.f32 %v2140_v37, %v2016_v14 }
 0x158   : > { %v2284_v61 = vadd.f32 %v2274_v59, %v2150_v55 }
 0x15a   : > { %v2418_v31 = vadd.f32 %v2408_v62, %v2284_v61 }
 0x15c   : > { %v2434_v0 = vadd.f32 %v2426_v19, %v2418_v31 }
 0x15e   : > { %2442 = vst [vmem:[%s3760_s7 + $0x38] sm:$0xff] %v2434_v0 }
 0x15f PF: > { %s15_s20 = sadd.s32 1, %s3204_s20   ;;  %s3814_s18 = smov %s3200_s19 }
 0x160   : > { %p12_p5 = scmp.ge.s32.totalorder %s15_s20, 4   ;;  %s3815_s19 = smov %s3817_s21 }
 0x162   :  { %14 = sbr.rel (!%p12_p5) target bundleno = 2 (0x2), region = 96 }

// kernel: basic_block_forward.4
= control target key start
LH: loop header
LB: loop body
LE: loop exit
PB: predicated region body
PF: predicated region fallthrough
CT: control target
= control target key end

     0   :  { %s4051_s17 = smov 0   ;;  %s4053_s18 = smov 0   ;;  %s5011_s0 = inlined_call_operand.vmem [shape: f32[2,8,8,128], index: 0, kind: input, shape index: {}]   ;;  %s5012_s1 = inlined_call_operand.vmem [shape: f32[2,8,8,128], index: 1, kind: input, shape index: {}]   ;;  %s5013_s2 = inlined_call_operand.vmem [shape: f32[2,8,8,128], index: 2, kind: input, shape index: {}]   ;;  %s5014_s3 = inlined_call_operand.vmem [shape: f32[2,8,8,128], index: 3, kind: input, shape index: {}]   ;;  %s5015_s4 = inlined_call_operand.vmem [shape: bf16[1,1152,128], index: 4, kind: input, shape index: {}]   ;;  %s5016_s5 = inlined_call_operand.vmem [shape: f32[1,128], index: 5, kind: input, shape index: {}]   ;;  %s5017_s6 = inlined_call_operand.vmem [shape: f32[1,128], index: 6, kind: input, shape index: {}]   ;;  %s5018_s7 = inlined_call_operand.vmem [shape: bf16[1,128,128], index: 7, kind: input, shape index: {}]   ;;  %s5019_s8 = inlined_call_operand.vmem [shape: bf16[2,8,8,128], index: 8, kind: output, shape index: {0}]   ;;  %s5020_s9 = inlined_call_operand.vmem [shape: f32[2,1,128], index: 9, kind: output, shape index: {1}]   ;;  %s5021_s10 = inlined_call_operand.vmem [shape: f32[2,1,128], index: 10, kind: output, shape index: {2}]   ;;  %s5022_s11 = inlined_call_operand.vmem [shape: f32[2,8,8,128], index: 11, kind: output, shape index: {3}]  }
   0x1   :  { %s4055_s19 = smov 0  }
   0x2 LB: > { %s34_s20 = sadd.s32 1, %s3984_s18  ;;  %p3277_p0 = scmp.ge.s32.totalorder %s3988_s19, 1  ;;  %s3988_s19 = sphi %s4055_s19, %s22_s19   ;;  %s3984_s18 = sphi %s4053_s18, %s5030_s18   ;;  %s3980_s17 = sphi %s4051_s17, %s5029_s17  }
   0x3   : > { %p36_p1 = scmp.ge.s32.totalorder %s34_s20, 2  ;;  %p394_p2 = scmp.lt.s32.totalorder %s3988_s19, 3 }
   0x5   : > { %s5032_s20 = smov (%p36_p1, %s34_s20), 0  ;;  %p395_p3 = pnand %p3277_p0, %p394_p2 }
   0x6   : > { %p472_p4 = scmp.lt.s32.totalorder (!%p395_p3), %s3980_s17, 1 }
   0x7   : > { %398 = sbr.rel (%p395_p3) target bundleno = 412 (0x19c), region = 52 }
   0xc   : > { %v3801_v0 = vld [vmem:[%s5015_s4 + $0x78] sm:$0xff]  ;;  %v3800_v1 = vld [vmem:[%s5015_s4 + $0x70] sm:$0xff]  ;;  %v3799_v3 = vld [vmem:[%s5015_s4 + $0x68] sm:$0xff]  ;;  %s5034_s17 = smov (!%p472_p4, %s3980_s17), 1  ;;  %v3990_v4 = vmov 0   ;;  %vm693_vm0 = vcmask 1043456  }
   0xd   : > { %3921 = vmatpush.bf16.msra.mxu2 %v3801_v0  ;;  %1783 = vmatpush.bf16.msra.mxu0 %v3801_v0  ;;  %v3789_v2 = vld [vmem:[%s5015_s4 + $0x38] sm:$0xff]  ;;  %761 = vst [vmem:[#allocation2 + $0x68] sm:$0xf] %v3990_v4  ;;  %v3788_v5 = vld [vmem:[%s5015_s4 + $0x30] sm:$0xff]  ;;  %s4089_s12 = sshll.u32 %s5034_s17, 6  ;;  %v3798_v6 = vld [vmem:[%s5015_s4 + $0x60] sm:$0xff]  ;;  %s505_s23 = scalar_lea.vmem %s5020_s9, %s5034_s17 }
   0xe   : > { %765 = vst [vmem:[#allocation2 + $0x70] sm:$0xf] %v3990_v4  ;;  %1884 = vmatpush.bf16.msra.mxu1 %v3789_v2  ;;  %3929 = vmatpush.bf16.msra.mxu3 %v3789_v2  ;;  %s4099_s21 = scalar_lea.vmem %s5012_s1, %s4089_s12  ;;  %v4105_v7 = vld [vmem:[%s5016_s5] ss:$0 sm:$0xff]  ;;  %v3787_v10 = vld [vmem:[%s5015_s4 + $0x28] sm:$0xff]  ;;  %v3797_v12 = vld [vmem:[%s5015_s4 + $0x58] sm:$0xff]  ;;  %s4128_s14 = scalar_lea.vmem %s5011_s0, %s4089_s12 }
   0xf   : > { %527 = vst [vmem:[#allocation2] sm:$0xf] %v3990_v4  ;;  %v4110_v8 = vld [vmem:[%s5017_s6] ss:$0 sm:$0xff]  ;;  %v784_v9 = vld [vmem:[%s4099_s21 + $0x18] sm:$0xff]  ;;  %v3796_v19 = vld [vmem:[%s5015_s4 + $0x50] sm:$0xff]  ;;  %s4321_s22 = scalar_lea.vmem %s5013_s2, %s4089_s12  ;;  %s4442_s16 = scalar_lea.vmem %s5014_s3, %s4089_s12 }
  0x10   : > { %534 = vst [vmem:[#allocation2 + $0x8] sm:$0xf] %v3990_v4  ;;  %v785_v11 = vld [vmem:[%s4099_s21 + $0x20] sm:$0xff]  ;;  %v792_v13 = vmul.f32 %v4105_v7, %v784_v9  ;;  %v569_v22 = vld [vmem:[%s4128_s14 + $0x18] sm:$0xff]  ;;  %v3795_v28 = vld [vmem:[%s5015_s4 + $0x48] sm:$0xff]  ;;  %vm528_vm4 = vcmask 1040384   ;;  %s4958_s29 = scalar_lea.vmem %s5022_s11, %s4089_s12  ;;  %s511_s26 = scalar_lea.vmem %s5021_s10, %s5034_s17 }
  0x11   : > { %3922 = vmatpush.bf16.msra.mxu2 %v3800_v1  ;;  %1784 = vmatpush.bf16.msra.mxu0 %v3800_v1  ;;  %538 = vst [vmem:[#allocation2 + $0x10] sm:$0xf] %v3990_v4  ;;  %v793_v14 = vmul.f32 %v4105_v7, %v785_v11  ;;  %v3786_v17 = vld [vmem:[%s5015_s4 + $0x20] sm:$0xff]  ;;  %v3785_v27 = vld [vmem:[%s5015_s4 + $0x18] sm:$0xff]  ;;  %v580_v29 = vmul.f32 %v4105_v7, %v569_v22  ;;  %v3784_v32 = vld [vmem:[%s5015_s4 + $0x10] sm:$0xff] }
  0x12   : > { %1885 = vmatpush.bf16.msra.mxu1 %v3788_v5  ;;  %3930 = vmatpush.bf16.msra.mxu3 %v3788_v5  ;;  %542 = vst [vmem:[#allocation2 + $0x18] sm:$0xf] %v3990_v4  ;;  %v800_v15 = vadd.f32 %v4110_v8, %v792_v13  ;;  %v566_v18 = vld [vmem:[%s4128_s14] sm:$0xff]  ;;  %v3813_v36 = vld [vmem:[%s5015_s4 + $0xb8] sm:$0xff]  ;;  %v3783_v39 = vld [vmem:[%s5015_s4 + $0x8] sm:$0xff] }
  0x13   : > { %546 = vst [vmem:[#allocation2 + $0x20] sm:$0xf] %v3990_v4  ;;  %v801_v16 = vadd.f32 %v4110_v8, %v793_v14  ;;  %v577_v25 = vmul.f32 %v4105_v7, %v566_v18  ;;  %v570_v26 = vld [vmem:[%s4128_s14 + $0x20] sm:$0xff]  ;;  %v591_v35 = vadd.f32 %v4110_v8, %v580_v29  ;;  %v567_v42 = vld [vmem:[%s4128_s14 + $0x8] sm:$0xff]  ;;  %v568_v45 = vld [vmem:[%s4128_s14 + $0x10] sm:$0xff] }
  0x14   : > { %550 = vst [vmem:[#allocation2 + $0x28] sm:$0xf] %v3990_v4  ;;  %v808_v20 = vmax.f32 %v800_v15, 0.0  ;;  %v581_v30 = vmul.f32 %v4105_v7, %v570_v26  ;;  %v3794_v33 = vld [vmem:[%s5015_s4 + $0x40] sm:$0xff]  ;;  %v3812_v46 = vld [vmem:[%s5015_s4 + $0xb0] sm:$0xff]  ;;  %v578_v49 = vmul.f32 %v4105_v7, %v567_v42  ;;  %v579_v52 = vmul.f32 %v4105_v7, %v568_v45  ;;  %v571_v55 = vld [vmem:[%s4128_s14 + $0x28] sm:$0xff] }
  0x15   : > { %3923 = vmatpush.bf16.msra.mxu2 %v3799_v3  ;;  %1785 = vmatpush.bf16.msra.mxu0 %v3799_v3  ;;  %554 = vst [vmem:[#allocation2 + $0x30] sm:$0xf] %v3990_v4  ;;  %v809_v21 = vmax.f32 %v801_v16, 0.0  ;;  %v588_v31 = vadd.f32 %v4110_v8, %v577_v25  ;;  %v781_v34 = vld [vmem:[%s4099_s21] sm:$0xff]  ;;  %v599_v44 = vmax.f32 %v591_v35, 0.0  ;;  %v786_v57 = vld [vmem:[%s4099_s21 + $0x28] sm:$0xff]  ;;  %v582_v3 = vmul.f32 %v4105_v7, %v571_v55 }
  0x16   : > { %1886 = vmatpush.bf16.msra.mxu1 %v3787_v10  ;;  %3931 = vmatpush.bf16.msra.mxu3 %v3787_v10  ;;  %558 = vst [vmem:[#allocation2 + $0x38] sm:$0xf] %v3990_v4  ;;  %v816_v23 = vpack.c.bf16 %v808_v20, %v808_v20  ;;  %v592_v37 = vadd.f32 %v4110_v8, %v581_v30  ;;  %v3782_v50 = vld [vmem:[%s5015_s4] sm:$0xff]  ;;  %v572_v59 = vld [vmem:[%s4128_s14 + $0x30] sm:$0xff]  ;;  %vm694_vm1 = vsmask.f32 7938 }
  0x17   : > { %562 = vst [vmem:[#allocation2 + $0x40] sm:$0xf] %v3990_v4  ;;  %v817_v24 = vpack.c.bf16 %v809_v21, %v809_v21  ;;  %v596_v38 = vmax.f32 %v588_v31, 0.0  ;;  %v789_v41 = vmul.f32 %v4105_v7, %v781_v34  ;;  %v4198_v53 = vpack.c.bf16 %v599_v44, %v599_v44  ;;  %v787_v61 = vld [vmem:[%s4099_s21 + $0x30] sm:$0xff]  ;;  %v3825_v1 = vld [vmem:[%s5015_s4 + $0xf8] sm:$0xff]  ;;  %v3811_v9 = vld [vmem:[%s5015_s4 + $0xa8] sm:$0xff] }
  0x18   : > { %745 = vst [vmem:[#allocation2 + $0x48] sm:$0xf] %v3990_v4  ;;  %v600_v47 = vmax.f32 %v592_v37, 0.0  ;;  %v4208_v58 = vadd.f32 %v4110_v8, %v578_v49  ;;  %v590_v62 = vadd.f32 %v4110_v8, %v579_v52  ;;  %v3837_v2 = vld [vmem:[%s5015_s4 + $0x138] sm:$0xff]  ;;  %v794_v10 = vmul.f32 %v4105_v7, %v786_v57  ;;  %v782_v11 = vld [vmem:[%s4099_s21 + $0x8] sm:$0xff]  ;;  %v3824_v14 = vld [vmem:[%s5015_s4 + $0xf0] sm:$0xff] }
  0x19   : > { %3924 = vmatpush.bf16.msra.mxu2 %v3798_v6  ;;  %1786 = vmatpush.bf16.msra.mxu0 %v3798_v6  ;;  %749 = vst [vmem:[#allocation2 + $0x50] sm:$0xf] %v3990_v4  ;;  %v4186_v48 = vpack.c.bf16 %v596_v38, %v596_v38  ;;  %v4194_v51 = vadd.f32 %v4110_v8, %v789_v41  ;;  %v637_v0 = vshrl.u32 %v4198_v53, 16  ;;  %v783_v16 = vld [vmem:[%s4099_s21 + $0x10] sm:$0xff]  ;;  %v3849_v20 = vld [vmem:[%s5015_s4 + $0x178] sm:$0xff]  ;;  %vm4270_vm2 = vmand %vm693_vm0, %vm694_vm1 }
  0x1a   : > { %1887 = vmatpush.bf16.msra.mxu1 %v3786_v17  ;;  %3932 = vmatpush.bf16.msra.mxu3 %v3786_v17  ;;  %825 = vst [vmem:[#allocation2 + $0x68] sm:$0xf] %v816_v23  ;;  %v4201_v54 = vpack.c.bf16 %v600_v47, %v600_v47  ;;  %v795_v15 = vmul.f32 %v4105_v7, %v787_v61  ;;  %v597_v17 = vmax.f32 %v4208_v58, 0.0  ;;  %v3836_v18 = vld [vmem:[%s5015_s4 + $0x130] sm:$0xff]  ;;  %v598_v21 = vmax.f32 %v590_v62, 0.0  ;;  %v3823_v34 = vld [vmem:[%s5015_s4 + $0xe8] sm:$0xff] }
  0x1b   : > { %826 = vst [vmem:[#allocation2 + $0x70] sm:$0xf] %v817_v24  ;;  %v613_v56 = vshrl.u32 %v4186_v48, 16  ;;  %v805_v60 = vmax.f32 %v4194_v51, 0.0  ;;  %v616_v5 = vshll.u32 %v4186_v48, 16  ;;  %v4252_v22 = vrot.slane %v637_v0, 7 }
  0x1c   : > { %753 = vst [vmem:[#allocation2 + $0x58] sm:$0xf] %v3990_v4  ;;  %v645_v6 = vshrl.u32 %v4201_v54, 16  ;;  %v640_v23 = vshll.u32 %v4198_v53, 16  ;;  %v790_v24 = vmul.f32 %v4105_v7, %v782_v11  ;;  %v593_v25 = vadd.f32 %v4110_v8, %v582_v3  ;;  %v3848_v29 = vld [vmem:[%s5015_s4 + $0x170] sm:$0xff] }
  0x1d   : > { %3925 = vmatpush.bf16.msra.mxu2 %v3797_v12  ;;  %1787 = vmatpush.bf16.msra.mxu0 %v3797_v12  ;;  %757 = vst [vmem:[#allocation2 + $0x60] sm:$0xf] %v3990_v4  ;;  %v583_v12 = vmul.f32 %v4105_v7, %v572_v59  ;;  %v4233_v13 = vrot.slane %v613_v56, 7  ;;  %v803_v35 = vadd.f32 %v4110_v8, %v795_v15  ;;  %v714_v38 = vld [vmem:[#allocation2 + $0x20] sm:$0xf]  ;;  %v3808_v56 = vld [vmem:[%s5015_s4 + $0x90] sm:$0xff] }
  0x1e   : > { %1888 = vmatpush.bf16.msra.mxu1 %v3785_v27  ;;  %3933 = vmatpush.bf16.msra.mxu3 %v3785_v27  ;;  %769 = vst [vmem:[#allocation2 + $0x78] sm:$0xf] %v3990_v4  ;;  %v4258_v26 = vrot.slane %v645_v6, 7  ;;  %v648_v27 = vshll.u32 %v4201_v54, 16  ;;  %v813_v37 = vpack.c.bf16 %v805_v60, %v805_v60  ;;  %v4286_v41 = vpack.c.bf16 %v597_v17, %v597_v17  ;;  %v720_v44 = vld [vmem:[#allocation2 + $0x28] sm:$0xf] }
  0x1f   : > { %773 = vst [vmem:[#allocation2 + $0x80] sm:$0xf] %v3990_v4  ;;  %v594_v30 = vadd.f32 %v4110_v8, %v583_v12  ;;  %v618_v31 = vor.u32 %v616_v5, %v4233_v13  ;;  %v4288_v42 = vpack.c.bf16 %v598_v21, %v598_v21  ;;  %v798_v45 = vadd.f32 %v4110_v8, %v790_v24  ;;  %v1136_v47 = vld [vmem:[#allocation2 + $0x48] sm:$0xf]  ;;  %v1120_v52 = vld [vmem:[#allocation2] sm:$0xf] }
  0x20   : > { %777 = vst [vmem:[#allocation2 + $0x88] sm:$0xf] %v3990_v4  ;;  %v650_v48 = vor.u32 %v648_v27, %v4258_v26  ;;  %v811_v53 = vmax.f32 %v803_v35, 0.0  ;;  %v3822_v54 = vld [vmem:[%s5015_s4 + $0xe0] sm:$0xff]  ;;  %v621_v57 = vshrl.u32 %v4286_v41, 16  ;;  %v624_v5 = vshll.u32 %v4286_v41, 16 }
  0x21   : > { %3926 = vmatpush.bf16.msra.mxu2 %v3796_v19  ;;  %1788 = vmatpush.bf16.msra.mxu0 %v3796_v19  ;;  %v1140_v40 = vld [vmem:[#allocation2 + $0x68] sm:$0xf]  ;;  %831 = vst [vmem:[#allocation2 + $0x90] sm:$0xf] %v3990_v4  ;;  %v3810_v19 = vld [vmem:[%s5015_s4 + $0xa0] sm:$0xff]  ;;  %v629_v58 = vshrl.u32 %v4288_v42, 16 }
  0x22   : > { %1889 = vmatpush.bf16.msra.mxu1 %v3784_v32  ;;  %3934 = vmatpush.bf16.msra.mxu3 %v3784_v32  ;;  %v1141_v43 = vld [vmem:[#allocation2 + $0x70] sm:$0xf]  ;;  %1149 = vst [vmem:[#allocation3 + $0x30] sm:$0xf] %v1140_v40  ;;  %v3809_v40 = vld [vmem:[%s5015_s4 + $0x98] sm:$0xff]  ;;  %v806_v60 = vmax.f32 %v798_v45, 0.0  ;;  %v721_v62 = vsel %vm4270_vm2, %v650_v48, %v720_v44 }
  0x23   : > { %1150 = vst [vmem:[#allocation3 + $0x34] sm:$0xf] %v1141_v43  ;;  %v642_v43 = vor.u32 %v640_v23, %v4252_v22  ;;  %v4323_v3 = vrot.slane %v621_v57, 7  ;;  %v4326_v6 = vrot.slane %v629_v58, 7  ;;  %v3821_v12 = vld [vmem:[%s5015_s4 + $0xd8] sm:$0xff]  ;;  %v3847_v17 = vld [vmem:[%s5015_s4 + $0x168] sm:$0xff] }
  0x24   : > { %835 = vst [vmem:[#allocation2 + $0x98] sm:$0xf] %v3990_v4  ;;  %v3820_v23 = vld [vmem:[%s5015_s4 + $0xd0] sm:$0xff]  ;;  %v3806_v27 = vld [vmem:[%s5015_s4 + $0x80] sm:$0xff]  ;;  %vm529_vm3 = vsmask.f32 256 }
  0x25   : > { %3927 = vmatpush.bf16.msra.mxu2 %v3795_v28  ;;  %1789 = vmatpush.bf16.msra.mxu0 %v3795_v28  ;;  %839 = vst [vmem:[#allocation2 + $0xa0] sm:$0xf] %v3990_v4  ;;  %v802_v28 = vadd.f32 %v4110_v8, %v794_v10  ;;  %v715_v59 = vsel %vm4270_vm2, %v642_v43, %v714_v38  ;;  %v632_v10 = vshll.u32 %v4288_v42, 16  ;;  %v702_v24 = vld [vmem:[#allocation2 + $0x10] sm:$0xf]  ;;  %v3831_v43 = vld [vmem:[%s5015_s4 + $0x108] sm:$0xff]  ;;  %vm4383_vm5 = vmand %vm528_vm4, %vm529_vm3 }
  0x26   : > { %1890 = vmatpush.bf16.msra.mxu1 %v3783_v39  ;;  %3935 = vmatpush.bf16.msra.mxu3 %v3783_v39  ;;  %843 = vst [vmem:[#allocation2 + $0xa8] sm:$0xf] %v3990_v4  ;;  %v3835_v39 = vld [vmem:[%s5015_s4 + $0x128] sm:$0xff]  ;;  %v726_v42 = vld [vmem:[#allocation2 + $0x30] sm:$0xf] }
  0x27   : > { %847 = vst [vmem:[#allocation2 + $0xb0] sm:$0xf] %v3990_v4  ;;  %v810_v49 = vmax.f32 %v802_v28, 0.0  ;;  %vm1169_vm6 = vsmask.f32 3328 }
  0x28   : > { %851 = vst [vmem:[#allocation2 + $0xb8] sm:$0xf] %v3990_v4  ;;  %vm1170_vm7 = vsmask.f32 7440 }
  0x29   : > { %3928 = vmatpush.bf16.msra.mxu2 %v3794_v33  ;;  %1790 = vmatpush.bf16.msra.mxu0 %v3794_v33  ;;  %855 = vst [vmem:[#allocation2 + $0xc0] sm:$0xf] %v3990_v4  ;;  %v696_v33 = vld [vmem:[#allocation2 + $0x8] sm:$0xf]  ;;  %vm4432_vm8 = vmor %vm1169_vm6, %vm1170_vm7 }
  0x2a   : > { %1891 = vmatpush.bf16.msra.mxu1 %v3782_v50  ;;  %3936 = vmatpush.bf16.msra.mxu3 %v3782_v50  ;;  %v3792_v63 = vld [vmem:[#allocation3 + $0x30] sm:$0xff]  ;;  %859 = vst [vmem:[#allocation2 + $0xc8] sm:$0xf] %v3990_v4  ;;  %v602_v50 = vmax.f32 %v594_v30, 0.0  ;;  %v697_v51 = vsel %vm4270_vm2, %v618_v31, %v696_v33  ;;  %v3846_v31 = vld [vmem:[%s5015_s4 + $0x160] sm:$0xff] }
  0x2b   : > { %1036 = vst [vmem:[#allocation2 + $0xd8] sm:$0xf] %v3990_v4 }
  0x2c   : > { %1801 = vmatmul.bf16.vlgmr.msra.gmra.mxu2 %v3792_v63  ;;  %1040 = vst [vmem:[#allocation2 + $0xe0] sm:$0xf] %v3990_v4  ;;  %v818_v63 = vpack.c.bf16 %v810_v49, %v810_v49  ;;  %v4315_v0 = vpack.c.bf16 %v602_v50, %v602_v50 }
  0x2d   : > { %2010 = vmatpush.bf16.msrb.mxu2 %v3813_v36  ;;  %2278 = vmatpush.bf16.msrb.mxu0 %v3837_v2  ;;  %1044 = vst [vmem:[#allocation2 + $0xe8] sm:$0xf] %v3990_v4  ;;  %v791_v36 = vmul.f32 %v4105_v7, %v783_v16  ;;  %v3807_v16 = vld [vmem:[%s5015_s4 + $0x88] sm:$0xff] }
  0x2e   : > { %2144 = vmatpush.bf16.msrb.mxu3 %v3825_v1  ;;  %1048 = vst [vmem:[#allocation2 + $0xf0] sm:$0xf] %v3990_v4  ;;  %2412 = vmatpush.bf16.msrb.mxu1 %v3849_v20  ;;  %v819_v1 = vpack.c.bf16 %v811_v53, %v811_v53  ;;  %v661_v15 = vshrl.u32 %v4315_v0, 16 }
  0x2f   : > { %1052 = vst [vmem:[#allocation2 + $0xf8] sm:$0xf] %v3990_v4  ;;  %v799_v55 = vadd.f32 %v4110_v8, %v791_v36  ;;  %v664_v36 = vshll.u32 %v4315_v0, 16 }
  0x30   : > { %1056 = vst [vmem:[#allocation2 + $0x100] sm:$0xf] %v3990_v4  ;;  %v4361_v35 = vrot.slane %v661_v15, 7 }
  0x31   : > { %2011 = vmatpush.bf16.msrb.mxu2 %v3812_v46  ;;  %2279 = vmatpush.bf16.msrb.mxu0 %v3836_v18  ;;  %1060 = vst [vmem:[#allocation2 + $0x108] sm:$0xf] %v3990_v4  ;;  %v601_v46 = vmax.f32 %v593_v25, 0.0  ;;  %v807_v2 = vmax.f32 %v799_v55, 0.0  ;;  %v867_v18 = vld [vmem:[%s4321_s22] sm:$0xff]  ;;  %v3832_v25 = vld [vmem:[%s5015_s4 + $0x110] sm:$0xff] }
  0x32   : > { %2145 = vmatpush.bf16.msrb.mxu3 %v3824_v14  ;;  %1064 = vst [vmem:[#allocation2 + $0x110] sm:$0xf] %v3990_v4  ;;  %2413 = vmatpush.bf16.msrb.mxu1 %v3848_v29  ;;  %v3834_v4 = vld [vmem:[%s5015_s4 + $0x120] sm:$0xff]  ;;  %v3833_v14 = vld [vmem:[%s5015_s4 + $0x118] sm:$0xff]  ;;  %v626_v29 = vor.u32 %v624_v5, %v4323_v3  ;;  %v875_v33 = vmul.f32 %v4105_v7, %v867_v18 }
  0x33   : > { %822 = vst [vmem:[#allocation2 + $0x50] sm:$0xf] %v813_v37  ;;  %v4311_v61 = vpack.c.bf16 %v601_v46, %v601_v46  ;;  %v815_v20 = vpack.c.bf16 %v807_v2, %v807_v2  ;;  %v1153_v37 = vld [vmem:[#allocation2] sm:$0xf]  ;;  %v666_v50 = vor.u32 %v664_v36, %v4361_v35  ;;  %v732_v55 = vld [vmem:[#allocation2 + $0x38] sm:$0xf] }
  0x34   : > { %1145 = vst [vmem:[#allocation3 + $0x20] sm:$0xf] %v1136_v47  ;;  %v703_v45 = vsel %vm4270_vm2, %v626_v29, %v702_v24  ;;  %v868_v47 = vld [vmem:[%s4321_s22 + $0x8] sm:$0xff]  ;;  %v883_v48 = vadd.f32 %v4110_v8, %v875_v33  ;;  %v619_v24 = vrot.slane %v4233_v13, 4 }
  0x35   : > { %2012 = vmatpush.bf16.msrb.mxu2 %v3811_v9  ;;  %2280 = vmatpush.bf16.msrb.mxu0 %v3835_v39  ;;  %698 = vst [vmem:[#allocation2 + $0x8] sm:$0xf] %v697_v51  ;;  %v814_v9 = vpack.c.bf16 %v806_v60, %v806_v60  ;;  %v653_v11 = vshrl.u32 %v4311_v61, 16  ;;  %v656_v21 = vshll.u32 %v4311_v61, 16  ;;  %v634_v39 = vor.u32 %v632_v10, %v4326_v6  ;;  %v535_v60 = vld [vmem:[#allocation2 + $0xc] sm:$0x1] }
  0x36   : > { %2146 = vmatpush.bf16.msrb.mxu3 %v3823_v34  ;;  %1128 = vst [vmem:[#allocation3] sm:$0xf] %v1120_v52  ;;  %2414 = vmatpush.bf16.msrb.mxu1 %v3847_v17  ;;  %v708_v34 = vld [vmem:[#allocation2 + $0x18] sm:$0xf]  ;;  %v1173_v51 = vshrl.u32 %v1153_v37, 16  ;;  %v1176_v52 = vshll.u32 %v1153_v37, 16  ;;  %v876_v61 = vmul.f32 %v4105_v7, %v868_v47  ;;  %v733_v0 = vsel %vm4270_vm2, %v666_v50, %v732_v55 }
  0x37   : > { %716 = vst [vmem:[#allocation2 + $0x20] sm:$0xf] %v715_v59  ;;  %v4355_v30 = vrot.slane %v653_v11, 7  ;;  %v536_v11 = vsel %vm4383_vm5, 0, %v535_v60  ;;  %v3844_v47 = vld [vmem:[%s5015_s4 + $0x150] sm:$0xff]  ;;  %v651_v55 = vrot.slane %v4258_v26, 4 }
  0x38   : > { %722 = vst [vmem:[#allocation2 + $0x28] sm:$0xf] %v721_v62  ;;  %v891_v62 = vmax.f32 %v883_v48, 0.0  ;;  %v1178_v2 = vrot.slane %v1176_v52, 5  ;;  %v627_v60 = vrot.slane %v4323_v3, 4 }
  0x39   : > { %2013 = vmatpush.bf16.msrb.mxu2 %v3810_v19  ;;  %2281 = vmatpush.bf16.msrb.mxu0 %v3834_v4  ;;  %827 = vst [vmem:[#allocation2 + $0x78] sm:$0xf] %v818_v63  ;;  %v658_v46 = vor.u32 %v656_v21, %v4355_v30 }
  0x3a   : > { %2147 = vmatpush.bf16.msrb.mxu3 %v3822_v54  ;;  %v1137_v19 = vld [vmem:[#allocation2 + $0x50] sm:$0xf]  ;;  %828 = vst [vmem:[#allocation2 + $0x80] sm:$0xf] %v819_v1  ;;  %2415 = vmatpush.bf16.msrb.mxu1 %v3846_v31  ;;  %v709_v54 = vsel %vm4270_vm2, %v634_v39, %v708_v34  ;;  %v1175_v1 = vrot.slane %v1173_v51, 4  ;;  %v4398_v15 = vpack.c.bf16 %v891_v62, %v891_v62  ;;  %v3818_v39 = vld [vmem:[%s5015_s4 + $0xc0] sm:$0xff] }
  0x3b   : > { %1146 = vst [vmem:[#allocation3 + $0x24] sm:$0xf] %v1137_v19  ;;  %v727_v58 = vsel %vm4270_vm2, %v658_v46, %v726_v42  ;;  %v758_v31 = vld [vmem:[#allocation2 + $0x64] sm:$0x1] }
  0x3c   : > { %v1121_v28 = vld [vmem:[#allocation2 + $0x8] sm:$0xf]  ;;  %823 = vst [vmem:[#allocation2 + $0x58] sm:$0xf] %v814_v9  ;;  %v1179_v18 = vor.u32 %v1178_v2, %v1175_v1  ;;  %v908_v29 = vshrl.u32 %v4398_v15, 16  ;;  %v3830_v42 = vld [vmem:[%s5015_s4 + $0x100] sm:$0xff] }
  0x3d   : > { %2014 = vmatpush.bf16.msrb.mxu2 %v3809_v40  ;;  %2282 = vmatpush.bf16.msrb.mxu0 %v3833_v14  ;;  %1129 = vst [vmem:[#allocation3 + $0x4] sm:$0xf] %v1121_v28  ;;  %v3819_v40 = vld [vmem:[%s5015_s4 + $0xc8] sm:$0xff]  ;;  %v884_v14 = vadd.f32 %v4110_v8, %v876_v61  ;;  %v635_v61 = vrot.slane %v4326_v6, 4  ;;  %v4447_v1 = vld [vmem:[#allocation2 + $0xdc] sm:$0x1] }
  0x3e   : > { %2148 = vmatpush.bf16.msrb.mxu3 %v3821_v12  ;;  %v1124_v38 = vld [vmem:[#allocation2 + $0x20] sm:$0xf]  ;;  %824 = vst [vmem:[#allocation2 + $0x60] sm:$0xf] %v815_v20  ;;  %v1155_v9 = vld [vmem:[#allocation2 + $0x8] sm:$0xf] }
  0x3f   : > { %v1125_v41 = vld [vmem:[#allocation2 + $0x28] sm:$0xf]  ;;  %1132 = vst [vmem:[#allocation3 + $0x10] sm:$0xf] %v1124_v38  ;;  %v3845_v12 = vld [vmem:[%s5015_s4 + $0x158] sm:$0xff]  ;;  %v1187_v19 = vshrl.u32 %v1155_v9, 16 }
  0x40   : > { %1133 = vst [vmem:[#allocation3 + $0x14] sm:$0xf] %v1125_v41  ;;  %v1142_v44 = vld [vmem:[#allocation2 + $0x78] sm:$0xf]  ;;  %v1190_v21 = vshll.u32 %v1155_v9, 16  ;;  %2416 = vmatpush.bf16.msrb.mxu1 %v3845_v12  ;;  %v892_v28 = vmax.f32 %v884_v14, 0.0 }
  0x41   : > { %2015 = vmatpush.bf16.msrb.mxu2 %v3808_v56  ;;  %2283 = vmatpush.bf16.msrb.mxu0 %v3832_v25  ;;  %v1143_v49 = vld [vmem:[#allocation2 + $0x80] sm:$0xf]  ;;  %1151 = vst [vmem:[#allocation3 + $0x38] sm:$0xf] %v1142_v44  ;;  %v531_v56 = vld [vmem:[#allocation2 + $0x4] sm:$0x1] }
  0x42   : > { %2149 = vmatpush.bf16.msrb.mxu3 %v3820_v23  ;;  %v3790_v53 = vld [vmem:[#allocation3 + $0x20] sm:$0xff]  ;;  %1152 = vst [vmem:[#allocation3 + $0x3c] sm:$0xf] %v1143_v49  ;;  %v532_v5 = vsel %vm4383_vm5, 0, %v531_v56  ;;  %v750_v23 = vld [vmem:[#allocation2 + $0x54] sm:$0x1]  ;;  %v4422_v48 = vpack.c.bf16 %v892_v28, %v892_v28 }
  0x43   : > { %v1138_v4 = vld [vmem:[#allocation2 + $0x58] sm:$0xf]  ;;  %704 = vst [vmem:[#allocation2 + $0x10] sm:$0xf] %v703_v45  ;;  %1791 = vmatmul.bf16.vlgmr.msra.gmra.mxu0 %v3790_v53  ;;  %v754_v25 = vld [vmem:[#allocation2 + $0x5c] sm:$0x1] }
  0x44   : > { %v3778_v57 = vld [vmem:[#allocation3] sm:$0xff]  ;;  %1147 = vst [vmem:[#allocation3 + $0x28] sm:$0xf] %v1138_v4  ;;  %v1180_v33 = vrot.slane %v1179_v18, 4  ;;  %v4402_v34 = vrot.slane %v1187_v19, 4  ;;  %v4404_v37 = vrot.slane %v1190_v21, 5  ;;  %2417 = vmatpush.bf16.msrb.mxu1 %v3844_v47 }
  0x45   : > { %2016 = vmatpush.bf16.msrb.mxu2 %v3807_v16  ;;  %2284 = vmatpush.bf16.msrb.mxu0 %v3831_v43  ;;  %v1139_v63 = vld [vmem:[#allocation2 + $0x60] sm:$0xf]  ;;  %710 = vst [vmem:[#allocation2 + $0x18] sm:$0xf] %v709_v54  ;;  %v746_v16 = vld [vmem:[#allocation2 + $0x4c] sm:$0x1] }
  0x46   : > { %2150 = vmatpush.bf16.msrb.mxu3 %v3819_v40  ;;  %1892 = vmatmul.bf16.vlgmr.msra.gmra.mxu1 %v3778_v57  ;;  %1148 = vst [vmem:[#allocation3 + $0x2c] sm:$0xf] %v1139_v63  ;;  %v747_v13 = vsel %vm4383_vm5, 0, %v746_v16  ;;  %v751_v38 = vsel %vm4383_vm5, 0, %v750_v23  ;;  %v762_v40 = vld [vmem:[#allocation2 + $0x6c] sm:$0x1] }
  0x47   : > { %v3780_v10 = vld [vmem:[#allocation3 + $0x10] sm:$0xff]  ;;  %728 = vst [vmem:[#allocation2 + $0x30] sm:$0xf] %v727_v58  ;;  %v3861_v43 = vld [vmem:[%s5015_s4 + $0x1b8] sm:$0xff]  ;;  %v755_v52 = vsel %vm4383_vm5, 0, %v754_v25  ;;  %v643_v54 = vrot.slane %v4252_v22, 4 }
  0x48   : > { %734 = vst [vmem:[#allocation2 + $0x38] sm:$0xf] %v733_v0  ;;  %1902 = vmatmul.bf16.vlgmr.msra.gmra.mxu3 %v3780_v10  ;;  %v766_v44 = vld [vmem:[#allocation2 + $0x74] sm:$0x1]  ;;  %v770_v49 = vld [vmem:[#allocation2 + $0x7c] sm:$0x1] }
  0x49   : > { %2017 = vmatpush.bf16.msrb.mxu2 %v3806_v27  ;;  %v3793_v17 = vld [vmem:[#allocation3 + $0x38] sm:$0xff]  ;;  %533 = vst [vmem:[#allocation2 + $0x4] sm:$0x1] %v532_v5  ;;  %2285 = vmatpush.bf16.msrb.mxu0 %v3830_v42  ;;  %v774_v53 = vld [vmem:[#allocation2 + $0x84] sm:$0x1]  ;;  %v759_v57 = vsel %vm4383_vm5, 0, %v758_v31  ;;  %v1193_v5 = vor.u32 %v4404_v37, %v4402_v34 }
  0x4a   : > { %v1122_v20 = vld [vmem:[#allocation2 + $0x10] sm:$0xf]  ;;  %537 = vst [vmem:[#allocation2 + $0xc] sm:$0x1] %v536_v11  ;;  %1806 = vmatmul.bf16.gmra.mxu2 %v3793_v17  ;;  %2151 = vmatpush.bf16.msrb.mxu3 %v3818_v39  ;;  %v778_v58 = vld [vmem:[#allocation2 + $0x8c] sm:$0x1] }
  0x4b   : > { %1130 = vst [vmem:[#allocation3 + $0x8] sm:$0xf] %v1122_v20  ;;  %v869_v63 = vld [vmem:[%s4321_s22 + $0x10] sm:$0xff]  ;;  %v763_v9 = vsel %vm4383_vm5, 0, %v762_v40  ;;  %v916_v10 = vshrl.u32 %v4422_v48, 16  ;;  %v870_v11 = vld [vmem:[%s4321_s22 + $0x18] sm:$0xff] }
  0x4c   : > { %v1123_v27 = vld [vmem:[#allocation2 + $0x18] sm:$0xf]  ;;  %748 = vst [vmem:[#allocation2 + $0x4c] sm:$0x1] %v747_v13  ;;  %v864_v0 = vld [vmem:[#allocation2 + $0xd4] sm:$0x1]  ;;  %v877_v12 = vmul.f32 %v4105_v7, %v869_v63  ;;  %v878_v25 = vmul.f32 %v4105_v7, %v870_v11 }
  0x4d   : > { %1131 = vst [vmem:[#allocation3 + $0xc] sm:$0xf] %v1123_v27  ;;  %v3791_v45 = vld [vmem:[#allocation3 + $0x28] sm:$0xff]  ;;  %2546 = vmatpush.bf16.msra.mxu2 %v3861_v43  ;;  %v1041_v14 = vld [vmem:[#allocation2 + $0xe4] sm:$0x1]  ;;  %v659_v16 = vrot.slane %v4355_v30, 4 }
  0x4e   : > { %v1126_v36 = vld [vmem:[#allocation2 + $0x30] sm:$0xf]  ;;  %752 = vst [vmem:[#allocation2 + $0x54] sm:$0x1] %v751_v38  ;;  %v767_v18 = vsel %vm4383_vm5, 0, %v766_v44  ;;  %v4461_v19 = vrot.slane %v908_v29, 7  ;;  %v885_v27 = vadd.f32 %v4110_v8, %v877_v12  ;;  %v886_v47 = vadd.f32 %v4110_v8, %v878_v25 }
  0x4f   : > { %v1127_v41 = vld [vmem:[#allocation2 + $0x38] sm:$0xf]  ;;  %1134 = vst [vmem:[#allocation3 + $0x18] sm:$0xf] %v1126_v36  ;;  %v1072_v20 = vld [vmem:[%s4442_s16] sm:$0xff]  ;;  %v771_v21 = vsel %vm4383_vm5, 0, %v770_v49 }
  0x50   : > { %1135 = vst [vmem:[#allocation3 + $0x1c] sm:$0xf] %v1127_v41  ;;  %v1154_v46 = vld [vmem:[#allocation2 + $0x4] sm:$0x1]  ;;  %v911_v23 = vshll.u32 %v4398_v15, 16  ;;  %v914_v29 = vrot.slane %v4461_v19, 4  ;;  %v1080_v39 = vmul.f32 %v4105_v7, %v1072_v20 }
  0x51   : > { %v699_v50 = vld [vmem:[#allocation2 + $0xc] sm:$0x1]  ;;  %v1182_v51 = vshll.u32 %v1154_v46, 16  ;;  %756 = vst [vmem:[#allocation2 + $0x5c] sm:$0x1] %v755_v52  ;;  %v919_v34 = vshll.u32 %v4422_v48, 16 }
  0x52   : > { %v700_v4 = vsel %vm4383_vm5, %v619_v24, %v699_v50  ;;  %760 = vst [vmem:[#allocation2 + $0x64] sm:$0x1] %v759_v57  ;;  %v1073_v24 = vld [vmem:[%s4442_s16 + $0x8] sm:$0xff]  ;;  %v1049_v36 = vld [vmem:[#allocation2 + $0xf4] sm:$0x1]  ;;  %v1194_v37 = vrot.slane %v1193_v5, 4 }
  0x53   : > { %701 = vst [vmem:[#allocation2 + $0xc] sm:$0x1] %v700_v4  ;;  %v1184_v62 = vrot.slane %v1182_v51, 5  ;;  %1796 = vmatmul.bf16.gmra.mxu0 %v3791_v45  ;;  %v1045_v28 = vld [vmem:[#allocation2 + $0xec] sm:$0x1]  ;;  %v779_v13 = vsel %vm4383_vm5, 0, %v778_v58  ;;  %v1081_v43 = vmul.f32 %v4105_v7, %v1073_v24 }
  0x54   : > { %v3779_v2 = vld [vmem:[#allocation3 + $0x8] sm:$0xff]  ;;  %764 = vst [vmem:[#allocation2 + $0x6c] sm:$0x1] %v763_v9  ;;  %v4476_v38 = vrot.slane %v916_v10, 7  ;;  %v1053_v40 = vld [vmem:[#allocation2 + $0xfc] sm:$0x1] }
  0x55   : > { %v1185_v17 = vsel %vm4432_vm8, %v1180_v33, %v1184_v62  ;;  %v775_v33 = vsel %vm4383_vm5, 0, %v774_v53  ;;  %768 = vst [vmem:[#allocation2 + $0x74] sm:$0x1] %v767_v18  ;;  %v865_v41 = vsel %vm4383_vm5, 0, %v864_v0  ;;  %v1038_v42 = vsel %vm4383_vm5, 0, %v4447_v1  ;;  %v3873_v51 = vld [vmem:[%s5015_s4 + $0x1f8] sm:$0xff] }
  0x56   : > { %1897 = vmatmul.bf16.gmra.mxu1 %v3779_v2  ;;  %1293 = vst [vmem:[#allocation3 + $0x40] sm:$0xf] %v1185_v17  ;;  %v1157_v44 = vld [vmem:[#allocation2 + $0x10] sm:$0xf]  ;;  %v1042_v46 = vsel %vm4383_vm5, 0, %v1041_v14  ;;  %v893_v48 = vmax.f32 %v885_v27, 0.0  ;;  %v1088_v62 = vadd.f32 %v4110_v8, %v1080_v39  ;;  %v1089_v9 = vadd.f32 %v4110_v8, %v1081_v43  ;;  %2680 = vmatpush.bf16.msra.mxu3 %v3873_v51 }
  0x57   : > { %v3781_v31 = vld [vmem:[#allocation3 + $0x18] sm:$0xff]  ;;  %772 = vst [vmem:[#allocation2 + $0x7c] sm:$0x1] %v771_v21  ;;  %v1057_v49 = vld [vmem:[#allocation2 + $0x104] sm:$0x1]  ;;  %v3843_v52 = vld [vmem:[%s5015_s4 + $0x148] sm:$0xff]  ;;  %v921_v39 = vor.u32 %v919_v34, %v4476_v38 }
  0x58   : > { %1907 = vmatmul.bf16.gmra.mxu3 %v3781_v31  ;;  %776 = vst [vmem:[#allocation2 + $0x84] sm:$0x1] %v775_v33  ;;  %v3860_v53 = vld [vmem:[%s5015_s4 + $0x1b0] sm:$0xff]  ;;  %v1061_v4 = vld [vmem:[#allocation2 + $0x10c] sm:$0x1]  ;;  %v1046_v58 = vsel %vm4383_vm5, 0, %v1045_v28  ;;  %2418 = vmatpush.bf16.msrb.mxu1 %v3843_v52  ;;  %v4516_v27 = vpack.c.bf16 %v893_v48, %v893_v48  ;;  %v913_v31 = vor.u32 %v911_v23, %v4461_v19 }
  0x59   : > { %780 = vst [vmem:[#allocation2 + $0x8c] sm:$0x1] %v779_v13  ;;  %v1065_v57 = vld [vmem:[#allocation2 + $0x114] sm:$0x1]  ;;  %v3885_v63 = vld [vmem:[%s5015_s4 + $0x238] sm:$0xff]  ;;  %v1050_v5 = vsel %vm4383_vm5, 0, %v1049_v36  ;;  %2547 = vmatpush.bf16.msra.mxu2 %v3860_v53 }
  0x5a   : > { %v1156_v45 = vld [vmem:[#allocation2 + $0xc] sm:$0x1]  ;;  %866 = vst [vmem:[#allocation2 + $0xd4] sm:$0x1] %v865_v41  ;;  %v1159_v0 = vld [vmem:[#allocation2 + $0x18] sm:$0xf]  ;;  %2814 = vmatpush.bf16.msra.mxu0 %v3885_v63 }
  0x5b   : > { %v1196_v50 = vshll.u32 %v1156_v45, 16  ;;  %v1069_v1 = vld [vmem:[#allocation2 + $0x11c] sm:$0x1]  ;;  %1039 = vst [vmem:[#allocation2 + $0xdc] sm:$0x1] %v1038_v42  ;;  %v3842_v10 = vld [vmem:[%s5015_s4 + $0x140] sm:$0xff] }
  0x5c   : > { %v3872_v11 = vld [vmem:[%s5015_s4 + $0x1f0] sm:$0xff]  ;;  %v1054_v12 = vsel %vm4383_vm5, 0, %v1053_v40  ;;  %1043 = vst [vmem:[#allocation2 + $0xe4] sm:$0x1] %v1042_v46  ;;  %v1201_v14 = vshrl.u32 %v1157_v44, 16  ;;  %v1204_v17 = vshll.u32 %v1157_v44, 16  ;;  %2419 = vmatpush.bf16.msrb.mxu1 %v3842_v10 }
  0x5d   : > { %v1198_v2 = vrot.slane %v1196_v50, 5  ;;  %v894_v18 = vmax.f32 %v886_v47, 0.0  ;;  %1047 = vst [vmem:[#allocation2 + $0xec] sm:$0x1] %v1046_v58  ;;  %v987_v21 = vld [vmem:[#allocation2 + $0x90] sm:$0xf]  ;;  %2681 = vmatpush.bf16.msra.mxu3 %v3872_v11 }
  0x5e   : > { %v1215_v24 = vshrl.u32 %v1159_v0, 16  ;;  %v1218_v25 = vshll.u32 %v1159_v0, 16  ;;  %v1058_v28 = vsel %vm4383_vm5, 0, %v1057_v49  ;;  %v993_v33 = vld [vmem:[#allocation2 + $0x98] sm:$0xf]  ;;  %v1096_v36 = vmax.f32 %v1088_v62, 0.0 }
  0x5f   : > { %v1199_v20 = vsel %vm4432_vm8, %v1194_v37, %v1198_v2  ;;  %v1062_v37 = vsel %vm4383_vm5, 0, %v1061_v4  ;;  %v1066_v13 = vsel %vm4383_vm5, 0, %v1065_v57  ;;  %1051 = vst [vmem:[#allocation2 + $0xf4] sm:$0x1] %v1050_v5  ;;  %v1074_v40 = vld [vmem:[%s4442_s16 + $0x10] sm:$0xff]  ;;  %v1075_v41 = vld [vmem:[%s4442_s16 + $0x18] sm:$0xff]  ;;  %v4532_v43 = vpack.c.bf16 %v894_v18, %v894_v18 }
  0x60   : > { %1294 = vst [vmem:[#allocation3 + $0x44] sm:$0xf] %v1199_v20  ;;  %v1070_v42 = vsel %vm4383_vm5, 0, %v1069_v1  ;;  %v1097_v15 = vmax.f32 %v1089_v9, 0.0  ;;  %v1203_v23 = vrot.slane %v1201_v14, 4  ;;  %v1206_v44 = vrot.slane %v1204_v17, 5 }
  0x61   : > { %1055 = vst [vmem:[#allocation2 + $0xfc] sm:$0x1] %v1054_v12  ;;  %v1217_v45 = vrot.slane %v1215_v24, 4  ;;  %v1220_v46 = vrot.slane %v1218_v25, 5  ;;  %v924_v47 = vshrl.u32 %v4516_v27, 16  ;;  %v988_v34 = vsel %vm4270_vm2, %v913_v31, %v987_v21  ;;  %v871_v58 = vld [vmem:[%s4321_s22 + $0x20] sm:$0xff] }
  0x62   : > { %1059 = vst [vmem:[#allocation2 + $0x104] sm:$0x1] %v1058_v28  ;;  %v539_v48 = vld [vmem:[#allocation2 + $0x14] sm:$0x1]  ;;  %v543_v49 = vld [vmem:[#allocation2 + $0x1c] sm:$0x1]  ;;  %v1082_v50 = vmul.f32 %v4105_v7, %v1074_v40  ;;  %v1083_v51 = vmul.f32 %v4105_v7, %v1075_v41  ;;  %v994_v53 = vsel %vm4270_vm2, %v921_v39, %v993_v33  ;;  %v1104_v4 = vpack.c.bf16 %v1096_v36, %v1096_v36 }
  0x63   : > { %1063 = vst [vmem:[#allocation2 + $0x10c] sm:$0x1] %v1062_v37  ;;  %v922_v52 = vrot.slane %v4476_v38, 4  ;;  %v832_v57 = vld [vmem:[#allocation2 + $0x94] sm:$0x1]  ;;  %v1105_v62 = vpack.c.bf16 %v1097_v15, %v1097_v15  ;;  %v927_v63 = vshll.u32 %v4516_v27, 16  ;;  %v879_v2 = vmul.f32 %v4105_v7, %v871_v58 }
  0x64   : > { %1067 = vst [vmem:[#allocation2 + $0x114] sm:$0x1] %v1066_v13  ;;  %v932_v0 = vshrl.u32 %v4532_v43, 16  ;;  %v872_v1 = vld [vmem:[%s4321_s22 + $0x28] sm:$0xff]  ;;  %v1207_v9 = vor.u32 %v1206_v44, %v1203_v23  ;;  %v1221_v10 = vor.u32 %v1220_v46, %v1217_v45  ;;  %v836_v11 = vld [vmem:[#allocation2 + $0x9c] sm:$0x1]  ;;  %v4555_v20 = vadd.f32 %v4110_v8, %v1082_v50 }
  0x65   : > { %1071 = vst [vmem:[#allocation2 + $0x11c] sm:$0x1] %v1070_v42  ;;  %v4547_v12 = vrot.slane %v924_v47, 7  ;;  %v880_v14 = vmul.f32 %v4105_v7, %v872_v1  ;;  %v540_v17 = vsel %vm4383_vm5, 0, %v539_v48  ;;  %v544_v18 = vsel %vm4383_vm5, 0, %v543_v49 }
  0x66   : > { %989 = vst [vmem:[#allocation2 + $0x90] sm:$0xf] %v988_v34  ;;  %v4558_v21 = vadd.f32 %v4110_v8, %v1083_v51  ;;  %v4560_v24 = vld [vmem:[#allocation2 + $0x24] sm:$0x1]  ;;  %v4562_v25 = vld [vmem:[#allocation2 + $0x2c] sm:$0x1]  ;;  %v887_v7 = vadd.f32 %v4110_v8, %v879_v2 }
  0x67   : > { %v3802_v5 = vld [vmem:[#allocation3 + $0x40] sm:$0xff]  ;;  %995 = vst [vmem:[#allocation2 + $0x98] sm:$0xf] %v994_v53  ;;  %v4566_v27 = vadd.f32 %v4110_v8, %v880_v14  ;;  %v833_v28 = vsel %vm4383_vm5, 0, %v832_v57  ;;  %v837_v31 = vsel %vm4383_vm5, 0, %v836_v11  ;;  %v4572_v33 = vrot.slane %v932_v0, 7 }
  0x68   : > { %2018 = vmatmul.bf16.vlgmr.msrb.gmra.mxu2 %v3802_v5  ;;  %1112 = vst [vmem:[#allocation2 + $0xd8] sm:$0xf] %v1104_v4  ;;  %v935_v36 = vshll.u32 %v4532_v43, 16  ;;  %v4575_v37 = vrot.slane %v1207_v9, 4  ;;  %v4577_v13 = vrot.slane %v1221_v10, 4  ;;  %v929_v39 = vor.u32 %v927_v63, %v4547_v12  ;;  %v3859_v43 = vld [vmem:[%s5015_s4 + $0x1a8] sm:$0xff] }
  0x69   : > { %1113 = vst [vmem:[#allocation2 + $0xe0] sm:$0xf] %v1105_v62  ;;  %v999_v8 = vld [vmem:[#allocation2 + $0xa0] sm:$0xf]  ;;  %v1098_v41 = vmax.f32 %v4555_v20, 0.0  ;;  %v1099_v42 = vmax.f32 %v4558_v21, 0.0  ;;  %2548 = vmatpush.bf16.msra.mxu2 %v3859_v43 }
  0x6a   : > { %541 = vst [vmem:[#allocation2 + $0x14] sm:$0x1] %v540_v17  ;;  %v4580_v40 = vld [vmem:[#allocation2 + $0x20] sm:$0xf]  ;;  %v548_v15 = vsel %vm4383_vm5, 0, %v4560_v24  ;;  %v552_v23 = vsel %vm4383_vm5, 0, %v4562_v25  ;;  %v937_v51 = vor.u32 %v935_v36, %v4572_v33  ;;  %v1000_v58 = vsel %vm4270_vm2, %v929_v39, %v999_v8 }
  0x6b   : > { %545 = vst [vmem:[#allocation2 + $0x1c] sm:$0x1] %v544_v18  ;;  %v1229_v44 = vshrl.u32 %v4580_v40, 16  ;;  %v895_v45 = vmax.f32 %v887_v7, 0.0  ;;  %v896_v46 = vmax.f32 %v4566_v27, 0.0  ;;  %v3858_v8 = vld [vmem:[%s5015_s4 + $0x1a0] sm:$0xff]  ;;  %v1107_v19 = vpack.c.bf16 %v1099_v42, %v1099_v42 }
  0x6c   : > { %834 = vst [vmem:[#allocation2 + $0x94] sm:$0x1] %v833_v28  ;;  %v1005_v48 = vld [vmem:[#allocation2 + $0xa8] sm:$0xf]  ;;  %v4598_v10 = vld [vmem:[#allocation2 + $0xa4] sm:$0x1]  ;;  %v1106_v28 = vpack.c.bf16 %v1098_v41, %v1098_v41 }
  0x6d   : > { %v1301_v47 = vld [vmem:[#allocation2 + $0x90] sm:$0xf]  ;;  %838 = vst [vmem:[#allocation2 + $0x9c] sm:$0x1] %v837_v31  ;;  %v1163_v1 = vld [vmem:[#allocation2 + $0x28] sm:$0xf]  ;;  %v1006_v20 = vsel %vm4270_vm2, %v937_v51, %v1005_v48  ;;  %v4618_v36 = vpack.c.bf16 %v895_v45, %v895_v45  ;;  %v4628_v43 = vpack.c.bf16 %v896_v46, %v896_v46  ;;  %2549 = vmatpush.bf16.msra.mxu2 %v3858_v8 }
  0x6e   : > { %v1335_v34 = vld [vmem:[#allocation2 + $0x90] sm:$0xf]  ;;  %v1302_v49 = vld [vmem:[#allocation2 + $0x98] sm:$0xf]  ;;  %1310 = vst [vmem:[#allocation3 + $0x60] sm:$0xf] %v1301_v47 }
  0x6f   : > { %v1337_v50 = vld [vmem:[#allocation2 + $0x98] sm:$0xf]  ;;  %1311 = vst [vmem:[#allocation3 + $0x64] sm:$0xf] %v1302_v49  ;;  %v1352_v4 = vshrl.u32 %v1335_v34, 16  ;;  %v1355_v57 = vshll.u32 %v1335_v34, 16 }
  0x70   : > { %v1318_v53 = vld [vmem:[#allocation2 + $0xd8] sm:$0xf]  ;;  %v1319_v62 = vld [vmem:[#allocation2 + $0xe0] sm:$0xf]  ;;  %v1366_v63 = vshrl.u32 %v1337_v50, 16  ;;  %v1369_v0 = vshll.u32 %v1337_v50, 16 }
  0x71   : > { %1327 = vst [vmem:[#allocation3 + $0x80] sm:$0xf] %v1318_v53  ;;  %v705_v2 = vld [vmem:[#allocation2 + $0x14] sm:$0x1]  ;;  %v1354_v5 = vrot.slane %v1352_v4, 4  ;;  %v1357_v9 = vrot.slane %v1355_v57, 5 }
  0x72   : > { %1328 = vst [vmem:[#allocation3 + $0x84] sm:$0xf] %v1319_v62  ;;  %v706_v11 = vsel %vm4383_vm5, %v627_v60, %v705_v2  ;;  %v711_v14 = vld [vmem:[#allocation2 + $0x1c] sm:$0x1]  ;;  %v1368_v17 = vrot.slane %v1366_v63, 4  ;;  %v1371_v18 = vrot.slane %v1369_v0, 5 }
  0x73   : > { %1001 = vst [vmem:[#allocation2 + $0xa0] sm:$0xf] %v1000_v58  ;;  %v4606_v21 = vld [vmem:[#allocation2 + $0xac] sm:$0x1]  ;;  %v712_v7 = vsel %vm4383_vm5, %v635_v61, %v711_v14  ;;  %v990_v27 = vld [vmem:[#allocation2 + $0x94] sm:$0x1]  ;;  %v1358_v3 = vor.u32 %v1357_v9, %v1354_v5 }
  0x74   : > { %707 = vst [vmem:[#allocation2 + $0x14] sm:$0x1] %v706_v11  ;;  %v3871_v60 = vld [vmem:[%s5015_s4 + $0x1e8] sm:$0xff]  ;;  %v3884_v31 = vld [vmem:[%s5015_s4 + $0x230] sm:$0xff]  ;;  %v991_v6 = vsel %vm4383_vm5, %v914_v29, %v990_v27  ;;  %v996_v61 = vld [vmem:[#allocation2 + $0x9c] sm:$0x1]  ;;  %v1372_v39 = vor.u32 %v1371_v18, %v1368_v17 }
  0x75   : > { %713 = vst [vmem:[#allocation2 + $0x1c] sm:$0x1] %v712_v7  ;;  %v1232_v41 = vshll.u32 %v4580_v40, 16  ;;  %v997_v45 = vsel %vm4383_vm5, %v922_v52, %v996_v61  ;;  %2682 = vmatpush.bf16.msra.mxu3 %v3871_v60  ;;  %2815 = vmatpush.bf16.msra.mxu0 %v3884_v31  ;;  %v3870_v29 = vld [vmem:[%s5015_s4 + $0x1e0] sm:$0xff]  ;;  %v3883_v47 = vld [vmem:[%s5015_s4 + $0x228] sm:$0xff]  ;;  %v1243_v34 = vshrl.u32 %v1163_v1, 16 }
  0x76   : > { %992 = vst [vmem:[#allocation2 + $0x94] sm:$0x1] %v991_v6  ;;  %v1246_v46 = vshll.u32 %v1163_v1, 16  ;;  %v3814_v48 = vld [vmem:[#allocation3 + $0x60] sm:$0xff]  ;;  %v930_v38 = vrot.slane %v4547_v12, 4  ;;  %v938_v49 = vrot.slane %v4572_v33, 4 }
  0x77   : > { %998 = vst [vmem:[#allocation2 + $0x9c] sm:$0x1] %v997_v45  ;;  %v841_v52 = vsel %vm4383_vm5, 0, %v4598_v10  ;;  %v1359_v42 = vrot.slane %v1358_v3, 4  ;;  %v4647_v50 = vrot.slane %v1229_v44, 4  ;;  %v845_v51 = vsel %vm4383_vm5, 0, %v4606_v21  ;;  %2152 = vmatmul.bf16.vlgmr.msrb.gmra.mxu3 %v3814_v48 }
  0x78   : > { %1007 = vst [vmem:[#allocation2 + $0xa8] sm:$0xf] %v1006_v20  ;;  %v940_v53 = vshrl.u32 %v4618_v36, 16  ;;  %v1373_v57 = vrot.slane %v1372_v39, 4  ;;  %v4653_v58 = vrot.slane %v1232_v41, 5  ;;  %v948_v62 = vshrl.u32 %v4628_v43, 16 }
  0x79   : > { %v3826_v4 = vld [vmem:[#allocation3 + $0x80] sm:$0xff]  ;;  %1114 = vst [vmem:[#allocation2 + $0xe8] sm:$0xf] %v1106_v28  ;;  %2683 = vmatpush.bf16.msra.mxu3 %v3870_v29  ;;  %2816 = vmatpush.bf16.msra.mxu0 %v3883_v47  ;;  %v4656_v40 = vrot.slane %v1243_v34, 4  ;;  %v4658_v44 = vrot.slane %v1246_v46, 5  ;;  %v943_v2 = vshll.u32 %v4618_v36, 16 }
  0x7a   : > { %v1303_v63 = vld [vmem:[#allocation2 + $0xa0] sm:$0xf]  ;;  %1115 = vst [vmem:[#allocation2 + $0xf0] sm:$0xf] %v1107_v19  ;;  %2286 = vmatmul.bf16.vlgmr.msrb.gmra.mxu0 %v3826_v4  ;;  %v951_v5 = vshll.u32 %v4628_v43, 16  ;;  %v1077_v9 = vld [vmem:[%s4442_s16 + $0x28] sm:$0xff] }
  0x7b   : > { %v1076_v0 = vld [vmem:[%s4442_s16 + $0x20] sm:$0xff]  ;;  %v1158_v1 = vld [vmem:[#allocation2 + $0x14] sm:$0x1]  ;;  %1312 = vst [vmem:[#allocation3 + $0x68] sm:$0xf] %v1303_v63  ;;  %v4668_v14 = vrot.slane %v940_v53, 7 }
  0x7c   : > { %v1160_v10 = vld [vmem:[#allocation2 + $0x1c] sm:$0x1]  ;;  %v1210_v11 = vshll.u32 %v1158_v1, 16  ;;  %549 = vst [vmem:[#allocation2 + $0x24] sm:$0x1] %v548_v15  ;;  %v4674_v20 = vrot.slane %v948_v62, 7 }
  0x7d   : > { %v1224_v17 = vshll.u32 %v1160_v10, 16  ;;  %v1336_v18 = vld [vmem:[#allocation2 + $0x94] sm:$0x1]  ;;  %553 = vst [vmem:[#allocation2 + $0x2c] sm:$0x1] %v552_v23  ;;  %v3897_v36 = vld [vmem:[%s5018_s7 + $0x38] sm:$0xff] }
  0x7e   : > { %v1212_v21 = vrot.slane %v1210_v11, 5  ;;  %v1338_v7 = vld [vmem:[#allocation2 + $0x9c] sm:$0x1]  ;;  %v1361_v27 = vshll.u32 %v1336_v18, 16  ;;  %842 = vst [vmem:[#allocation2 + $0xa4] sm:$0x1] %v841_v52  ;;  %2986 = vmatpush.bf16.msra.mxu1 %v3897_v36  ;;  %v953_v22 = vor.u32 %v951_v5, %v4674_v20 }
  0x7f   : > { %v1226_v3 = vrot.slane %v1224_v17, 5  ;;  %v1375_v28 = vshll.u32 %v1338_v7, 16  ;;  %v1304_v60 = vld [vmem:[#allocation2 + $0xa8] sm:$0xf]  ;;  %846 = vst [vmem:[#allocation2 + $0xac] sm:$0x1] %v845_v51 }
  0x80   : > { %v4679_v24 = vld [vmem:[%s5016_s5] ss:$0 sm:$0xff]  ;;  %v1213_v25 = vsel %vm4432_vm8, %v4575_v37, %v1212_v21  ;;  %v1363_v23 = vrot.slane %v1361_v27, 5  ;;  %1313 = vst [vmem:[#allocation3 + $0x6c] sm:$0xf] %v1304_v60  ;;  %v3857_v37 = vld [vmem:[%s5015_s4 + $0x198] sm:$0xff] }
  0x81   : > { %v1084_v15 = vmul.f32 %v4679_v24, %v1076_v0  ;;  %v1320_v31 = vld [vmem:[#allocation2 + $0xe8] sm:$0xf]  ;;  %v1085_v6 = vmul.f32 %v4679_v24, %v1077_v9  ;;  %v1227_v61 = vsel %vm4432_vm8, %v4577_v13, %v1226_v3  ;;  %1295 = vst [vmem:[#allocation3 + $0x48] sm:$0xf] %v1213_v25  ;;  %v1377_v39 = vrot.slane %v1375_v28, 5  ;;  %2550 = vmatpush.bf16.msra.mxu2 %v3857_v37  ;;  %v3869_v17 = vld [vmem:[%s5015_s4 + $0x1d8] sm:$0xff] }
  0x82   : > { %v1321_v8 = vld [vmem:[#allocation2 + $0xf0] sm:$0xf]  ;;  %1296 = vst [vmem:[#allocation3 + $0x4c] sm:$0xf] %v1227_v61  ;;  %v1364_v41 = vsel %vm4432_vm8, %v1359_v42, %v1363_v23  ;;  %v1339_v43 = vld [vmem:[#allocation2 + $0xa0] sm:$0xf]  ;;  %v945_v42 = vor.u32 %v943_v2, %v4668_v14  ;;  %2684 = vmatpush.bf16.msra.mxu3 %v3869_v17 }
  0x83   : > { %v1341_v45 = vld [vmem:[#allocation2 + $0xa8] sm:$0xf]  ;;  %v1378_v19 = vsel %vm4432_vm8, %v1373_v57, %v1377_v39  ;;  %1472 = vst [vmem:[#allocation3 + $0xa0] sm:$0xf] %v1364_v41  ;;  %v717_v29 = vld [vmem:[#allocation2 + $0x24] sm:$0x1] }
  0x84   : > { %v1380_v13 = vshrl.u32 %v1339_v43, 16  ;;  %v1383_v47 = vshll.u32 %v1339_v43, 16  ;;  %v4702_v34 = vld [vmem:[%s5017_s6] ss:$0 sm:$0xff]  ;;  %1473 = vst [vmem:[#allocation3 + $0xa4] sm:$0xf] %v1378_v19  ;;  %v718_v48 = vsel %vm4383_vm5, %v643_v54, %v717_v29 }
  0x85   : > { %v1092_v46 = vadd.f32 %v4702_v34, %v1084_v15  ;;  %v723_v52 = vld [vmem:[#allocation2 + $0x2c] sm:$0x1]  ;;  %v1011_v51 = vld [vmem:[#allocation2 + $0xb0] sm:$0xf]  ;;  %v1093_v53 = vadd.f32 %v4702_v34, %v1085_v6  ;;  %1329 = vst [vmem:[#allocation3 + $0x88] sm:$0xf] %v1320_v31 }
  0x86   : > { %v724_v4 = vsel %vm4383_vm5, %v651_v55, %v723_v52  ;;  %v1002_v57 = vld [vmem:[#allocation2 + $0xa4] sm:$0x1]  ;;  %v1394_v62 = vshrl.u32 %v1341_v45, 16  ;;  %v1397_v63 = vshll.u32 %v1341_v45, 16  ;;  %1330 = vst [vmem:[#allocation3 + $0x8c] sm:$0xf] %v1321_v8  ;;  %v1235_v55 = vor.u32 %v4653_v58, %v4647_v50 }
  0x87   : > { %v1003_v54 = vsel %vm4383_vm5, %v930_v38, %v1002_v57  ;;  %v1008_v0 = vld [vmem:[#allocation2 + $0xac] sm:$0x1]  ;;  %v4720_v1 = vrot.slane %v1380_v13, 4  ;;  %v4722_v2 = vrot.slane %v1383_v47, 5  ;;  %719 = vst [vmem:[#allocation2 + $0x24] sm:$0x1] %v718_v48  ;;  %v1249_v38 = vor.u32 %v4658_v44, %v4656_v40 }
  0x88   : > { %v3815_v26 = vld [vmem:[#allocation3 + $0x68] sm:$0xff]  ;;  %v1009_v5 = vsel %vm4383_vm5, %v938_v49, %v1008_v0  ;;  %v1017_v9 = vld [vmem:[#allocation2 + $0xb8] sm:$0xf]  ;;  %v1100_v12 = vmax.f32 %v1092_v46, 0.0  ;;  %725 = vst [vmem:[#allocation2 + $0x2c] sm:$0x1] %v724_v4  ;;  %v1012_v10 = vsel %vm4270_vm2, %v945_v42, %v1011_v51 }
  0x89   : > { %v1101_v11 = vmax.f32 %v1093_v53, 0.0  ;;  %v3882_v33 = vld [vmem:[%s5015_s4 + $0x220] sm:$0xff]  ;;  %v3896_v49 = vld [vmem:[%s5018_s7 + $0x30] sm:$0xff]  ;;  %v3803_v50 = vld [vmem:[#allocation3 + $0x48] sm:$0xff]  ;;  %2157 = vmatmul.bf16.gmra.mxu3 %v3815_v26  ;;  %1004 = vst [vmem:[#allocation2 + $0xa4] sm:$0x1] %v1003_v54  ;;  %v1018_v44 = vsel %vm4270_vm2, %v953_v22, %v1017_v9  ;;  %v1386_v61 = vor.u32 %v4722_v2, %v4720_v1 }
  0x8a   : > { %v1396_v58 = vrot.slane %v1394_v62, 4  ;;  %v1399_v40 = vrot.slane %v1397_v63, 5  ;;  %v1108_v18 = vpack.c.bf16 %v1100_v12, %v1100_v12  ;;  %v3856_v21 = vld [vmem:[%s5015_s4 + $0x190] sm:$0xff]  ;;  %1010 = vst [vmem:[#allocation2 + $0xac] sm:$0x1] %v1009_v5  ;;  %2817 = vmatpush.bf16.msra.mxu0 %v3882_v33  ;;  %v3881_v3 = vld [vmem:[%s5015_s4 + $0x218] sm:$0xff]  ;;  %2023 = vmatmul.bf16.gmra.mxu2 %v3803_v50 }
  0x8b   : > { %v1109_v7 = vpack.c.bf16 %v1101_v11, %v1101_v11  ;;  %v3868_v27 = vld [vmem:[%s5015_s4 + $0x1d0] sm:$0xff]  ;;  %v3838_v60 = vld [vmem:[#allocation3 + $0xa0] sm:$0xff]  ;;  %v1236_v15 = vrot.slane %v1235_v55, 4  ;;  %1013 = vst [vmem:[#allocation2 + $0xb0] sm:$0xf] %v1012_v10  ;;  %2987 = vmatpush.bf16.msra.mxu1 %v3896_v49  ;;  %v1250_v23 = vrot.slane %v1249_v38, 4  ;;  %2551 = vmatpush.bf16.msra.mxu2 %v3856_v21 }
  0x8c   : > { %v555_v28 = vld [vmem:[#allocation2 + $0x34] sm:$0x1]  ;;  %v559_v25 = vld [vmem:[#allocation2 + $0x3c] sm:$0x1]  ;;  %1019 = vst [vmem:[#allocation2 + $0xb8] sm:$0xf] %v1018_v44  ;;  %2420 = vmatmul.bf16.vlgmr.msrb.gmra.mxu1 %v3838_v60  ;;  %v1400_v41 = vor.u32 %v1399_v40, %v1396_v58  ;;  %2685 = vmatpush.bf16.msra.mxu3 %v3868_v27 }
  0x8d   : > { %v556_v31 = vsel %vm4383_vm5, 0, %v555_v28  ;;  %v1165_v36 = vld [vmem:[#allocation2 + $0x30] sm:$0xf]  ;;  %v3827_v6 = vld [vmem:[#allocation3 + $0x88] sm:$0xff]  ;;  %1116 = vst [vmem:[#allocation2 + $0xf8] sm:$0xf] %v1108_v18 }
  0x8e   : > { %v560_v39 = vsel %vm4383_vm5, 0, %v559_v25  ;;  %v1167_v8 = vld [vmem:[#allocation2 + $0x38] sm:$0xf]  ;;  %v1162_v37 = vld [vmem:[#allocation2 + $0x24] sm:$0x1]  ;;  %2818 = vmatpush.bf16.msra.mxu0 %v3881_v3  ;;  %v1257_v43 = vshrl.u32 %v1165_v36, 16 }
  0x8f   : > { %1117 = vst [vmem:[#allocation2 + $0x100] sm:$0xf] %v1109_v7  ;;  %v873_v45 = vld [vmem:[%s4321_s22 + $0x30] sm:$0xff]  ;;  %2291 = vmatmul.bf16.gmra.mxu0 %v3827_v6  ;;  %v1164_v19 = vld [vmem:[#allocation2 + $0x2c] sm:$0x1]  ;;  %v1238_v29 = vshll.u32 %v1162_v37, 16 }
  0x90   : > { %557 = vst [vmem:[#allocation2 + $0x34] sm:$0x1] %v556_v31  ;;  %v1260_v13 = vshll.u32 %v1165_v36, 16  ;;  %v1252_v47 = vshll.u32 %v1164_v19, 16  ;;  %v1340_v46 = vld [vmem:[#allocation2 + $0xa4] sm:$0x1]  ;;  %v881_v54 = vmul.f32 %v4679_v24, %v873_v45 }
  0x91   : > { %561 = vst [vmem:[#allocation2 + $0x3c] sm:$0x1] %v560_v39  ;;  %v1271_v48 = vshrl.u32 %v1167_v8, 16  ;;  %v1240_v52 = vrot.slane %v1238_v29, 5  ;;  %v1342_v42 = vld [vmem:[#allocation2 + $0xac] sm:$0x1] }
  0x92   : > { %v1387_v51 = vrot.slane %v1386_v61, 4  ;;  %v1389_v53 = vshll.u32 %v1340_v46, 16  ;;  %v1274_v4 = vshll.u32 %v1167_v8, 16  ;;  %v1254_v57 = vrot.slane %v1252_v47, 5  ;;  %v1305_v22 = vld [vmem:[#allocation2 + $0xb0] sm:$0xf] }
  0x93   : > { %v1401_v62 = vrot.slane %v1400_v41, 4  ;;  %v1403_v63 = vshll.u32 %v1342_v42, 16  ;;  %v667_v0 = vrot.slane %v4361_v35, 4  ;;  %v1241_v1 = vsel %vm4432_vm8, %v1236_v15, %v1240_v52  ;;  %1314 = vst [vmem:[#allocation3 + $0x70] sm:$0xf] %v1305_v22  ;;  %v874_v17 = vld [vmem:[%s4321_s22 + $0x38] sm:$0xff] }
  0x94   : > { %v1391_v2 = vrot.slane %v1389_v53, 5  ;;  %v1259_v26 = vrot.slane %v1257_v43, 4  ;;  %v1255_v55 = vsel %vm4432_vm8, %v1250_v23, %v1254_v57  ;;  %1297 = vst [vmem:[#allocation3 + $0x50] sm:$0xf] %v1241_v1  ;;  %v1262_v9 = vrot.slane %v1260_v13, 5  ;;  %v1078_v45 = vld [vmem:[%s4442_s16 + $0x30] sm:$0xff] }
  0x95   : > { %v1405_v5 = vrot.slane %v1403_v63, 5  ;;  %v1273_v12 = vrot.slane %v1271_v48, 4  ;;  %1298 = vst [vmem:[#allocation3 + $0x54] sm:$0xf] %v1255_v55  ;;  %v1306_v10 = vld [vmem:[#allocation2 + $0xb8] sm:$0xf]  ;;  %v882_v58 = vmul.f32 %v4679_v24, %v874_v17  ;;  %v889_v40 = vadd.f32 %v4702_v34, %v881_v54 }
  0x96   : > { %v1392_v38 = vsel %vm4432_vm8, %v1387_v51, %v1391_v2  ;;  %v1276_v11 = vrot.slane %v1274_v4, 5  ;;  %v848_v35 = vld [vmem:[#allocation2 + $0xb4] sm:$0x1]  ;;  %v1322_v49 = vld [vmem:[#allocation2 + $0xf8] sm:$0xf]  ;;  %v946_v28 = vrot.slane %v4668_v14, 4  ;;  %v1263_v31 = vor.u32 %v1262_v9, %v1259_v26 }
  0x97   : > { %v1406_v33 = vsel %vm4432_vm8, %v1401_v62, %v1405_v5  ;;  %1474 = vst [vmem:[#allocation3 + $0xa8] sm:$0xf] %v1392_v38  ;;  %v729_v50 = vld [vmem:[#allocation2 + $0x34] sm:$0x1]  ;;  %v1323_v44 = vld [vmem:[#allocation2 + $0x100] sm:$0xf]  ;;  %v890_v3 = vadd.f32 %v4702_v34, %v882_v58  ;;  %v1086_v46 = vmul.f32 %v4679_v24, %v1078_v45 }
  0x98   : > { %1475 = vst [vmem:[#allocation3 + $0xac] sm:$0xf] %v1406_v33  ;;  %v735_v18 = vld [vmem:[#allocation2 + $0x3c] sm:$0x1]  ;;  %v730_v21 = vsel %vm4383_vm5, %v659_v16, %v729_v50  ;;  %v1343_v27 = vld [vmem:[#allocation2 + $0xb0] sm:$0xf]  ;;  %v1277_v36 = vor.u32 %v1276_v11, %v1273_v12 }
  0x99   : > { %1315 = vst [vmem:[#allocation3 + $0x74] sm:$0xf] %v1306_v10  ;;  %v852_v7 = vld [vmem:[#allocation2 + $0xbc] sm:$0x1]  ;;  %v736_v60 = vsel %vm4383_vm5, %v667_v0, %v735_v18  ;;  %v1345_v15 = vld [vmem:[#allocation2 + $0xb8] sm:$0xf]  ;;  %v1094_v54 = vadd.f32 %v4702_v34, %v1086_v46 }
  0x9a   : > { %1331 = vst [vmem:[#allocation3 + $0x90] sm:$0xf] %v1322_v49  ;;  %v954_v25 = vrot.slane %v4674_v20, 4  ;;  %v849_v30 = vsel %vm4383_vm5, 0, %v848_v35  ;;  %v897_v23 = vmax.f32 %v889_v40, 0.0  ;;  %v898_v16 = vmax.f32 %v890_v3, 0.0 }
  0x9b   : > { %1332 = vst [vmem:[#allocation3 + $0x94] sm:$0xf] %v1323_v44  ;;  %v853_v6 = vsel %vm4383_vm5, 0, %v852_v7  ;;  %v1408_v61 = vshrl.u32 %v1343_v27, 16  ;;  %v1411_v8 = vshll.u32 %v1343_v27, 16  ;;  %v1422_v37 = vshrl.u32 %v1345_v15, 16 }
  0x9c   : > { %731 = vst [vmem:[#allocation2 + $0x34] sm:$0x1] %v730_v21  ;;  %v3804_v39 = vld [vmem:[#allocation3 + $0x50] sm:$0xff]  ;;  %v905_v41 = vpack.c.bf16 %v897_v23, %v897_v23  ;;  %v906_v43 = vpack.c.bf16 %v898_v16, %v898_v16  ;;  %v1425_v19 = vshll.u32 %v1345_v15, 16  ;;  %v3895_v29 = vld [vmem:[%s5018_s7 + $0x28] sm:$0xff]  ;;  %v1079_v47 = vld [vmem:[%s4442_s16 + $0x38] sm:$0xff] }
  0x9d   : > { %737 = vst [vmem:[#allocation2 + $0x3c] sm:$0x1] %v736_v60  ;;  %v3855_v13 = vld [vmem:[%s5015_s4 + $0x188] sm:$0xff]  ;;  %2028 = vmatmul.bf16.gmra.mxu2 %v3804_v39  ;;  %v1087_v53 = vmul.f32 %v4679_v24, %v1079_v47  ;;  %v1264_v57 = vrot.slane %v1263_v31, 4  ;;  %v4797_v62 = vrot.slane %v1277_v36, 4  ;;  %2988 = vmatpush.bf16.msra.mxu1 %v3895_v29  ;;  %v3880_v1 = vld [vmem:[%s5015_s4 + $0x210] sm:$0xff] }
  0x9e   : > { %850 = vst [vmem:[#allocation2 + $0xb4] sm:$0x1] %v849_v30  ;;  %v956_v52 = vshrl.u32 %v905_v41, 16  ;;  %v959_v42 = vshll.u32 %v905_v41, 16  ;;  %v964_v51 = vshrl.u32 %v906_v43, 16  ;;  %2552 = vmatpush.bf16.msra.mxu2 %v3855_v13  ;;  %v967_v63 = vshll.u32 %v906_v43, 16  ;;  %2819 = vmatpush.bf16.msra.mxu0 %v3880_v1 }
  0x9f   : > { %v3839_v48 = vld [vmem:[#allocation3 + $0xa8] sm:$0xff]  ;;  %854 = vst [vmem:[#allocation2 + $0xbc] sm:$0x1] %v853_v6  ;;  %v1023_v22 = vld [vmem:[#allocation2 + $0xc0] sm:$0xf]  ;;  %v1410_v2 = vrot.slane %v1408_v61, 4  ;;  %v1095_v5 = vadd.f32 %v4702_v34, %v1087_v53 }
  0xa0   : > { %v3816_v4 = vld [vmem:[#allocation3 + $0x70] sm:$0xff]  ;;  %v3867_v0 = vld [vmem:[%s5015_s4 + $0x1c8] sm:$0xff]  ;;  %2425 = vmatmul.bf16.gmra.mxu1 %v3839_v48  ;;  %v4806_v26 = vrot.slane %v956_v52, 7  ;;  %v4808_v55 = vrot.slane %v964_v51, 7  ;;  %v3894_v9 = vld [vmem:[%s5018_s7 + $0x20] sm:$0xff]  ;;  %v1413_v10 = vrot.slane %v1411_v8, 5 }
  0xa1   : > { %v3854_v12 = vld [vmem:[%s5015_s4 + $0x180] sm:$0xff]  ;;  %2162 = vmatmul.bf16.gmra.mxu3 %v3816_v4  ;;  %v1424_v11 = vrot.slane %v1422_v37, 4  ;;  %v3879_v35 = vld [vmem:[%s5015_s4 + $0x208] sm:$0xff]  ;;  %v1427_v49 = vrot.slane %v1425_v19, 5  ;;  %v1102_v7 = vmax.f32 %v1094_v54, 0.0  ;;  %2989 = vmatpush.bf16.msra.mxu1 %v3894_v9  ;;  %v1103_v30 = vmax.f32 %v1095_v5, 0.0 }
  0xa2   : > { %v3828_v38 = vld [vmem:[#allocation3 + $0x90] sm:$0xff]  ;;  %v856_v17 = vld [vmem:[#allocation2 + $0xc4] sm:$0x1]  ;;  %v961_v50 = vor.u32 %v959_v42, %v4806_v26  ;;  %v1029_v58 = vld [vmem:[#allocation2 + $0xc8] sm:$0xf]  ;;  %2686 = vmatpush.bf16.msra.mxu3 %v3867_v0  ;;  %v969_v21 = vor.u32 %v967_v63, %v4808_v55  ;;  %2553 = vmatpush.bf16.msra.mxu2 %v3854_v12  ;;  %v1414_v36 = vor.u32 %v1413_v10, %v1410_v2  ;;  %v962_v8 = vrot.slane %v4806_v26, 4 }
  0xa3   : > { %v1166_v33 = vld [vmem:[#allocation2 + $0x34] sm:$0x1]  ;;  %v3866_v40 = vld [vmem:[%s5015_s4 + $0x1c0] sm:$0xff]  ;;  %2296 = vmatmul.bf16.gmra.mxu0 %v3828_v38  ;;  %v857_v27 = vsel %vm4383_vm5, 0, %v856_v17  ;;  %v1428_v39 = vor.u32 %v1427_v49, %v1424_v11  ;;  %v1110_v37 = vpack.c.bf16 %v1102_v7, %v1102_v7  ;;  %v860_v41 = vld [vmem:[#allocation2 + $0xcc] sm:$0x1] }
  0xa4   : > { %v1168_v44 = vld [vmem:[#allocation2 + $0x3c] sm:$0x1]  ;;  %v1266_v18 = vshll.u32 %v1166_v33, 16  ;;  %v1024_v15 = vsel %vm4270_vm2, %v961_v50, %v1023_v22  ;;  %858 = vst [vmem:[#allocation2 + $0xc4] sm:$0x1] %v857_v27  ;;  %2820 = vmatpush.bf16.msra.mxu0 %v3879_v35  ;;  %v1415_v29 = vrot.slane %v1414_v36, 4 }
  0xa5   : > { %v1280_v3 = vshll.u32 %v1168_v44, 16  ;;  %v1014_v60 = vld [vmem:[#allocation2 + $0xb4] sm:$0x1]  ;;  %1025 = vst [vmem:[#allocation2 + $0xc0] sm:$0xf] %v1024_v15  ;;  %v1429_v13 = vrot.slane %v1428_v39, 4 }
  0xa6   : > { %v1268_v23 = vrot.slane %v1266_v18, 5  ;;  %v1015_v16 = vsel %vm4383_vm5, %v946_v28, %v1014_v60  ;;  %v1020_v31 = vld [vmem:[#allocation2 + $0xbc] sm:$0x1]  ;;  %2687 = vmatpush.bf16.msra.mxu3 %v3866_v40  ;;  %v1030_v28 = vsel %vm4270_vm2, %v969_v21, %v1029_v58  ;;  %v1514_v43 = vld [vmem:[#allocation2 + $0x8] sm:$0xf]  ;;  %v861_v47 = vsel %vm4383_vm5, 0, %v860_v41 }
  0xa7   : > { %v1282_v6 = vrot.slane %v1280_v3, 5  ;;  %1016 = vst [vmem:[#allocation2 + $0xb4] sm:$0x1] %v1015_v16  ;;  %v1021_v61 = vsel %vm4383_vm5, %v954_v25, %v1020_v31  ;;  %v1111_v25 = vpack.c.bf16 %v1103_v30, %v1103_v30  ;;  %v1515_v45 = vld [vmem:[#allocation2 + $0xc] sm:$0x1]  ;;  %v1531_v46 = vshrl.u32 %v1514_v43, 16 }
  0xa8   : > { %v1269_v14 = vsel %vm4432_vm8, %v1264_v57, %v1268_v23  ;;  %1022 = vst [vmem:[#allocation2 + $0xbc] sm:$0x1] %v1021_v61  ;;  %v4845_v19 = vld [vmem:[#allocation2 + $0x10] sm:$0xf]  ;;  %v1534_v48 = vshll.u32 %v1514_v43, 16  ;;  %v1540_v51 = vshll.u32 %v1515_v45, 16 }
  0xa9   : > { %v1283_v20 = vsel %vm4432_vm8, %v4797_v62, %v1282_v6  ;;  %1299 = vst [vmem:[#allocation3 + $0x58] sm:$0xf] %v1269_v14  ;;  %v1480_v42 = vld [vmem:[#allocation2 + $0x8] sm:$0xf]  ;;  %v1545_v53 = vshrl.u32 %v4845_v19, 16  ;;  %v3893_v2 = vld [vmem:[%s5018_s7 + $0x18] sm:$0xff] }
  0xaa   : > { %1300 = vst [vmem:[#allocation3 + $0x5c] sm:$0xf] %v1283_v20  ;;  %v3878_v12 = vld [vmem:[%s5015_s4 + $0x200] sm:$0xff]  ;;  %2990 = vmatpush.bf16.msra.mxu1 %v3893_v2  ;;  %v1517_v11 = vld [vmem:[#allocation2 + $0x14] sm:$0x1]  ;;  %v1533_v35 = vrot.slane %v1531_v46, 4 }
  0xab   : > { %1031 = vst [vmem:[#allocation2 + $0xc8] sm:$0xf] %v1030_v28  ;;  %v1026_v52 = vld [vmem:[#allocation2 + $0xc4] sm:$0x1]  ;;  %v1536_v17 = vrot.slane %v1534_v48, 5  ;;  %v970_v49 = vrot.slane %v4808_v55, 4  ;;  %2821 = vmatpush.bf16.msra.mxu0 %v3878_v12 }
  0xac   : > { %1118 = vst [vmem:[#allocation2 + $0x108] sm:$0xf] %v1110_v37  ;;  %v1307_v4 = vld [vmem:[#allocation2 + $0xc0] sm:$0xf]  ;;  %v1027_v57 = vsel %vm4383_vm5, %v962_v8, %v1026_v52  ;;  %v1481_v15 = vld [vmem:[#allocation2 + $0x10] sm:$0xf] }
  0xad   : > { %1119 = vst [vmem:[#allocation2 + $0x110] sm:$0xf] %v1111_v25  ;;  %v1347_v62 = vld [vmem:[#allocation2 + $0xc0] sm:$0xf]  ;;  %v1537_v7 = vor.u32 %v1536_v17, %v1533_v35  ;;  %v1542_v55 = vrot.slane %v1540_v51, 5  ;;  %v1547_v30 = vrot.slane %v1545_v53, 4 }
  0xae   : > { %v1344_v63 = vld [vmem:[#allocation2 + $0xb4] sm:$0x1]  ;;  %1316 = vst [vmem:[#allocation3 + $0x78] sm:$0xf] %v1307_v4  ;;  %v1436_v22 = vshrl.u32 %v1347_v62, 16  ;;  %v1439_v54 = vshll.u32 %v1347_v62, 16 }
  0xaf   : > { %v1346_v0 = vld [vmem:[#allocation2 + $0xbc] sm:$0x1]  ;;  %v1417_v1 = vshll.u32 %v1344_v63, 16  ;;  %862 = vst [vmem:[#allocation2 + $0xcc] sm:$0x1] %v861_v47  ;;  %v1538_v36 = vrot.slane %v1537_v7, 4 }
  0xb0   : > { %v1431_v26 = vshll.u32 %v1346_v0, 16  ;;  %1028 = vst [vmem:[#allocation2 + $0xc4] sm:$0x1] %v1027_v57  ;;  %v1438_v5 = vrot.slane %v1436_v22, 4  ;;  %v1441_v9 = vrot.slane %v1439_v54, 5  ;;  %v1548_v6 = vshll.u32 %v4845_v19, 16 }
  0xb1   : > { %v3805_v38 = vld [vmem:[#allocation3 + $0x58] sm:$0xff]  ;;  %v1419_v10 = vrot.slane %v1417_v1, 5  ;;  %1489 = vst [vmem:[#allocation3 + $0xc0] sm:$0xf] %v1480_v42  ;;  %v1497_v31 = vld [vmem:[#allocation2 + $0x50] sm:$0xf]  ;;  %v1543_v19 = vsel %vm4432_vm8, %v1538_v36, %v1542_v55 }
  0xb2   : > { %v1433_v33 = vrot.slane %v1431_v26, 5  ;;  %v1308_v50 = vld [vmem:[#allocation2 + $0xc8] sm:$0xf]  ;;  %2033 = vmatmul.bf16.gmra.mxu2 %v3805_v38  ;;  %v1442_v60 = vor.u32 %v1441_v9, %v1438_v5  ;;  %v1498_v39 = vld [vmem:[#allocation2 + $0x58] sm:$0xf]  ;;  %v1554_v8 = vshll.u32 %v1517_v11, 16 }
  0xb3   : > { %v1349_v58 = vld [vmem:[#allocation2 + $0xc8] sm:$0xf]  ;;  %v1420_v40 = vsel %vm4432_vm8, %v1415_v29, %v1419_v10  ;;  %1317 = vst [vmem:[#allocation3 + $0x7c] sm:$0xf] %v1308_v50  ;;  %v3892_v14 = vld [vmem:[%s5018_s7 + $0x10] sm:$0xff]  ;;  %v1550_v43 = vrot.slane %v1548_v6, 5 }
  0xb4   : > { %v1324_v44 = vld [vmem:[#allocation2 + $0x108] sm:$0xf]  ;;  %v1450_v18 = vshrl.u32 %v1349_v58, 16  ;;  %v1453_v21 = vshll.u32 %v1349_v58, 16  ;;  %v1434_v27 = vsel %vm4432_vm8, %v1429_v13, %v1433_v33  ;;  %1476 = vst [vmem:[#allocation3 + $0xb0] sm:$0xf] %v1420_v40  ;;  %2991 = vmatpush.bf16.msra.mxu1 %v3892_v14 }
  0xb5   : > { %v1325_v3 = vld [vmem:[#allocation2 + $0x110] sm:$0xf]  ;;  %1477 = vst [vmem:[#allocation3 + $0xb4] sm:$0xf] %v1434_v27  ;;  %v1443_v20 = vrot.slane %v1442_v60, 4  ;;  %v3891_v45 = vld [vmem:[%s5018_s7 + $0x8] sm:$0xff]  ;;  %v1551_v29 = vor.u32 %v1550_v43, %v1547_v30 }
  0xb6   : > { %v1452_v23 = vrot.slane %v1450_v18, 4  ;;  %v1455_v16 = vrot.slane %v1453_v21, 5  ;;  %1333 = vst [vmem:[#allocation3 + $0x98] sm:$0xf] %v1324_v44  ;;  %v1032_v61 = vld [vmem:[#allocation2 + $0xcc] sm:$0x1] }
  0xb7   : > { %1334 = vst [vmem:[#allocation3 + $0x9c] sm:$0xf] %v1325_v3  ;;  %v1033_v28 = vsel %vm4383_vm5, %v970_v49, %v1032_v61  ;;  %v1348_v37 = vld [vmem:[#allocation2 + $0xc4] sm:$0x1]  ;;  %v1556_v13 = vrot.slane %v1554_v8, 5  ;;  %v1552_v42 = vrot.slane %v1551_v29, 4 }
  0xb8   : > { %v1456_v41 = vor.u32 %v1455_v16, %v1452_v23  ;;  %1034 = vst [vmem:[#allocation2 + $0xcc] sm:$0x1] %v1033_v28  ;;  %v1445_v25 = vshll.u32 %v1348_v37, 16  ;;  %v1482_v52 = vld [vmem:[#allocation2 + $0x18] sm:$0xf]  ;;  %v3890_v53 = vld [vmem:[%s5018_s7] sm:$0xff]  ;;  %2992 = vmatpush.bf16.msra.mxu1 %v3891_v45 }
  0xb9   : > { %1490 = vst [vmem:[#allocation3 + $0xc4] sm:$0xf] %v1481_v15  ;;  %v1483_v51 = vld [vmem:[#allocation2 + $0x20] sm:$0xf]  ;;  %v1518_v63 = vld [vmem:[#allocation2 + $0x18] sm:$0xf]  ;;  %v1557_v54 = vsel %vm4432_vm8, %v1552_v42, %v1556_v13 }
  0xba   : > { %v3817_v47 = vld [vmem:[#allocation3 + $0x78] sm:$0xff]  ;;  %v1447_v46 = vrot.slane %v1445_v25, 5  ;;  %v1457_v48 = vrot.slane %v1456_v41, 4  ;;  %1506 = vst [vmem:[#allocation3 + $0xe0] sm:$0xf] %v1497_v31  ;;  %v1559_v9 = vshrl.u32 %v1518_v63, 16 }
  0xbb   : > { %1507 = vst [vmem:[#allocation3 + $0xe4] sm:$0xf] %v1498_v39  ;;  %2167 = vmatmul.bf16.gmra.mxu3 %v3817_v47  ;;  %v1499_v62 = vld [vmem:[#allocation2 + $0x60] sm:$0xf]  ;;  %v573_v22 = vld [vmem:[%s4128_s14 + $0x38] sm:$0xff]  ;;  %v1562_v38 = vshll.u32 %v1518_v63, 16 }
  0xbc   : > { %v3840_v4 = vld [vmem:[#allocation3 + $0xb0] sm:$0xff]  ;;  %v1448_v57 = vsel %vm4432_vm8, %v1443_v20, %v1447_v46  ;;  %1651 = vst [vmem:[#allocation3 + $0x100] sm:$0xf] %v1543_v19  ;;  %v1500_v0 = vld [vmem:[#allocation2 + $0x68] sm:$0xf]  ;;  %2993 = vmatpush.bf16.msra.mxu1 %v3890_v53  ;;  %v1561_v17 = vrot.slane %v1559_v9, 4  ;;  %v584_v49 = vmul.f32 %v4679_v24, %v573_v22  ;;  %v1802_v20 = vpop.f32.mrf.mxu2 }
  0xbd   : > { %1478 = vst [vmem:[#allocation3 + $0xb8] sm:$0xf] %v1448_v57  ;;  %v1519_v1 = vld [vmem:[#allocation2 + $0x1c] sm:$0x1]  ;;  %v1520_v2 = vld [vmem:[#allocation2 + $0x20] sm:$0xf]  ;;  %2430 = vmatmul.bf16.gmra.mxu1 %v3840_v4 }
  0xbe   : > { %v3829_v26 = vld [vmem:[#allocation3 + $0x98] sm:$0xff]  ;;  %1652 = vst [vmem:[#allocation3 + $0x104] sm:$0xf] %v1557_v54  ;;  %v1521_v5 = vld [vmem:[#allocation2 + $0x24] sm:$0x1]  ;;  %v1568_v10 = vshll.u32 %v1519_v1, 16  ;;  %v595_v31 = vadd.f32 %v4702_v34, %v584_v49 }
  0xbf   : > { %v1350_v12 = vld [vmem:[#allocation2 + $0xcc] sm:$0x1]  ;;  %1491 = vst [vmem:[#allocation3 + $0xc8] sm:$0xf] %v1482_v52  ;;  %2301 = vmatmul.bf16.gmra.mxu0 %v3829_v26  ;;  %v1573_v33 = vshrl.u32 %v1520_v2, 16  ;;  %v1564_v50 = vrot.slane %v1562_v38, 5 }
  0xc0   : > { %v1459_v11 = vshll.u32 %v1350_v12, 16  ;;  %v3850_v35 = vld [vmem:[#allocation3 + $0xc0] sm:$0xff]  ;;  %1492 = vst [vmem:[#allocation3 + $0xcc] sm:$0xf] %v1483_v51  ;;  %v1576_v58 = vshll.u32 %v1520_v2, 16  ;;  %v1582_v40 = vshll.u32 %v1521_v5, 16  ;;  %v1792_v55 = vpop.f32.mrf.mxu0 }
  0xc1   : > { %1508 = vst [vmem:[#allocation3 + $0xe8] sm:$0xf] %v1499_v62  ;;  %v1575_v18 = vrot.slane %v1573_v33, 4  ;;  %v1565_v21 = vor.u32 %v1564_v50, %v1561_v17  ;;  %v1570_v7 = vrot.slane %v1568_v10, 5  ;;  %v1484_v3 = vld [vmem:[#allocation2 + $0x28] sm:$0xf] }
  0xc2   : > { %v1461_v44 = vrot.slane %v1459_v11, 5  ;;  %1509 = vst [vmem:[#allocation3 + $0xec] sm:$0xf] %v1500_v0  ;;  %2554 = vmatmul.bf16.vlgmr.msra.gmra.mxu2 %v3850_v35  ;;  %v1578_v27 = vrot.slane %v1576_v58, 5  ;;  %v1485_v60 = vld [vmem:[#allocation2 + $0x30] sm:$0xf] }
  0xc3   : > { %1493 = vst [vmem:[#allocation3 + $0xd0] sm:$0xf] %v1484_v3  ;;  %v1893_v30 = vpop.f32.mrf.mxu1  ;;  %v1501_v23 = vld [vmem:[#allocation2 + $0x70] sm:$0xf]  ;;  %v1502_v16 = vld [vmem:[#allocation2 + $0x78] sm:$0xf] }
  0xc4   : > { %v1462_v15 = vsel %vm4432_vm8, %v1457_v48, %v1461_v44  ;;  %v1566_v36 = vrot.slane %v1565_v21, 4  ;;  %v1579_v6 = vor.u32 %v1578_v27, %v1575_v18  ;;  %v1584_v61 = vrot.slane %v1582_v40, 5  ;;  %v1522_v8 = vld [vmem:[#allocation2 + $0x28] sm:$0xf]  ;;  %1494 = vst [vmem:[#allocation3 + $0xd4] sm:$0xf] %v1485_v60 }
  0xc5   : > { %1479 = vst [vmem:[#allocation3 + $0xbc] sm:$0xf] %v1462_v15  ;;  %v4886_v39 = vadd.f32 %v1893_v30, %v1792_v55  ;;  %v1523_v14 = vld [vmem:[#allocation2 + $0x2c] sm:$0x1]  ;;  %v1524_v28 = vld [vmem:[#allocation2 + $0x30] sm:$0xf] }
  0xc6   : > { %v3862_v37 = vld [vmem:[#allocation3 + $0xe0] sm:$0xff]  ;;  %v1571_v41 = vsel %vm4432_vm8, %v1566_v36, %v1570_v7  ;;  %v1580_v43 = vrot.slane %v1579_v6, 4  ;;  %1510 = vst [vmem:[#allocation3 + $0xf0] sm:$0xf] %v1501_v23  ;;  %v1525_v25 = vld [vmem:[#allocation2 + $0x34] sm:$0x1] }
  0xc7   : > { %1653 = vst [vmem:[#allocation3 + $0x108] sm:$0xf] %v1571_v41  ;;  %v1587_v45 = vshrl.u32 %v1522_v8, 16  ;;  %v1590_v19 = vshll.u32 %v1522_v8, 16  ;;  %v1596_v29 = vshll.u32 %v1523_v14, 16  ;;  %v1601_v13 = vshrl.u32 %v1524_v28, 16 }
  0xc8   : > { %v1585_v47 = vsel %vm4432_vm8, %v1580_v43, %v1584_v61  ;;  %1511 = vst [vmem:[#allocation3 + $0xf4] sm:$0xf] %v1502_v16  ;;  %v1604_v46 = vshll.u32 %v1524_v28, 16  ;;  %v1610_v48 = vshll.u32 %v1525_v25, 16  ;;  %v603_v52 = vmax.f32 %v595_v31, 0.0  ;;  %v788_v62 = vld [vmem:[%s4099_s21 + $0x38] sm:$0xff]  ;;  %v1794_v50 = vpop.f32.mrf.mxu0 }
  0xc9   : > { %1654 = vst [vmem:[#allocation3 + $0x10c] sm:$0xf] %v1585_v47  ;;  %v1589_v42 = vrot.slane %v1587_v45, 4  ;;  %v1592_v51 = vrot.slane %v1590_v19, 5  ;;  %v1603_v53 = vrot.slane %v1601_v13, 4  ;;  %v3874_v22 = vld [vmem:[#allocation3 + $0x100] sm:$0xff]  ;;  %v796_v2 = vmul.f32 %v4679_v24, %v788_v62 }
  0xca   : > { %v1606_v4 = vrot.slane %v1604_v46, 5  ;;  %v611_v57 = vpack.c.bf16 %v603_v52, %v603_v52  ;;  %v1598_v0 = vrot.slane %v1596_v29, 5  ;;  %v1612_v1 = vrot.slane %v1610_v48, 5  ;;  %v563_v26 = vld [vmem:[#allocation2 + $0x44] sm:$0x1]  ;;  %v3851_v35 = vld [vmem:[#allocation3 + $0xc8] sm:$0xff] }
  0xcb   : > { %2688 = vmatmul.bf16.vlgmr.msra.gmra.mxu3 %v3862_v37  ;;  %v1593_v54 = vor.u32 %v1592_v51, %v1589_v42  ;;  %v564_v38 = vsel %vm4383_vm5, 0, %v563_v26  ;;  %v804_v11 = vadd.f32 %v4702_v34, %v796_v2  ;;  %v1903_v24 = vpop.f32.mrf.mxu3  ;;  %v738_v58 = vld [vmem:[#allocation2 + $0x40] sm:$0xf]  ;;  %v1486_v40 = vld [vmem:[#allocation2 + $0x38] sm:$0xf]  ;;  %v1804_v34 = vpop.f32.mrf.mxu2  ;;  %v3863_v41 = vld [vmem:[#allocation3 + $0xe8] sm:$0xff] }
  0xcc   : > { %v3841_v63 = vld [vmem:[#allocation3 + $0xb8] sm:$0xff]  ;;  %v1607_v5 = vor.u32 %v1606_v4, %v1603_v53  ;;  %v669_v9 = vshrl.u32 %v611_v57, 16  ;;  %v672_v12 = vshll.u32 %v611_v57, 16  ;;  %565 = vst [vmem:[#allocation2 + $0x44] sm:$0x1] %v564_v38  ;;  %v4901_v21 = vadd.f32 %v1903_v24, %v1802_v20  ;;  %v1895_v7 = vpop.f32.mrf.mxu1  ;;  %v3886_v47 = vld [vmem:[#allocation3 + $0x80] sm:$0xff] }
  0xcd   : > { %2435 = vmatmul.bf16.gmra.mxu1 %v3841_v63  ;;  %v1594_v10 = vrot.slane %v1593_v54, 4  ;;  %v812_v44 = vmax.f32 %v804_v11, 0.0  ;;  %v1526_v60 = vld [vmem:[#allocation2 + $0x38] sm:$0xf]  ;;  %v4903_v15 = vadd.f32 %v1895_v7, %v1794_v50  ;;  %1495 = vst [vmem:[#allocation3 + $0xd8] sm:$0xf] %v1486_v40 }
  0xce   : > { %v1608_v17 = vrot.slane %v1607_v5, 4  ;;  %v671_v33 = vrot.slane %v669_v9, 7  ;;  %v1615_v30 = vshrl.u32 %v1526_v60, 16  ;;  %v1618_v23 = vshll.u32 %v1526_v60, 16  ;;  %v1503_v31 = vld [vmem:[#allocation2 + $0x80] sm:$0xf] }
  0xcf   : > { %2822 = vmatmul.bf16.vlgmr.msra.gmra.mxu0 %v3874_v22  ;;  %v1599_v49 = vsel %vm4432_vm8, %v1594_v10, %v1598_v0  ;;  %v820_v55 = vpack.c.bf16 %v812_v44, %v812_v44  ;;  %v1527_v8 = vld [vmem:[#allocation2 + $0x3c] sm:$0x1]  ;;  %1512 = vst [vmem:[#allocation3 + $0xf8] sm:$0xf] %v1503_v31  ;;  %v3852_v63 = vld [vmem:[#allocation3 + $0xd0] sm:$0xff]  ;;  %s3776_s21 = sshll.u32 %s5034_s17, 5 }
  0xd0   : > { %v1613_v18 = vsel %vm4432_vm8, %v1608_v17, %v1612_v1  ;;  %1655 = vst [vmem:[#allocation3 + $0x110] sm:$0xf] %v1599_v49  ;;  %v674_v27 = vor.u32 %v672_v12, %v671_v33  ;;  %v675_v3 = vrot.slane %v671_v33, 4  ;;  %v1617_v36 = vrot.slane %v1615_v30, 4  ;;  %v1797_v20 = vpop.f32.mrf.mxu0  ;;  %v3875_v13 = vld [vmem:[#allocation3 + $0x108] sm:$0xff]  ;;  %v3864_v11 = vld [vmem:[#allocation3 + $0xf0] sm:$0xff]  ;;  %s4963_s13 = scalar_lea.vmem %s5019_s8, %s3776_s21 }
  0xd1   : > { %1656 = vst [vmem:[#allocation3 + $0x114] sm:$0xf] %v1613_v18  ;;  %v1620_v6 = vrot.slane %v1618_v23, 5  ;;  %v1624_v37 = vshll.u32 %v1527_v8, 16  ;;  %v3887_v33 = vld [vmem:[#allocation3 + $0x88] sm:$0xff]  ;;  %v3888_v44 = vld [vmem:[#allocation3 + $0x90] sm:$0xff] }
  0xd2   : > { %2559 = vmatmul.bf16.gmra.mxu2 %v3851_v35  ;;  %v739_v16 = vsel %vm4270_vm2, %v674_v27, %v738_v58  ;;  %829 = vst [vmem:[#allocation2 + $0x88] sm:$0xf] %v820_v55  ;;  %v3889_v30 = vld [vmem:[#allocation3 + $0x98] sm:$0xff] }
  0xd3   : > { %740 = vst [vmem:[#allocation2 + $0x40] sm:$0xf] %v739_v16  ;;  %v741_v61 = vld [vmem:[#allocation2 + $0x44] sm:$0x1]  ;;  %v1621_v28 = vor.u32 %v1620_v6, %v1617_v36  ;;  %v1905_v43 = vpop.f32.mrf.mxu3  ;;  %v1626_v25 = vrot.slane %v1624_v37, 5  ;;  %v1807_v19 = vpop.f32.mrf.mxu2 }
  0xd4   : > { %v742_v14 = vsel %vm4383_vm5, %v675_v3, %v741_v61  ;;  %v4909_v45 = vadd.f32 %v1905_v43, %v1804_v34  ;;  %v1898_v29 = vpop.f32.mrf.mxu1 }
  0xd5   : > { %743 = vst [vmem:[#allocation2 + $0x44] sm:$0x1] %v742_v14  ;;  %v1622_v32 = vrot.slane %v1621_v28, 4  ;;  %v1899_v46 = vadd.f32 %v1898_v29, %v1797_v20 }
  0xd7   : > { %v1627_v48 = vsel %vm4432_vm8, %v1622_v32, %v1626_v25 }
  0xd8   : > { %1657 = vst [vmem:[#allocation3 + $0x118] sm:$0xf] %v1627_v48  ;;  %v1799_v1 = vpop.f32.mrf.mxu0  ;;  %v3876_v49 = vld [vmem:[#allocation3 + $0x110] sm:$0xff] }
  0xd9   : > { %v1504_v42 = vld [vmem:[#allocation2 + $0x88] sm:$0xf] }
  0xda   : > { %v1487_v59 = vld [vmem:[#allocation2 + $0x40] sm:$0xf]  ;;  %1513 = vst [vmem:[#allocation3 + $0xfc] sm:$0xf] %v1504_v42 }
  0xdb   : > { %v1528_v52 = vld [vmem:[#allocation2 + $0x40] sm:$0xf]  ;;  %2693 = vmatmul.bf16.gmra.mxu3 %v3863_v41  ;;  %1496 = vst [vmem:[#allocation3 + $0xdc] sm:$0xf] %v1487_v59  ;;  %v1908_v0 = vpop.f32.mrf.mxu3  ;;  %v1809_v38 = vpop.f32.mrf.mxu2 }
  0xdc   : > { %v1629_v51 = vshrl.u32 %v1528_v52, 16  ;;  %v1632_v53 = vshll.u32 %v1528_v52, 16  ;;  %v1529_v4 = vld [vmem:[#allocation2 + $0x44] sm:$0x1]  ;;  %v4913_v26 = vadd.f32 %v1908_v0, %v1807_v19  ;;  %v1900_v5 = vpop.f32.mrf.mxu1 }
  0xdd   : > { %2994 = vmatmul.bf16.vlgmr.msra.gmra.mxu1 %v3886_v47  ;;  %v1638_v22 = vshll.u32 %v1529_v4, 16  ;;  %v4915_v12 = vadd.f32 %v1900_v5, %v1799_v1 }
  0xde   : > { %v1631_v57 = vrot.slane %v1629_v51, 4  ;;  %v1634_v62 = vrot.slane %v1632_v53, 5 }
  0xdf   : > { %2827 = vmatmul.bf16.gmra.mxu0 %v3875_v13  ;;  %v1640_v2 = vrot.slane %v1638_v22, 5 }
  0xe0   : > { %v1635_v54 = vor.u32 %v1634_v62, %v1631_v57 }
  0xe1   : > { %v3865_v40 = vld [vmem:[#allocation3 + $0xf8] sm:$0xff] }
  0xe2   : > { %v1636_v9 = vrot.slane %v1635_v54, 4  ;;  %2564 = vmatmul.bf16.gmra.mxu2 %v3852_v63  ;;  %v3853_v58 = vld [vmem:[#allocation3 + $0xd8] sm:$0xff] }
  0xe3   : > { %v1910_v35 = vpop.f32.mrf.mxu3 }
  0xe4   : > { %v1641_v10 = vsel %vm4432_vm8, %v1636_v9, %v1640_v2  ;;  %v4919_v17 = vadd.f32 %v1910_v35, %v1809_v38 }
  0xe5   : > { %1658 = vst [vmem:[#allocation3 + $0x11c] sm:$0xf] %v1641_v10 }
  0xeb   : > { %2698 = vmatmul.bf16.gmra.mxu3 %v3864_v11  ;;  %v2019_v24 = vpop.f32.mrf.mxu2 }
  0xec   : > { %v2039_v50 = vadd.f32 %v2019_v24, %v4886_v39  ;;  %v3877_v56 = vld [vmem:[#allocation3 + $0x118] sm:$0xff] }
  0xed   : > { %2999 = vmatmul.bf16.gmra.mxu1 %v3887_v33 }
  0xef   : > { %2832 = vmatmul.bf16.gmra.mxu0 %v3876_v49 }
  0xf2   : > { %2569 = vmatmul.bf16.gmra.mxu2 %v3853_v58 }
  0xf3   : > { %v2021_v3 = vpop.f32.mrf.mxu2 }
  0xf4   : > { %v2040_v63 = vadd.f32 %v2021_v3, %v4903_v15 }
  0xf7   : > { %v2287_v7 = vpop.f32.mrf.mxu0 }
  0xfa   : > { %v2153_v18 = vpop.f32.mrf.mxu3 }
  0xfb   : > { %2703 = vmatmul.bf16.gmra.mxu3 %v3865_v40  ;;  %v2173_v34 = vadd.f32 %v2153_v18, %v2039_v50 }
  0xfd   : > { %3004 = vmatmul.bf16.gmra.mxu1 %v3888_v44  ;;  %v2307_v27 = vadd.f32 %v2287_v7, %v2173_v34 }
  0xff   : > { %2837 = vmatmul.bf16.gmra.mxu0 %v3877_v56  ;;  %v2289_v55 = vpop.f32.mrf.mxu0 }
 0x102   : > { %v2155_v60 = vpop.f32.mrf.mxu3 }
 0x103   : > { %v2174_v54 = vadd.f32 %v2155_v60, %v2040_v63 }
 0x105   : > { %v2308_v9 = vadd.f32 %v2289_v55, %v2174_v54 }
 0x109   : > { %v2421_v36 = vpop.f32.mrf.mxu1 }
 0x10a   : > { %v2441_v5 = vadd.f32 %v2421_v36, %v2307_v27 }
 0x10c   : > { %v2158_v39 = vpop.f32.mrf.mxu3  ;;  %v2292_v6 = vpop.f32.mrf.mxu0 }
 0x10d   : > { %3009 = vmatmul.bf16.gmra.mxu1 %v3889_v30  ;;  %v2024_v23 = vpop.f32.mrf.mxu2 }
 0x10e   : > { %v2041_v16 = vadd.f32 %v2024_v23, %v1899_v46 }
 0x110   : > { %v2175_v31 = vadd.f32 %v2158_v39, %v2041_v16 }
 0x111   : > { %v2423_v28 = vpop.f32.mrf.mxu1 }
 0x112   : > { %v2309_v61 = vadd.f32 %v2292_v6, %v2175_v31  ;;  %v2442_v11 = vadd.f32 %v2423_v28, %v2308_v9 }
 0x114   : > { %v2160_v14 = vpop.f32.mrf.mxu3  ;;  %v2294_v37 = vpop.f32.mrf.mxu0 }
 0x115   : > { %v2026_v8 = vpop.f32.mrf.mxu2 }
 0x116   : > { %v2042_v40 = vadd.f32 %v2026_v8, %v4915_v12 }
 0x118   : > { %v2176_v18 = vadd.f32 %v2160_v14, %v2042_v40 }
 0x11a   : > { %v2310_v16 = vadd.f32 %v2294_v37, %v2176_v18 }
 0x11d   : > { %v2426_v25 = vpop.f32.mrf.mxu1 }
 0x11e   : > { %v2443_v56 = vadd.f32 %v2426_v25, %v2309_v61 }
 0x120   : > { %v2029_v41 = vpop.f32.mrf.mxu2  ;;  %v2297_v19 = vpop.f32.mrf.mxu0 }
 0x121   : > { %v2043_v43 = vadd.f32 %v2029_v41, %v4901_v21 }
 0x124   : > { %v2163_v20 = vpop.f32.mrf.mxu3 }
 0x125   : > { %v2177_v32 = vadd.f32 %v2163_v20, %v2043_v43  ;;  %v2428_v47 = vpop.f32.mrf.mxu1 }
 0x126   : > { %v2444_v61 = vadd.f32 %v2428_v47, %v2310_v16 }
 0x127   : > { %v4923_v29 = vadd.f32 %v2297_v19, %v2177_v32 }
 0x128   : > { %v4925_v13 = vpop.f32.mrf.mxu2  ;;  %v4927_v46 = vpop.f32.mrf.mxu0 }
 0x129   : > { %v2044_v19 = vadd.f32 %v4925_v13, %v4909_v45 }
 0x12c   : > { %v4929_v48 = vpop.f32.mrf.mxu3 }
 0x12d   : > { %v2178_v37 = vadd.f32 %v4929_v48, %v2044_v19 }
 0x12f   : > { %v2312_v45 = vadd.f32 %v4927_v46, %v2178_v37 }
 0x135   : > { %v4931_v59 = vpop.f32.mrf.mxu2 }
 0x136   : > { %v2045_v48 = vadd.f32 %v4931_v59, %v4913_v26 }
 0x13a   : > { %v4933_v52 = vpop.f32.mrf.mxu1 }
 0x13b   : > { %v2445_v47 = vadd.f32 %v4933_v52, %v4923_v29 }
 0x13c   : > { %v4935_v42 = vpop.f32.mrf.mxu0 }
 0x13d   : > { %v4937_v21 = vpop.f32.mrf.mxu2 }
 0x13e   : > { %v4939_v51 = vpop.f32.mrf.mxu3  ;;  %v2046_v26 = vadd.f32 %v4937_v21, %v4919_v17 }
 0x13f   : > { %v2179_v52 = vadd.f32 %v4939_v51, %v2045_v48 }
 0x141   : > { %v2313_v46 = vadd.f32 %v4935_v42, %v2179_v52 }
 0x142   : > { %v4941_v53 = vpop.f32.mrf.mxu1 }
 0x143   : > { %v2446_v29 = vadd.f32 %v4941_v53, %v2312_v45 }
 0x144   : > { %v4943_v4 = vpop.f32.mrf.mxu0 }
 0x145   : > { %v2555_v57 = vpop.f32.mrf.mxu2 }
 0x146   : > { %v4945_v62 = vpop.f32.mrf.mxu3  ;;  %v2575_v38 = vadd.f32 %v2555_v57, %v2441_v5 }
 0x147   : > { %v2180_v53 = vadd.f32 %v4945_v62, %v2046_v26 }
 0x14a   : > { %v4948_v22 = vpop.f32.mrf.mxu1 }
 0x14b   : > { %v2447_v18 = vadd.f32 %v4948_v22, %v2313_v46 }
 0x14c   : > { %v2823_v0 = vpop.f32.mrf.mxu0 }
 0x14d   : > { %v2557_v1 = vpop.f32.mrf.mxu2 }
 0x14e   : > { %v2689_v2 = vpop.f32.mrf.mxu3  ;;  %v2576_v49 = vadd.f32 %v2557_v1, %v2442_v11 }
 0x14f   : > { %v2709_v35 = vadd.f32 %v2689_v2, %v2575_v38 }
 0x151   : > { %v2843_v15 = vadd.f32 %v2823_v0, %v2709_v35 }
 0x152   : > { %v4950_v10 = vpop.f32.mrf.mxu1 }
 0x153   : > { %v2865_v7 = vmul.f32 %v2843_v15, %v2843_v15 }
 0x154   : > { %v2825_v33 = vpop.f32.mrf.mxu0 }
 0x155   : > { %v2560_v24 = vpop.f32.mrf.mxu2 }
 0x156   : > { %v2691_v50 = vpop.f32.mrf.mxu3  ;;  %v2577_v30 = vadd.f32 %v2560_v24, %v2443_v56 }
 0x157   : > { %v2710_v58 = vadd.f32 %v2691_v50, %v2576_v49 }
 0x159   : > { %v2844_v44 = vadd.f32 %v2825_v33, %v2710_v58 }
 0x15a   : > { %v2995_v34 = vpop.f32.mrf.mxu1 }
 0x15b   : > { %v2851_v27 = vadd.f32 %v2844_v44, %v2843_v15  ;;  %v2866_v3 = vmul.f32 %v2844_v44, %v2844_v44  ;;  %v3901_v12 = vpack.c.bf16 %v2844_v44, %v2843_v15  ;;  %3015 = vst [vmem:[%s4958_s29] sm:$0xff] %v2995_v34 }
 0x15c   : > { %v2828_v60 = vpop.f32.mrf.mxu0 }
 0x15d   : > { %v2873_v55 = vadd.f32 %v2866_v3, %v2865_v7  ;;  %3902 = vst [vmem:[%s4963_s13] sm:$0xff] %v3901_v12   ;;  %v2562_v23 = vpop.f32.mrf.mxu2 }
 0x15e   : > { %v2694_v39 = vpop.f32.mrf.mxu3  ;;  %v2578_v43 = vadd.f32 %v2562_v23, %v2444_v61 }
 0x15f   : > { %v2711_v31 = vadd.f32 %v2694_v39, %v2577_v30 }
 0x161   : > { %v2845_v36 = vadd.f32 %v2828_v60, %v2711_v31 }
 0x162   : > { %v2997_v6 = vpop.f32.mrf.mxu1 }
 0x163   : > { %v2852_v8 = vadd.f32 %v2851_v27, %v2845_v36  ;;  %v2867_v14 = vmul.f32 %v2845_v36, %v2845_v36  ;;  %3016 = vst [vmem:[%s4958_s29 + $0x8] sm:$0xff] %v2997_v6 }
 0x164   : > { %v2830_v28 = vpop.f32.mrf.mxu0 }
 0x165   : > { %v2874_v41 = vadd.f32 %v2873_v55, %v2867_v14  ;;  %v2565_v20 = vpop.f32.mrf.mxu2  ;;  %v2314_v55 = vadd.f32 %v4943_v4, %v2180_v53 }
 0x166   : > { %v2696_v32 = vpop.f32.mrf.mxu3  ;;  %v2579_v9 = vadd.f32 %v2565_v20, %v2445_v47 }
 0x167   : > { %v2712_v25 = vadd.f32 %v2696_v32, %v2578_v43  ;;  %v2448_v23 = vadd.f32 %v4950_v10, %v2314_v55 }
 0x169   : > { %v2846_v57 = vadd.f32 %v2830_v28, %v2712_v25 }
 0x16a   : > { %v3000_v63 = vpop.f32.mrf.mxu1 }
 0x16b   : > { %v2853_v54 = vadd.f32 %v2852_v8, %v2846_v57  ;;  %v2868_v0 = vmul.f32 %v2846_v57, %v2846_v57  ;;  %v3906_v1 = vpack.c.bf16 %v2846_v57, %v2845_v36  ;;  %3017 = vst [vmem:[%s4958_s29 + $0x10] sm:$0xff] %v3000_v63 }
 0x16c   : > { %v2833_v2 = vpop.f32.mrf.mxu0 }
 0x16d   : > { %v2875_v5 = vadd.f32 %v2874_v41, %v2868_v0  ;;  %3918 = vst [vmem:[%s4963_s13 + $0x8] sm:$0xff] %v3906_v1   ;;  %v2567_v11 = vpop.f32.mrf.mxu2 }
 0x16e   : > { %v2699_v38 = vpop.f32.mrf.mxu3  ;;  %v2580_v58 = vadd.f32 %v2567_v11, %v2446_v29 }
 0x16f   : > { %v2713_v13 = vadd.f32 %v2699_v38, %v2579_v9 }
 0x171   : > { %v2847_v35 = vadd.f32 %v2833_v2, %v2713_v13 }
 0x172   : > { %v3002_v33 = vpop.f32.mrf.mxu1 }
 0x173   : > { %v2854_v49 = vadd.f32 %v2853_v54, %v2847_v35  ;;  %v2869_v24 = vmul.f32 %v2847_v35, %v2847_v35  ;;  %3018 = vst [vmem:[%s4958_s29 + $0x18] sm:$0xff] %v3002_v33 }
 0x174   : > { %v2835_v50 = vpop.f32.mrf.mxu0 }
 0x175   : > { %v2876_v15 = vadd.f32 %v2875_v5, %v2869_v24  ;;  %v2570_v59 = vpop.f32.mrf.mxu2 }
 0x176   : > { %v2701_v40 = vpop.f32.mrf.mxu3  ;;  %v2581_v12 = vadd.f32 %v2570_v59, %v2447_v18 }
 0x177   : > { %v2714_v44 = vadd.f32 %v2701_v40, %v2580_v58 }
 0x179   : > { %v2848_v56 = vadd.f32 %v2835_v50, %v2714_v44 }
 0x17a   : > { %v3005_v51 = vpop.f32.mrf.mxu1 }
 0x17b   : > { %v2855_v34 = vadd.f32 %v2854_v49, %v2848_v56  ;;  %v2870_v7 = vmul.f32 %v2848_v56, %v2848_v56  ;;  %v3911_v27 = vpack.c.bf16 %v2848_v56, %v2847_v35  ;;  %3019 = vst [vmem:[%s4958_s29 + $0x20] sm:$0xff] %v3005_v51 }
 0x17c   : > { %v2838_v42 = vpop.f32.mrf.mxu0 }
 0x17d   : > { %v2877_v3 = vadd.f32 %v2876_v15, %v2870_v7  ;;  %3919 = vst [vmem:[%s4963_s13 + $0x10] sm:$0xff] %v3911_v27   ;;  %v2572_v30 = vpop.f32.mrf.mxu2 }
 0x17e   : > { %v2704_v60 = vpop.f32.mrf.mxu3  ;;  %v2582_v31 = vadd.f32 %v2572_v30, %v2448_v23 }
 0x17f   : > { %v2715_v17 = vadd.f32 %v2704_v60, %v2581_v12 }
 0x181   : > { %v2849_v21 = vadd.f32 %v2838_v42, %v2715_v17 }
 0x182   : > { %v3007_v62 = vpop.f32.mrf.mxu1 }
 0x183   : > { %v2856_v22 = vadd.f32 %v2855_v34, %v2849_v21  ;;  %v2871_v39 = vmul.f32 %v2849_v21, %v2849_v21  ;;  %3020 = vst [vmem:[%s4958_s29 + $0x28] sm:$0xff] %v3007_v62 }
 0x184   : > { %v2840_v61 = vpop.f32.mrf.mxu0 }
 0x185   : > { %v2878_v16 = vadd.f32 %v2877_v3, %v2871_v39 }
 0x186   : > { %v2706_v36 = vpop.f32.mrf.mxu3 }
 0x187   : > { %v2716_v6 = vadd.f32 %v2706_v36, %v2582_v31 }
 0x189   : > { %v2850_v8 = vadd.f32 %v2840_v61, %v2716_v6 }
 0x18a   : > { %v3010_v14 = vpop.f32.mrf.mxu1 }
 0x18b   : > { %v2857_v4 = vadd.f32 %v2856_v22, %v2850_v8  ;;  %v2872_v28 = vmul.f32 %v2850_v8, %v2850_v8  ;;  %v3916_v41 = vpack.c.bf16 %v2850_v8, %v2849_v21  ;;  %3021 = vst [vmem:[%s4958_s29 + $0x30] sm:$0xff] %v3010_v14 }
 0x18d   : > { %v2858_v43 = vrot.slane %v2857_v4, 4  ;;  %v2879_v10 = vadd.f32 %v2878_v16, %v2872_v28  ;;  %3920 = vst [vmem:[%s4963_s13 + $0x18] sm:$0xff] %v3916_v41  }
 0x18f   : > { %v2859_v20 = vadd.f32 %v2858_v43, %v2857_v4  ;;  %v2880_v32 = vrot.slane %v2879_v10, 4 }
 0x191   : > { %v2860_v25 = vrot.slane %v2859_v20, 2  ;;  %v2881_v19 = vadd.f32 %v2880_v32, %v2879_v10 }
 0x192   : > { %v3012_v57 = vpop.f32.mrf.mxu1 }
 0x193   : > { %v2861_v37 = vadd.f32 %v2860_v25, %v2859_v20  ;;  %v2882_v63 = vrot.slane %v2881_v19, 2  ;;  %3022 = vst [vmem:[%s4958_s29 + $0x38] sm:$0xff] %v3012_v57 }
 0x195   : > { %v2862_v47 = vrot.slane %v2861_v37, 1  ;;  %v2883_v54 = vadd.f32 %v2882_v63, %v2881_v19 }
 0x197   : > { %v2863_v0 = vadd.f32 %v2862_v47, %v2861_v37  ;;  %v2884_v1 = vrot.slane %v2883_v54, 1 }
 0x199   : > { %2864 = vst [vmem:[%s505_s23] sm:$0x1] %v2863_v0  ;;  %v2885_v2 = vadd.f32 %v2884_v1, %v2883_v54 }
 0x19b   : > { %2886 = vst [vmem:[%s511_s26] sm:$0x1] %v2885_v2 }
 0x19c PF: > { %s22_s19 = sadd.s32 1, %s3988_s19   ;;  %s5029_s17 = smov %s3984_s18 }
 0x19d   : > { %p19_p5 = scmp.ge.s32.totalorder %s22_s19, 4   ;;  %s5030_s18 = smov %s5032_s20 }
 0x19f   :  { %21 = sbr.rel (!%p19_p5) target bundleno = 2 (0x2), region = 154 }

</bundles_post_ra>
